<compile_context>
chip_gen: v7x
topology: tpu7x:2x2x1
jax: 0.10.0
libtpu: 0.0.40
codegen_flags: <defaults>
</compile_context>

<pallas_src>
import jax
import jax.numpy as jnp
from jax.experimental import pallas as pl
from jax.experimental.pallas import tpu as pltpu

# ----------------------------- configuration -------------------------------
INPUT_SIZE = 8
OUTPUT_SIZE = 8
CONTROLLER_SIZE = 32
ST_N, ST_M = 16, 16          # short_term_memory = (N, M)
LT_NODES, LT_DIM = 12, 16    # long_term_memory  = (num_nodes, node_dim)
SEQ_LEN = 4
BATCH = 2
EPS = 1e-8                   # torch.cosine_similarity eps

CONCAT_DIM = INPUT_SIZE + ST_M + 3 * LT_DIM           # 72
HEADS_DIM = ST_N + 2 * ST_M + LT_NODES + 2 * LT_DIM   # 92


# ------------------------------- helpers ------------------------------------
def _softmax(x):
    m = jnp.max(x, axis=-1, keepdims=True)
    e = jnp.exp(x - m)
    s = jnp.sum(e, axis=-1, keepdims=True)
    # EUP reciprocal (softmax denominator off the VALU critical path).
    return e * pl.reciprocal(s, approx=True)


def _l2_normalize(x):
    # x / max(||x||, EPS)  ==  x * rsqrt(max(||x||^2, EPS^2))
    sq = jnp.sum(x * x, axis=-1, keepdims=True)
    return x * jax.lax.rsqrt(jnp.maximum(sq, EPS * EPS))


# ------------------------------- kernel ------------------------------------
def dual_ntm_kernel(
    x_ref,       # [T, B, I]
    w_key_ref,   # [I, M + LD]
    b_key_ref,   # [1, M + LD]
    w_ctrl_ref,  # [CONCAT_DIM + H, H]   (w_ih ‖ w_hh, stacked on rows)
    b_h_ref,     # [1, H]
    w_oh_ref,    # [H, O + HEADS_DIM]    (w_out ‖ w_heads, stacked on cols)
    b_oh_ref,    # [1, O + HEADS_DIM]
    out_ref,     # [T, B, O]
):
    f32 = jnp.float32
    T, B, _ = x_ref.shape

    # ---- hoist all weights / biases (single VMEM read, single broadcast) ----
    w_key = w_key_ref[...]
    b_key = b_key_ref[...]
    w_ctrl = w_ctrl_ref[...]
    b_h = b_h_ref[...]
    w_oh = w_oh_ref[...]
    b_oh = b_oh_ref[...]

    # ---- block-diagonal selection masks (batch folded into sublanes) ----
    def batch_mask(k):
        # [B, B*k] : 1.0 where the column belongs to the row's batch block.
        r = jax.lax.broadcasted_iota(jnp.int32, (B, B * k), 0)
        c = jax.lax.broadcasted_iota(jnp.int32, (B, B * k), 1)
        return jnp.where((c >= r * k) & (c < (r + 1) * k), 1.0, 0.0)

    def batch_mask_t(k):
        # [B*k, B] : transpose of batch_mask(k), built directly (no vxpose).
        r = jax.lax.broadcasted_iota(jnp.int32, (B * k, B), 0)
        c = jax.lax.broadcasted_iota(jnp.int32, (B * k, B), 1)
        return jnp.where((r >= c * k) & (r < (c + 1) * k), 1.0, 0.0)

    sel_st = batch_mask(ST_N)          # [B, B*N]
    sel_lt = batch_mask(LT_NODES)      # [B, B*LN]
    sel_ltT = batch_mask_t(LT_NODES)   # [B*LN, B]

    def block_diag(x, k):
        # [B, B*k] -> [B, k] : keep each row's own batch block (static slices).
        return jnp.concatenate(
            [x[b:b + 1, b * k:(b + 1) * k] for b in range(B)], axis=0)

    def expand_masked(w, sel):
        # [B, k] dense per-batch weights -> [B, B*k] block-diagonal layout.
        return jnp.tile(w, (1, B)) * sel

    # ---- init_sequence(): initial recurrent state (values, not scratch) ----
    mem = jnp.full((B * ST_N, ST_M), 1e-6, f32)           # short-term memory
    nodes = jnp.full((B * LT_NODES, LT_DIM), 1e-6, f32)   # graph node features
    adj = jnp.zeros((B * LT_NODES, LT_NODES), f32)        # graph adjacency
    hidden = jnp.zeros((B, CONTROLLER_SIZE), f32)         # controller hidden
    prev_w_lt_m = jnp.zeros((B, B * LT_NODES), f32)       # previous LT write w

    o0 = ST_N
    o1 = o0 + ST_M
    o2 = o1 + ST_M
    o3 = o2 + LT_NODES
    o4 = o3 + LT_DIM

    # T is a trace-time constant: the recurrence is fully unrolled so the
    # scheduler sees the whole hidden[t-1] -> hidden[t] dependence chain.
    for t in range(T):
        x = x_ref[t]                                      # [B, I]

        # -- controller key generation (one fused linear for both keys) --
        key_all = jnp.dot(x, w_key, preferred_element_type=f32) + b_key
        key_st = key_all[:, :ST_M]                        # [B, M]
        key_lt = key_all[:, ST_M:]                        # [B, LD]

        # -- short-term read: cosine content addressing + softmax --
        mem_hat = _l2_normalize(mem)                      # [B*N, M]
        sim_st = jax.lax.dot_general(
            _l2_normalize(key_st), mem_hat,
            (((1,), (1,)), ((), ())), preferred_element_type=f32)  # [B, B*N]
        w_st_read = _softmax(block_diag(sim_st, ST_N))    # [B, N]
        w_st_read_m = expand_masked(w_st_read, sel_st)    # [B, B*N]
        st_read = jnp.dot(w_st_read_m, mem, preferred_element_type=f32)  # [B, M]

        # -- long-term (graph) read --
        nodes_hat = _l2_normalize(nodes)                  # [B*LN, LD]
        sim_lt = jax.lax.dot_general(
            _l2_normalize(key_lt), nodes_hat,
            (((1,), (1,)), ((), ())), preferred_element_type=f32)  # [B, B*LN]
        w_lt_read = _softmax(block_diag(sim_lt, LT_NODES))  # [B, LN]
        w_lt_read_m = expand_masked(w_lt_read, sel_lt)      # [B, B*LN]
        ltm_normal = jnp.dot(w_lt_read_m, nodes,
                             preferred_element_type=f32)    # [B, LD]
        w_fwd = jnp.dot(w_lt_read_m, adj,
                        preferred_element_type=f32)         # [B, LN]
        ltm_forward = jnp.dot(expand_masked(w_fwd, sel_lt), nodes,
                              preferred_element_type=f32)   # [B, LD]
        # backward: w_bwd[b,k] = sum_j adj[b,k,j] * w_lt_read[b,j]
        bwd_all = jax.lax.dot_general(
            adj, w_lt_read, (((1,), (1,)), ((), ())),
            preferred_element_type=f32)                     # [B*LN, B]
        ltm_backward = jax.lax.dot_general(
            bwd_all * sel_ltT, nodes, (((0,), (0,)), ((), ())),
            preferred_element_type=f32)                     # [B, LD]

        # -- controller forward (w_ih ‖ w_hh fused into a single matmul) --
        ctrl_in = jnp.concatenate(
            [x, st_read, ltm_normal, ltm_forward, ltm_backward, hidden],
            axis=1)                                         # [B, CONCAT_DIM+H]
        hidden = jnp.tanh(
            jnp.dot(ctrl_in, w_ctrl, preferred_element_type=f32) + b_h)

        # -- output + write-head parameters (w_out ‖ w_heads fused) --
        oh = jnp.dot(hidden, w_oh, preferred_element_type=f32) + b_oh
        out_ref[t] = oh[:, :OUTPUT_SIZE].astype(out_ref.dtype)  # VMEM store;
        # the HBM write-back of out_ref happens once when the kernel finishes.
        heads = oh[:, OUTPUT_SIZE:]                         # [B, HEADS_DIM]

        w_st = _softmax(heads[:, :o0])                      # [B, N]
        e_st = jax.nn.sigmoid(heads[:, o0:o1])              # [B, M]
        a_st = jnp.tanh(heads[:, o1:o2])                    # [B, M]
        w_lt = _softmax(heads[:, o2:o3])                    # [B, LN]
        e_lt = jax.nn.sigmoid(heads[:, o3:o4])              # [B, LD]
        a_lt = jnp.tanh(heads[:, o4:])                      # [B, LD]

        # -- short-term write: mem = mem * (1 - w^T e) + w^T a  (per batch) --
        w_st_m = expand_masked(w_st, sel_st)                # [B, B*N]
        erase_st = jax.lax.dot_general(
            w_st_m, e_st, (((0,), (0,)), ((), ())),
            preferred_element_type=f32)                     # [B*N, M]
        add_st = jax.lax.dot_general(
            w_st_m, a_st, (((0,), (0,)), ((), ())),
            preferred_element_type=f32)                     # [B*N, M]
        mem = mem * (1.0 - erase_st) + add_st

        # -- long-term write: node update + adjacency link (prev_w ⊗ w_lt) --
        w_lt_m = expand_masked(w_lt, sel_lt)                # [B, B*LN]
        erase_lt = jax.lax.dot_general(
            w_lt_m, e_lt, (((0,), (0,)), ((), ())),
            preferred_element_type=f32)                     # [B*LN, LD]
        add_lt = jax.lax.dot_general(
            w_lt_m, a_lt, (((0,), (0,)), ((), ())),
            preferred_element_type=f32)                     # [B*LN, LD]
        nodes = nodes * (1.0 - erase_lt) + add_lt

        adj = adj + jax.lax.dot_general(
            prev_w_lt_m, w_lt, (((0,), (0,)), ((), ())),
            preferred_element_type=f32)                     # [B*LN, LN]
        prev_w_lt_m = w_lt_m                                # detach == value copy


# ------------------------------- wrapper ------------------------------------
@jax.jit
def dual_memory_ntm_forward(input_seq, params):
    T, B, _ = input_seq.shape

    # Fuse the controller / head projections outside the kernel; the params
    # dict keeps the original (checkpoint-compatible) split.
    w_ctrl = jnp.concatenate([params["w_ih"], params["w_hh"]], axis=0)
    w_oh = jnp.concatenate([params["w_out"], params["w_heads"]], axis=1)
    b_oh = jnp.concatenate([params["b_out"], params["b_heads"]], axis=1)

    def vmem_spec():
        return pl.BlockSpec(memory_space=pltpu.MemorySpace.VMEM)

    # No grid: the whole (tiny) problem lives in VMEM for a single invocation;
    # the time recurrence is unrolled inside the kernel.
    return pl.pallas_call(
        dual_ntm_kernel,
        out_shape=jax.ShapeDtypeStruct((T, B, OUTPUT_SIZE), jnp.float32),
        in_specs=[vmem_spec() for _ in range(7)],
        out_specs=vmem_spec(),
    )(
        input_seq,
        params["w_key"], params["b_key"],
        w_ctrl, params["b_h"],
        w_oh, b_oh,
    )


def init_params(key):
    ks = jax.random.split(key, 6)
    scale = 0.1
    return {
        "w_key": scale * jax.random.normal(ks[0], (INPUT_SIZE, ST_M + LT_DIM), jnp.float32),
        "b_key": jnp.zeros((1, ST_M + LT_DIM), jnp.float32),
        "w_ih": scale * jax.random.normal(ks[1], (CONCAT_DIM, CONTROLLER_SIZE), jnp.float32),
        "b_h": jnp.zeros((1, CONTROLLER_SIZE), jnp.float32),
        "w_hh": scale * jax.random.normal(ks[2], (CONTROLLER_SIZE, CONTROLLER_SIZE), jnp.float32),
        "w_out": scale * jax.random.normal(ks[3], (CONTROLLER_SIZE, OUTPUT_SIZE), jnp.float32),
        "b_out": jnp.zeros((1, OUTPUT_SIZE), jnp.float32),
        "w_heads": scale * jax.random.normal(ks[4], (CONTROLLER_SIZE, HEADS_DIM), jnp.float32),
        "b_heads": jnp.zeros((1, HEADS_DIM), jnp.float32),
    }


if __name__ == "__main__":
    root = jax.random.PRNGKey(0)
    k_par, k_inp = jax.random.split(root)
    params = init_params(k_par)
    input_seq = jax.random.normal(
        k_inp, (SEQ_LEN, BATCH, INPUT_SIZE), jnp.float32
    )

    out = dual_memory_ntm_forward(input_seq, params)
    out = jax.block_until_ready(out)

    assert out.shape == (SEQ_LEN, BATCH, OUTPUT_SIZE)
    assert bool(jnp.all(jnp.isfinite(out)))
    print("KERNEL_OK")
</pallas_src>

<mosaic_0001>
module attributes {stable_mosaic.version = 11 : i64} {
  func.func @dual_ntm_kernel(%arg0: memref<4x2x8xf32, #tpu.memory_space<vmem>>, %arg1: memref<8x32xf32, #tpu.memory_space<vmem>>, %arg2: memref<1x32xf32, #tpu.memory_space<vmem>>, %arg3: memref<104x32xf32, #tpu.memory_space<vmem>>, %arg4: memref<1x32xf32, #tpu.memory_space<vmem>>, %arg5: memref<32x100xf32, #tpu.memory_space<vmem>>, %arg6: memref<1x100xf32, #tpu.memory_space<vmem>>, %arg7: memref<4x2x8xf32, #tpu.memory_space<vmem>>) attributes {dimension_semantics = [], scalar_prefetch = 0 : i64, scratch_operands = 0 : i64, tpu.core_type = #tpu.core_type<tc>} {
    %c0 = arith.constant 0 : index
    %c0_0 = arith.constant 0 : index
    %0 = vector.load %arg1[%c0, %c0_0] : memref<8x32xf32, #tpu.memory_space<vmem>>, vector<8x32xf32>
    %c0_1 = arith.constant 0 : index
    %c0_2 = arith.constant 0 : index
    %1 = vector.load %arg2[%c0_1, %c0_2] : memref<1x32xf32, #tpu.memory_space<vmem>>, vector<1x32xf32>
    %c0_3 = arith.constant 0 : index
    %c0_4 = arith.constant 0 : index
    %2 = vector.load %arg3[%c0_3, %c0_4] : memref<104x32xf32, #tpu.memory_space<vmem>>, vector<104x32xf32>
    %c0_5 = arith.constant 0 : index
    %c0_6 = arith.constant 0 : index
    %3 = vector.load %arg4[%c0_5, %c0_6] : memref<1x32xf32, #tpu.memory_space<vmem>>, vector<1x32xf32>
    %c0_7 = arith.constant 0 : index
    %c0_8 = arith.constant 0 : index
    %4 = vector.load %arg5[%c0_7, %c0_8] : memref<32x100xf32, #tpu.memory_space<vmem>>, vector<32x100xf32>
    %c0_9 = arith.constant 0 : index
    %c0_10 = arith.constant 0 : index
    %5 = vector.load %arg6[%c0_9, %c0_10] : memref<1x100xf32, #tpu.memory_space<vmem>>, vector<1x100xf32>
    %6 = tpu.iota {dimensions = array<i32: 0>} : vector<2x32xi32>
    %7 = tpu.iota {dimensions = array<i32: 1>} : vector<2x32xi32>
    %c16_i32 = arith.constant 16 : i32
    %8 = vector.broadcast %c16_i32 : i32 to vector<2x32xi32>
    %9 = arith.muli %6, %8 : vector<2x32xi32>
    %10 = arith.cmpi sge, %7, %9 : vector<2x32xi32>
    %c1_i32 = arith.constant 1 : i32
    %11 = vector.broadcast %c1_i32 : i32 to vector<2x32xi32>
    %12 = arith.addi %6, %11 : vector<2x32xi32>
    %c16_i32_11 = arith.constant 16 : i32
    %13 = vector.broadcast %c16_i32_11 : i32 to vector<2x32xi32>
    %14 = arith.muli %12, %13 : vector<2x32xi32>
    %15 = arith.cmpi slt, %7, %14 : vector<2x32xi32>
    %16 = arith.andi %10, %15 : vector<2x32xi1>
    %cst = arith.constant 1.000000e+00 : f32
    %cst_12 = arith.constant 0.000000e+00 : f32
    %17 = vector.broadcast %cst : f32 to vector<2x32xf32>
    %18 = vector.broadcast %cst_12 : f32 to vector<2x32xf32>
    %19 = arith.select %16, %17, %18 : vector<2x32xi1>, vector<2x32xf32>
    %20 = tpu.iota {dimensions = array<i32: 0>} : vector<2x24xi32>
    %21 = tpu.iota {dimensions = array<i32: 1>} : vector<2x24xi32>
    %c12_i32 = arith.constant 12 : i32
    %22 = vector.broadcast %c12_i32 : i32 to vector<2x24xi32>
    %23 = arith.muli %20, %22 : vector<2x24xi32>
    %24 = arith.cmpi sge, %21, %23 : vector<2x24xi32>
    %c1_i32_13 = arith.constant 1 : i32
    %25 = vector.broadcast %c1_i32_13 : i32 to vector<2x24xi32>
    %26 = arith.addi %20, %25 : vector<2x24xi32>
    %c12_i32_14 = arith.constant 12 : i32
    %27 = vector.broadcast %c12_i32_14 : i32 to vector<2x24xi32>
    %28 = arith.muli %26, %27 : vector<2x24xi32>
    %29 = arith.cmpi slt, %21, %28 : vector<2x24xi32>
    %30 = arith.andi %24, %29 : vector<2x24xi1>
    %cst_15 = arith.constant 1.000000e+00 : f32
    %cst_16 = arith.constant 0.000000e+00 : f32
    %31 = vector.broadcast %cst_15 : f32 to vector<2x24xf32>
    %32 = vector.broadcast %cst_16 : f32 to vector<2x24xf32>
    %33 = arith.select %30, %31, %32 : vector<2x24xi1>, vector<2x24xf32>
    %34 = tpu.iota {dimensions = array<i32: 0>} : vector<24x2xi32>
    %35 = tpu.iota {dimensions = array<i32: 1>} : vector<24x2xi32>
    %c12_i32_17 = arith.constant 12 : i32
    %36 = vector.broadcast %c12_i32_17 : i32 to vector<24x2xi32>
    %37 = arith.muli %35, %36 : vector<24x2xi32>
    %38 = arith.cmpi sge, %34, %37 : vector<24x2xi32>
    %c1_i32_18 = arith.constant 1 : i32
    %39 = vector.broadcast %c1_i32_18 : i32 to vector<24x2xi32>
    %40 = arith.addi %35, %39 : vector<24x2xi32>
    %c12_i32_19 = arith.constant 12 : i32
    %41 = vector.broadcast %c12_i32_19 : i32 to vector<24x2xi32>
    %42 = arith.muli %40, %41 : vector<24x2xi32>
    %43 = arith.cmpi slt, %34, %42 : vector<24x2xi32>
    %44 = arith.andi %38, %43 : vector<24x2xi1>
    %cst_20 = arith.constant 1.000000e+00 : f32
    %cst_21 = arith.constant 0.000000e+00 : f32
    %45 = vector.broadcast %cst_20 : f32 to vector<24x2xf32>
    %46 = vector.broadcast %cst_21 : f32 to vector<24x2xf32>
    %47 = arith.select %44, %45, %46 : vector<24x2xi1>, vector<24x2xf32>
    %cst_22 = arith.constant 9.99999997E-7 : f32
    %48 = vector.broadcast %cst_22 : f32 to vector<32x16xf32>
    %cst_23 = arith.constant 9.99999997E-7 : f32
    %49 = vector.broadcast %cst_23 : f32 to vector<24x16xf32>
    %cst_24 = arith.constant 0.000000e+00 : f32
    %50 = vector.broadcast %cst_24 : f32 to vector<24x12xf32>
    %cst_25 = arith.constant 0.000000e+00 : f32
    %51 = vector.broadcast %cst_25 : f32 to vector<2x32xf32>
    %cst_26 = arith.constant 0.000000e+00 : f32
    %52 = vector.broadcast %cst_26 : f32 to vector<2x24xf32>
    %c0_27 = arith.constant 0 : index
    %c0_28 = arith.constant 0 : index
    %c0_29 = arith.constant 0 : index
    %53 = vector.load %arg0[%c0_27, %c0_28, %c0_29] : memref<4x2x8xf32, #tpu.memory_space<vmem>>, vector<1x2x8xf32>
    %54 = vector.shape_cast %53 : vector<1x2x8xf32> to vector<2x8xf32>
    %cst_30 = arith.constant dense<0.000000e+00> : vector<2x32xf32>
    %55 = tpu.matmul %54, %0, %cst_30 {dimension_numbers = #tpu.dot_dimension_numbers<[1], [0], [0], [1], [0, 0, 1, 1], [], []>} : vector<2x8xf32>, vector<8x32xf32>, vector<2x32xf32> -> vector<2x32xf32>
    %56 = vector.broadcast %1 : vector<1x32xf32> to vector<2x32xf32>
    %57 = arith.addf %55, %56 : vector<2x32xf32>
    %58 = vector.extract_strided_slice %57 {offsets = [0, 0], sizes = [2, 16], strides = [1, 1]} : vector<2x32xf32> to vector<2x16xf32>
    %59 = vector.extract_strided_slice %57 {offsets = [0, 16], sizes = [2, 16], strides = [1, 1]} : vector<2x32xf32> to vector<2x16xf32>
    %60 = arith.mulf %48, %48 : vector<32x16xf32>
    %cst_31 = arith.constant dense<0.000000e+00> : vector<32xf32>
    %61 = vector.multi_reduction <add>, %60, %cst_31 [1] : vector<32x16xf32> to vector<32xf32>
    %62 = vector.shape_cast %61 : vector<32xf32> to vector<32x1xf32>
    %cst_32 = arith.constant 1.000000e-16 : f32
    %63 = vector.broadcast %cst_32 : f32 to vector<32x1xf32>
    %64 = arith.maximumf %62, %63 : vector<32x1xf32>
    %65 = math.rsqrt %64 : vector<32x1xf32>
    %66 = vector.broadcast %65 : vector<32x1xf32> to vector<32x16xf32>
    %67 = arith.mulf %48, %66 : vector<32x16xf32>
    %68 = arith.mulf %58, %58 : vector<2x16xf32>
    %cst_33 = arith.constant dense<0.000000e+00> : vector<2xf32>
    %69 = vector.multi_reduction <add>, %68, %cst_33 [1] : vector<2x16xf32> to vector<2xf32>
    %70 = vector.shape_cast %69 : vector<2xf32> to vector<2x1xf32>
    %cst_34 = arith.constant 1.000000e-16 : f32
    %71 = vector.broadcast %cst_34 : f32 to vector<2x1xf32>
    %72 = arith.maximumf %70, %71 : vector<2x1xf32>
    %73 = math.rsqrt %72 : vector<2x1xf32>
    %74 = vector.broadcast %73 : vector<2x1xf32> to vector<2x16xf32>
    %75 = arith.mulf %58, %74 : vector<2x16xf32>
    %cst_35 = arith.constant dense<0.000000e+00> : vector<2x32xf32>
    %76 = tpu.matmul %75, %67, %cst_35 {dimension_numbers = #tpu.dot_dimension_numbers<[1], [1], [0], [0], [0, 0, 1, 0], [], []>} : vector<2x16xf32>, vector<32x16xf32>, vector<2x32xf32> -> vector<2x32xf32>
    %77 = vector.extract_strided_slice %76 {offsets = [0, 0], sizes = [1, 16], strides = [1, 1]} : vector<2x32xf32> to vector<1x16xf32>
    %78 = vector.extract_strided_slice %76 {offsets = [1, 16], sizes = [1, 16], strides = [1, 1]} : vector<2x32xf32> to vector<1x16xf32>
    %79 = tpu.concatenate %77, %78 in 0 : vector<1x16xf32>, vector<1x16xf32> -> vector<2x16xf32>
    %cst_36 = arith.constant dense<0xFF800000> : vector<2xf32>
    %80 = vector.multi_reduction <maximumf>, %79, %cst_36 [1] : vector<2x16xf32> to vector<2xf32>
    %81 = vector.shape_cast %80 : vector<2xf32> to vector<2x1xf32>
    %82 = vector.broadcast %81 : vector<2x1xf32> to vector<2x16xf32>
    %83 = arith.subf %79, %82 : vector<2x16xf32>
    %84 = math.exp %83 : vector<2x16xf32>
    %cst_37 = arith.constant dense<0.000000e+00> : vector<2xf32>
    %85 = vector.multi_reduction <add>, %84, %cst_37 [1] : vector<2x16xf32> to vector<2xf32>
    %86 = vector.shape_cast %85 : vector<2xf32> to vector<2x1xf32>
    %87 = tpu.reciprocal %86 {approx = true} : vector<2x1xf32> -> vector<2x1xf32>
    %88 = vector.broadcast %87 : vector<2x1xf32> to vector<2x16xf32>
    %89 = arith.mulf %84, %88 : vector<2x16xf32>
    %90 = tpu.concatenate %89, %89 in 1 : vector<2x16xf32>, vector<2x16xf32> -> vector<2x32xf32>
    %91 = arith.mulf %90, %19 : vector<2x32xf32>
    %cst_38 = arith.constant dense<0.000000e+00> : vector<2x16xf32>
    %92 = tpu.matmul %91, %48, %cst_38 {dimension_numbers = #tpu.dot_dimension_numbers<[1], [0], [0], [1], [0, 0, 1, 1], [], []>} : vector<2x32xf32>, vector<32x16xf32>, vector<2x16xf32> -> vector<2x16xf32>
    %93 = arith.mulf %49, %49 : vector<24x16xf32>
    %cst_39 = arith.constant dense<0.000000e+00> : vector<24xf32>
    %94 = vector.multi_reduction <add>, %93, %cst_39 [1] : vector<24x16xf32> to vector<24xf32>
    %95 = vector.shape_cast %94 : vector<24xf32> to vector<24x1xf32>
    %cst_40 = arith.constant 1.000000e-16 : f32
    %96 = vector.broadcast %cst_40 : f32 to vector<24x1xf32>
    %97 = arith.maximumf %95, %96 : vector<24x1xf32>
    %98 = math.rsqrt %97 : vector<24x1xf32>
    %99 = vector.broadcast %98 : vector<24x1xf32> to vector<24x16xf32>
    %100 = arith.mulf %49, %99 : vector<24x16xf32>
    %101 = arith.mulf %59, %59 : vector<2x16xf32>
    %cst_41 = arith.constant dense<0.000000e+00> : vector<2xf32>
    %102 = vector.multi_reduction <add>, %101, %cst_41 [1] : vector<2x16xf32> to vector<2xf32>
    %103 = vector.shape_cast %102 : vector<2xf32> to vector<2x1xf32>
    %cst_42 = arith.constant 1.000000e-16 : f32
    %104 = vector.broadcast %cst_42 : f32 to vector<2x1xf32>
    %105 = arith.maximumf %103, %104 : vector<2x1xf32>
    %106 = math.rsqrt %105 : vector<2x1xf32>
    %107 = vector.broadcast %106 : vector<2x1xf32> to vector<2x16xf32>
    %108 = arith.mulf %59, %107 : vector<2x16xf32>
    %cst_43 = arith.constant dense<0.000000e+00> : vector<2x24xf32>
    %109 = tpu.matmul %108, %100, %cst_43 {dimension_numbers = #tpu.dot_dimension_numbers<[1], [1], [0], [0], [0, 0, 1, 0], [], []>} : vector<2x16xf32>, vector<24x16xf32>, vector<2x24xf32> -> vector<2x24xf32>
    %110 = vector.extract_strided_slice %109 {offsets = [0, 0], sizes = [1, 12], strides = [1, 1]} : vector<2x24xf32> to vector<1x12xf32>
    %111 = vector.extract_strided_slice %109 {offsets = [1, 12], sizes = [1, 12], strides = [1, 1]} : vector<2x24xf32> to vector<1x12xf32>
    %112 = tpu.concatenate %110, %111 in 0 : vector<1x12xf32>, vector<1x12xf32> -> vector<2x12xf32>
    %cst_44 = arith.constant dense<0xFF800000> : vector<2xf32>
    %113 = vector.multi_reduction <maximumf>, %112, %cst_44 [1] : vector<2x12xf32> to vector<2xf32>
    %114 = vector.shape_cast %113 : vector<2xf32> to vector<2x1xf32>
    %115 = vector.broadcast %114 : vector<2x1xf32> to vector<2x12xf32>
    %116 = arith.subf %112, %115 : vector<2x12xf32>
    %117 = math.exp %116 : vector<2x12xf32>
    %cst_45 = arith.constant dense<0.000000e+00> : vector<2xf32>
    %118 = vector.multi_reduction <add>, %117, %cst_45 [1] : vector<2x12xf32> to vector<2xf32>
    %119 = vector.shape_cast %118 : vector<2xf32> to vector<2x1xf32>
    %120 = tpu.reciprocal %119 {approx = true} : vector<2x1xf32> -> vector<2x1xf32>
    %121 = vector.broadcast %120 : vector<2x1xf32> to vector<2x12xf32>
    %122 = arith.mulf %117, %121 : vector<2x12xf32>
    %123 = tpu.concatenate %122, %122 in 1 : vector<2x12xf32>, vector<2x12xf32> -> vector<2x24xf32>
    %124 = arith.mulf %123, %33 : vector<2x24xf32>
    %cst_46 = arith.constant dense<0.000000e+00> : vector<2x16xf32>
    %125 = tpu.matmul %124, %49, %cst_46 {dimension_numbers = #tpu.dot_dimension_numbers<[1], [0], [0], [1], [0, 0, 1, 1], [], []>} : vector<2x24xf32>, vector<24x16xf32>, vector<2x16xf32> -> vector<2x16xf32>
    %cst_47 = arith.constant dense<0.000000e+00> : vector<2x12xf32>
    %126 = tpu.matmul %124, %50, %cst_47 {dimension_numbers = #tpu.dot_dimension_numbers<[1], [0], [0], [1], [0, 0, 1, 1], [], []>} : vector<2x24xf32>, vector<24x12xf32>, vector<2x12xf32> -> vector<2x12xf32>
    %127 = tpu.concatenate %126, %126 in 1 : vector<2x12xf32>, vector<2x12xf32> -> vector<2x24xf32>
    %128 = arith.mulf %127, %33 : vector<2x24xf32>
    %cst_48 = arith.constant dense<0.000000e+00> : vector<2x16xf32>
    %129 = tpu.matmul %128, %49, %cst_48 {dimension_numbers = #tpu.dot_dimension_numbers<[1], [0], [0], [1], [0, 0, 1, 1], [], []>} : vector<2x24xf32>, vector<24x16xf32>, vector<2x16xf32> -> vector<2x16xf32>
    %cst_49 = arith.constant dense<0.000000e+00> : vector<24x2xf32>
    %130 = tpu.matmul %50, %122, %cst_49 {dimension_numbers = #tpu.dot_dimension_numbers<[1], [1], [0], [0], [0, 0, 1, 0], [], []>} : vector<24x12xf32>, vector<2x12xf32>, vector<24x2xf32> -> vector<24x2xf32>
    %131 = arith.mulf %130, %47 : vector<24x2xf32>
    %cst_50 = arith.constant dense<0.000000e+00> : vector<2x16xf32>
    %132 = tpu.matmul %131, %49, %cst_50 {dimension_numbers = #tpu.dot_dimension_numbers<[0], [0], [1], [1], [0, 1, 1, 1], [], []>} : vector<24x2xf32>, vector<24x16xf32>, vector<2x16xf32> -> vector<2x16xf32>
    %133 = tpu.concatenate %54, %92, %125, %129, %132, %51 in 1 : vector<2x8xf32>, vector<2x16xf32>, vector<2x16xf32>, vector<2x16xf32>, vector<2x16xf32>, vector<2x32xf32> -> vector<2x104xf32>
    %cst_51 = arith.constant dense<0.000000e+00> : vector<2x32xf32>
    %134 = tpu.matmul %133, %2, %cst_51 {dimension_numbers = #tpu.dot_dimension_numbers<[1], [0], [0], [1], [0, 0, 1, 1], [], []>} : vector<2x104xf32>, vector<104x32xf32>, vector<2x32xf32> -> vector<2x32xf32>
    %135 = vector.broadcast %3 : vector<1x32xf32> to vector<2x32xf32>
    %136 = arith.addf %134, %135 : vector<2x32xf32>
    %137 = math.tanh %136 : vector<2x32xf32>
    %cst_52 = arith.constant dense<0.000000e+00> : vector<2x100xf32>
    %138 = tpu.matmul %137, %4, %cst_52 {dimension_numbers = #tpu.dot_dimension_numbers<[1], [0], [0], [1], [0, 0, 1, 1], [], []>} : vector<2x32xf32>, vector<32x100xf32>, vector<2x100xf32> -> vector<2x100xf32>
    %139 = vector.broadcast %5 : vector<1x100xf32> to vector<2x100xf32>
    %140 = arith.addf %138, %139 : vector<2x100xf32>
    %141 = vector.extract_strided_slice %140 {offsets = [0, 0], sizes = [2, 8], strides = [1, 1]} : vector<2x100xf32> to vector<2x8xf32>
    %c0_53 = arith.constant 0 : index
    %c0_54 = arith.constant 0 : index
    %c0_55 = arith.constant 0 : index
    %142 = vector.load %arg7[%c0_53, %c0_54, %c0_55] : memref<4x2x8xf32, #tpu.memory_space<vmem>>, vector<1x2x8xf32>
    %143 = vector.shape_cast %142 : vector<1x2x8xf32> to vector<2x8xf32>
    %144 = vector.shape_cast %141 : vector<2x8xf32> to vector<1x2x8xf32>
    tpu.vector_store %arg7[%c0_53, %c0_54, %c0_55], %144 {strides = array<i32>} : memref<4x2x8xf32, #tpu.memory_space<vmem>>, vector<1x2x8xf32>,
    %145 = vector.extract_strided_slice %140 {offsets = [0, 8], sizes = [2, 92], strides = [1, 1]} : vector<2x100xf32> to vector<2x92xf32>
    %146 = vector.extract_strided_slice %145 {offsets = [0, 0], sizes = [2, 16], strides = [1, 1]} : vector<2x92xf32> to vector<2x16xf32>
    %cst_56 = arith.constant dense<0xFF800000> : vector<2xf32>
    %147 = vector.multi_reduction <maximumf>, %146, %cst_56 [1] : vector<2x16xf32> to vector<2xf32>
    %148 = vector.shape_cast %147 : vector<2xf32> to vector<2x1xf32>
    %149 = vector.broadcast %148 : vector<2x1xf32> to vector<2x16xf32>
    %150 = arith.subf %146, %149 : vector<2x16xf32>
    %151 = math.exp %150 : vector<2x16xf32>
    %cst_57 = arith.constant dense<0.000000e+00> : vector<2xf32>
    %152 = vector.multi_reduction <add>, %151, %cst_57 [1] : vector<2x16xf32> to vector<2xf32>
    %153 = vector.shape_cast %152 : vector<2xf32> to vector<2x1xf32>
    %154 = tpu.reciprocal %153 {approx = true} : vector<2x1xf32> -> vector<2x1xf32>
    %155 = vector.broadcast %154 : vector<2x1xf32> to vector<2x16xf32>
    %156 = arith.mulf %151, %155 : vector<2x16xf32>
    %157 = vector.extract_strided_slice %145 {offsets = [0, 16], sizes = [2, 16], strides = [1, 1]} : vector<2x92xf32> to vector<2x16xf32>
    %158 = arith.negf %157 : vector<2x16xf32>
    %159 = math.exp %158 : vector<2x16xf32>
    %cst_58 = arith.constant 1.000000e+00 : f32
    %160 = vector.broadcast %cst_58 : f32 to vector<2x16xf32>
    %161 = arith.addf %160, %159 : vector<2x16xf32>
    %162 = arith.divf %160, %161 : vector<2x16xf32>
    %163 = vector.extract_strided_slice %145 {offsets = [0, 32], sizes = [2, 16], strides = [1, 1]} : vector<2x92xf32> to vector<2x16xf32>
    %164 = math.tanh %163 : vector<2x16xf32>
    %165 = vector.extract_strided_slice %145 {offsets = [0, 48], sizes = [2, 12], strides = [1, 1]} : vector<2x92xf32> to vector<2x12xf32>
    %cst_59 = arith.constant dense<0xFF800000> : vector<2xf32>
    %166 = vector.multi_reduction <maximumf>, %165, %cst_59 [1] : vector<2x12xf32> to vector<2xf32>
    %167 = vector.shape_cast %166 : vector<2xf32> to vector<2x1xf32>
    %168 = vector.broadcast %167 : vector<2x1xf32> to vector<2x12xf32>
    %169 = arith.subf %165, %168 : vector<2x12xf32>
    %170 = math.exp %169 : vector<2x12xf32>
    %cst_60 = arith.constant dense<0.000000e+00> : vector<2xf32>
    %171 = vector.multi_reduction <add>, %170, %cst_60 [1] : vector<2x12xf32> to vector<2xf32>
    %172 = vector.shape_cast %171 : vector<2xf32> to vector<2x1xf32>
    %173 = tpu.reciprocal %172 {approx = true} : vector<2x1xf32> -> vector<2x1xf32>
    %174 = vector.broadcast %173 : vector<2x1xf32> to vector<2x12xf32>
    %175 = arith.mulf %170, %174 : vector<2x12xf32>
    %176 = vector.extract_strided_slice %145 {offsets = [0, 60], sizes = [2, 16], strides = [1, 1]} : vector<2x92xf32> to vector<2x16xf32>
    %177 = arith.negf %176 : vector<2x16xf32>
    %178 = math.exp %177 : vector<2x16xf32>
    %cst_61 = arith.constant 1.000000e+00 : f32
    %179 = vector.broadcast %cst_61 : f32 to vector<2x16xf32>
    %180 = arith.addf %179, %178 : vector<2x16xf32>
    %181 = arith.divf %179, %180 : vector<2x16xf32>
    %182 = vector.extract_strided_slice %145 {offsets = [0, 76], sizes = [2, 16], strides = [1, 1]} : vector<2x92xf32> to vector<2x16xf32>
    %183 = math.tanh %182 : vector<2x16xf32>
    %184 = tpu.concatenate %156, %156 in 1 : vector<2x16xf32>, vector<2x16xf32> -> vector<2x32xf32>
    %185 = arith.mulf %184, %19 : vector<2x32xf32>
    %cst_62 = arith.constant dense<0.000000e+00> : vector<32x16xf32>
    %186 = tpu.matmul %185, %162, %cst_62 {dimension_numbers = #tpu.dot_dimension_numbers<[0], [0], [1], [1], [0, 1, 1, 1], [], []>} : vector<2x32xf32>, vector<2x16xf32>, vector<32x16xf32> -> vector<32x16xf32>
    %cst_63 = arith.constant dense<0.000000e+00> : vector<32x16xf32>
    %187 = tpu.matmul %185, %164, %cst_63 {dimension_numbers = #tpu.dot_dimension_numbers<[0], [0], [1], [1], [0, 1, 1, 1], [], []>} : vector<2x32xf32>, vector<2x16xf32>, vector<32x16xf32> -> vector<32x16xf32>
    %cst_64 = arith.constant 1.000000e+00 : f32
    %188 = vector.broadcast %cst_64 : f32 to vector<32x16xf32>
    %189 = arith.subf %188, %186 : vector<32x16xf32>
    %190 = arith.mulf %48, %189 : vector<32x16xf32>
    %191 = arith.addf %190, %187 : vector<32x16xf32>
    %192 = tpu.concatenate %175, %175 in 1 : vector<2x12xf32>, vector<2x12xf32> -> vector<2x24xf32>
    %193 = arith.mulf %192, %33 : vector<2x24xf32>
    %cst_65 = arith.constant dense<0.000000e+00> : vector<24x16xf32>
    %194 = tpu.matmul %193, %181, %cst_65 {dimension_numbers = #tpu.dot_dimension_numbers<[0], [0], [1], [1], [0, 1, 1, 1], [], []>} : vector<2x24xf32>, vector<2x16xf32>, vector<24x16xf32> -> vector<24x16xf32>
    %cst_66 = arith.constant dense<0.000000e+00> : vector<24x16xf32>
    %195 = tpu.matmul %193, %183, %cst_66 {dimension_numbers = #tpu.dot_dimension_numbers<[0], [0], [1], [1], [0, 1, 1, 1], [], []>} : vector<2x24xf32>, vector<2x16xf32>, vector<24x16xf32> -> vector<24x16xf32>
    %cst_67 = arith.constant 1.000000e+00 : f32
    %196 = vector.broadcast %cst_67 : f32 to vector<24x16xf32>
    %197 = arith.subf %196, %194 : vector<24x16xf32>
    %198 = arith.mulf %49, %197 : vector<24x16xf32>
    %199 = arith.addf %198, %195 : vector<24x16xf32>
    %cst_68 = arith.constant dense<0.000000e+00> : vector<24x12xf32>
    %200 = tpu.matmul %52, %175, %cst_68 {dimension_numbers = #tpu.dot_dimension_numbers<[0], [0], [1], [1], [0, 1, 1, 1], [], []>} : vector<2x24xf32>, vector<2x12xf32>, vector<24x12xf32> -> vector<24x12xf32>
    %201 = arith.addf %50, %200 : vector<24x12xf32>
    %c1 = arith.constant 1 : index
    %c0_69 = arith.constant 0 : index
    %c0_70 = arith.constant 0 : index
    %202 = vector.load %arg0[%c1, %c0_69, %c0_70] : memref<4x2x8xf32, #tpu.memory_space<vmem>>, vector<1x2x8xf32>
    %203 = vector.shape_cast %202 : vector<1x2x8xf32> to vector<2x8xf32>
    %cst_71 = arith.constant dense<0.000000e+00> : vector<2x32xf32>
    %204 = tpu.matmul %203, %0, %cst_71 {dimension_numbers = #tpu.dot_dimension_numbers<[1], [0], [0], [1], [0, 0, 1, 1], [], []>} : vector<2x8xf32>, vector<8x32xf32>, vector<2x32xf32> -> vector<2x32xf32>
    %205 = vector.broadcast %1 : vector<1x32xf32> to vector<2x32xf32>
    %206 = arith.addf %204, %205 : vector<2x32xf32>
    %207 = vector.extract_strided_slice %206 {offsets = [0, 0], sizes = [2, 16], strides = [1, 1]} : vector<2x32xf32> to vector<2x16xf32>
    %208 = vector.extract_strided_slice %206 {offsets = [0, 16], sizes = [2, 16], strides = [1, 1]} : vector<2x32xf32> to vector<2x16xf32>
    %209 = arith.mulf %191, %191 : vector<32x16xf32>
    %cst_72 = arith.constant dense<0.000000e+00> : vector<32xf32>
    %210 = vector.multi_reduction <add>, %209, %cst_72 [1] : vector<32x16xf32> to vector<32xf32>
    %211 = vector.shape_cast %210 : vector<32xf32> to vector<32x1xf32>
    %cst_73 = arith.constant 1.000000e-16 : f32
    %212 = vector.broadcast %cst_73 : f32 to vector<32x1xf32>
    %213 = arith.maximumf %211, %212 : vector<32x1xf32>
    %214 = math.rsqrt %213 : vector<32x1xf32>
    %215 = vector.broadcast %214 : vector<32x1xf32> to vector<32x16xf32>
    %216 = arith.mulf %191, %215 : vector<32x16xf32>
    %217 = arith.mulf %207, %207 : vector<2x16xf32>
    %cst_74 = arith.constant dense<0.000000e+00> : vector<2xf32>
    %218 = vector.multi_reduction <add>, %217, %cst_74 [1] : vector<2x16xf32> to vector<2xf32>
    %219 = vector.shape_cast %218 : vector<2xf32> to vector<2x1xf32>
    %cst_75 = arith.constant 1.000000e-16 : f32
    %220 = vector.broadcast %cst_75 : f32 to vector<2x1xf32>
    %221 = arith.maximumf %219, %220 : vector<2x1xf32>
    %222 = math.rsqrt %221 : vector<2x1xf32>
    %223 = vector.broadcast %222 : vector<2x1xf32> to vector<2x16xf32>
    %224 = arith.mulf %207, %223 : vector<2x16xf32>
    %cst_76 = arith.constant dense<0.000000e+00> : vector<2x32xf32>
    %225 = tpu.matmul %224, %216, %cst_76 {dimension_numbers = #tpu.dot_dimension_numbers<[1], [1], [0], [0], [0, 0, 1, 0], [], []>} : vector<2x16xf32>, vector<32x16xf32>, vector<2x32xf32> -> vector<2x32xf32>
    %226 = vector.extract_strided_slice %225 {offsets = [0, 0], sizes = [1, 16], strides = [1, 1]} : vector<2x32xf32> to vector<1x16xf32>
    %227 = vector.extract_strided_slice %225 {offsets = [1, 16], sizes = [1, 16], strides = [1, 1]} : vector<2x32xf32> to vector<1x16xf32>
    %228 = tpu.concatenate %226, %227 in 0 : vector<1x16xf32>, vector<1x16xf32> -> vector<2x16xf32>
    %cst_77 = arith.constant dense<0xFF800000> : vector<2xf32>
    %229 = vector.multi_reduction <maximumf>, %228, %cst_77 [1] : vector<2x16xf32> to vector<2xf32>
    %230 = vector.shape_cast %229 : vector<2xf32> to vector<2x1xf32>
    %231 = vector.broadcast %230 : vector<2x1xf32> to vector<2x16xf32>
    %232 = arith.subf %228, %231 : vector<2x16xf32>
    %233 = math.exp %232 : vector<2x16xf32>
    %cst_78 = arith.constant dense<0.000000e+00> : vector<2xf32>
    %234 = vector.multi_reduction <add>, %233, %cst_78 [1] : vector<2x16xf32> to vector<2xf32>
    %235 = vector.shape_cast %234 : vector<2xf32> to vector<2x1xf32>
    %236 = tpu.reciprocal %235 {approx = true} : vector<2x1xf32> -> vector<2x1xf32>
    %237 = vector.broadcast %236 : vector<2x1xf32> to vector<2x16xf32>
    %238 = arith.mulf %233, %237 : vector<2x16xf32>
    %239 = tpu.concatenate %238, %238 in 1 : vector<2x16xf32>, vector<2x16xf32> -> vector<2x32xf32>
    %240 = arith.mulf %239, %19 : vector<2x32xf32>
    %cst_79 = arith.constant dense<0.000000e+00> : vector<2x16xf32>
    %241 = tpu.matmul %240, %191, %cst_79 {dimension_numbers = #tpu.dot_dimension_numbers<[1], [0], [0], [1], [0, 0, 1, 1], [], []>} : vector<2x32xf32>, vector<32x16xf32>, vector<2x16xf32> -> vector<2x16xf32>
    %242 = arith.mulf %199, %199 : vector<24x16xf32>
    %cst_80 = arith.constant dense<0.000000e+00> : vector<24xf32>
    %243 = vector.multi_reduction <add>, %242, %cst_80 [1] : vector<24x16xf32> to vector<24xf32>
    %244 = vector.shape_cast %243 : vector<24xf32> to vector<24x1xf32>
    %cst_81 = arith.constant 1.000000e-16 : f32
    %245 = vector.broadcast %cst_81 : f32 to vector<24x1xf32>
    %246 = arith.maximumf %244, %245 : vector<24x1xf32>
    %247 = math.rsqrt %246 : vector<24x1xf32>
    %248 = vector.broadcast %247 : vector<24x1xf32> to vector<24x16xf32>
    %249 = arith.mulf %199, %248 : vector<24x16xf32>
    %250 = arith.mulf %208, %208 : vector<2x16xf32>
    %cst_82 = arith.constant dense<0.000000e+00> : vector<2xf32>
    %251 = vector.multi_reduction <add>, %250, %cst_82 [1] : vector<2x16xf32> to vector<2xf32>
    %252 = vector.shape_cast %251 : vector<2xf32> to vector<2x1xf32>
    %cst_83 = arith.constant 1.000000e-16 : f32
    %253 = vector.broadcast %cst_83 : f32 to vector<2x1xf32>
    %254 = arith.maximumf %252, %253 : vector<2x1xf32>
    %255 = math.rsqrt %254 : vector<2x1xf32>
    %256 = vector.broadcast %255 : vector<2x1xf32> to vector<2x16xf32>
    %257 = arith.mulf %208, %256 : vector<2x16xf32>
    %cst_84 = arith.constant dense<0.000000e+00> : vector<2x24xf32>
    %258 = tpu.matmul %257, %249, %cst_84 {dimension_numbers = #tpu.dot_dimension_numbers<[1], [1], [0], [0], [0, 0, 1, 0], [], []>} : vector<2x16xf32>, vector<24x16xf32>, vector<2x24xf32> -> vector<2x24xf32>
    %259 = vector.extract_strided_slice %258 {offsets = [0, 0], sizes = [1, 12], strides = [1, 1]} : vector<2x24xf32> to vector<1x12xf32>
    %260 = vector.extract_strided_slice %258 {offsets = [1, 12], sizes = [1, 12], strides = [1, 1]} : vector<2x24xf32> to vector<1x12xf32>
    %261 = tpu.concatenate %259, %260 in 0 : vector<1x12xf32>, vector<1x12xf32> -> vector<2x12xf32>
    %cst_85 = arith.constant dense<0xFF800000> : vector<2xf32>
    %262 = vector.multi_reduction <maximumf>, %261, %cst_85 [1] : vector<2x12xf32> to vector<2xf32>
    %263 = vector.shape_cast %262 : vector<2xf32> to vector<2x1xf32>
    %264 = vector.broadcast %263 : vector<2x1xf32> to vector<2x12xf32>
    %265 = arith.subf %261, %264 : vector<2x12xf32>
    %266 = math.exp %265 : vector<2x12xf32>
    %cst_86 = arith.constant dense<0.000000e+00> : vector<2xf32>
    %267 = vector.multi_reduction <add>, %266, %cst_86 [1] : vector<2x12xf32> to vector<2xf32>
    %268 = vector.shape_cast %267 : vector<2xf32> to vector<2x1xf32>
    %269 = tpu.reciprocal %268 {approx = true} : vector<2x1xf32> -> vector<2x1xf32>
    %270 = vector.broadcast %269 : vector<2x1xf32> to vector<2x12xf32>
    %271 = arith.mulf %266, %270 : vector<2x12xf32>
    %272 = tpu.concatenate %271, %271 in 1 : vector<2x12xf32>, vector<2x12xf32> -> vector<2x24xf32>
    %273 = arith.mulf %272, %33 : vector<2x24xf32>
    %cst_87 = arith.constant dense<0.000000e+00> : vector<2x16xf32>
    %274 = tpu.matmul %273, %199, %cst_87 {dimension_numbers = #tpu.dot_dimension_numbers<[1], [0], [0], [1], [0, 0, 1, 1], [], []>} : vector<2x24xf32>, vector<24x16xf32>, vector<2x16xf32> -> vector<2x16xf32>
    %cst_88 = arith.constant dense<0.000000e+00> : vector<2x12xf32>
    %275 = tpu.matmul %273, %201, %cst_88 {dimension_numbers = #tpu.dot_dimension_numbers<[1], [0], [0], [1], [0, 0, 1, 1], [], []>} : vector<2x24xf32>, vector<24x12xf32>, vector<2x12xf32> -> vector<2x12xf32>
    %276 = tpu.concatenate %275, %275 in 1 : vector<2x12xf32>, vector<2x12xf32> -> vector<2x24xf32>
    %277 = arith.mulf %276, %33 : vector<2x24xf32>
    %cst_89 = arith.constant dense<0.000000e+00> : vector<2x16xf32>
    %278 = tpu.matmul %277, %199, %cst_89 {dimension_numbers = #tpu.dot_dimension_numbers<[1], [0], [0], [1], [0, 0, 1, 1], [], []>} : vector<2x24xf32>, vector<24x16xf32>, vector<2x16xf32> -> vector<2x16xf32>
    %cst_90 = arith.constant dense<0.000000e+00> : vector<24x2xf32>
    %279 = tpu.matmul %201, %271, %cst_90 {dimension_numbers = #tpu.dot_dimension_numbers<[1], [1], [0], [0], [0, 0, 1, 0], [], []>} : vector<24x12xf32>, vector<2x12xf32>, vector<24x2xf32> -> vector<24x2xf32>
    %280 = arith.mulf %279, %47 : vector<24x2xf32>
    %cst_91 = arith.constant dense<0.000000e+00> : vector<2x16xf32>
    %281 = tpu.matmul %280, %199, %cst_91 {dimension_numbers = #tpu.dot_dimension_numbers<[0], [0], [1], [1], [0, 1, 1, 1], [], []>} : vector<24x2xf32>, vector<24x16xf32>, vector<2x16xf32> -> vector<2x16xf32>
    %282 = tpu.concatenate %203, %241, %274, %278, %281, %137 in 1 : vector<2x8xf32>, vector<2x16xf32>, vector<2x16xf32>, vector<2x16xf32>, vector<2x16xf32>, vector<2x32xf32> -> vector<2x104xf32>
    %cst_92 = arith.constant dense<0.000000e+00> : vector<2x32xf32>
    %283 = tpu.matmul %282, %2, %cst_92 {dimension_numbers = #tpu.dot_dimension_numbers<[1], [0], [0], [1], [0, 0, 1, 1], [], []>} : vector<2x104xf32>, vector<104x32xf32>, vector<2x32xf32> -> vector<2x32xf32>
    %284 = vector.broadcast %3 : vector<1x32xf32> to vector<2x32xf32>
    %285 = arith.addf %283, %284 : vector<2x32xf32>
    %286 = math.tanh %285 : vector<2x32xf32>
    %cst_93 = arith.constant dense<0.000000e+00> : vector<2x100xf32>
    %287 = tpu.matmul %286, %4, %cst_93 {dimension_numbers = #tpu.dot_dimension_numbers<[1], [0], [0], [1], [0, 0, 1, 1], [], []>} : vector<2x32xf32>, vector<32x100xf32>, vector<2x100xf32> -> vector<2x100xf32>
    %288 = vector.broadcast %5 : vector<1x100xf32> to vector<2x100xf32>
    %289 = arith.addf %287, %288 : vector<2x100xf32>
    %290 = vector.extract_strided_slice %289 {offsets = [0, 0], sizes = [2, 8], strides = [1, 1]} : vector<2x100xf32> to vector<2x8xf32>
    %c1_94 = arith.constant 1 : index
    %c0_95 = arith.constant 0 : index
    %c0_96 = arith.constant 0 : index
    %291 = vector.load %arg7[%c1_94, %c0_95, %c0_96] : memref<4x2x8xf32, #tpu.memory_space<vmem>>, vector<1x2x8xf32>
    %292 = vector.shape_cast %291 : vector<1x2x8xf32> to vector<2x8xf32>
    %293 = vector.shape_cast %290 : vector<2x8xf32> to vector<1x2x8xf32>
    tpu.vector_store %arg7[%c1_94, %c0_95, %c0_96], %293 {strides = array<i32>} : memref<4x2x8xf32, #tpu.memory_space<vmem>>, vector<1x2x8xf32>,
    %294 = vector.extract_strided_slice %289 {offsets = [0, 8], sizes = [2, 92], strides = [1, 1]} : vector<2x100xf32> to vector<2x92xf32>
    %295 = vector.extract_strided_slice %294 {offsets = [0, 0], sizes = [2, 16], strides = [1, 1]} : vector<2x92xf32> to vector<2x16xf32>
    %cst_97 = arith.constant dense<0xFF800000> : vector<2xf32>
    %296 = vector.multi_reduction <maximumf>, %295, %cst_97 [1] : vector<2x16xf32> to vector<2xf32>
    %297 = vector.shape_cast %296 : vector<2xf32> to vector<2x1xf32>
    %298 = vector.broadcast %297 : vector<2x1xf32> to vector<2x16xf32>
    %299 = arith.subf %295, %298 : vector<2x16xf32>
    %300 = math.exp %299 : vector<2x16xf32>
    %cst_98 = arith.constant dense<0.000000e+00> : vector<2xf32>
    %301 = vector.multi_reduction <add>, %300, %cst_98 [1] : vector<2x16xf32> to vector<2xf32>
    %302 = vector.shape_cast %301 : vector<2xf32> to vector<2x1xf32>
    %303 = tpu.reciprocal %302 {approx = true} : vector<2x1xf32> -> vector<2x1xf32>
    %304 = vector.broadcast %303 : vector<2x1xf32> to vector<2x16xf32>
    %305 = arith.mulf %300, %304 : vector<2x16xf32>
    %306 = vector.extract_strided_slice %294 {offsets = [0, 16], sizes = [2, 16], strides = [1, 1]} : vector<2x92xf32> to vector<2x16xf32>
    %307 = arith.negf %306 : vector<2x16xf32>
    %308 = math.exp %307 : vector<2x16xf32>
    %cst_99 = arith.constant 1.000000e+00 : f32
    %309 = vector.broadcast %cst_99 : f32 to vector<2x16xf32>
    %310 = arith.addf %309, %308 : vector<2x16xf32>
    %311 = arith.divf %309, %310 : vector<2x16xf32>
    %312 = vector.extract_strided_slice %294 {offsets = [0, 32], sizes = [2, 16], strides = [1, 1]} : vector<2x92xf32> to vector<2x16xf32>
    %313 = math.tanh %312 : vector<2x16xf32>
    %314 = vector.extract_strided_slice %294 {offsets = [0, 48], sizes = [2, 12], strides = [1, 1]} : vector<2x92xf32> to vector<2x12xf32>
    %cst_100 = arith.constant dense<0xFF800000> : vector<2xf32>
    %315 = vector.multi_reduction <maximumf>, %314, %cst_100 [1] : vector<2x12xf32> to vector<2xf32>
    %316 = vector.shape_cast %315 : vector<2xf32> to vector<2x1xf32>
    %317 = vector.broadcast %316 : vector<2x1xf32> to vector<2x12xf32>
    %318 = arith.subf %314, %317 : vector<2x12xf32>
    %319 = math.exp %318 : vector<2x12xf32>
    %cst_101 = arith.constant dense<0.000000e+00> : vector<2xf32>
    %320 = vector.multi_reduction <add>, %319, %cst_101 [1] : vector<2x12xf32> to vector<2xf32>
    %321 = vector.shape_cast %320 : vector<2xf32> to vector<2x1xf32>
    %322 = tpu.reciprocal %321 {approx = true} : vector<2x1xf32> -> vector<2x1xf32>
    %323 = vector.broadcast %322 : vector<2x1xf32> to vector<2x12xf32>
    %324 = arith.mulf %319, %323 : vector<2x12xf32>
    %325 = vector.extract_strided_slice %294 {offsets = [0, 60], sizes = [2, 16], strides = [1, 1]} : vector<2x92xf32> to vector<2x16xf32>
    %326 = arith.negf %325 : vector<2x16xf32>
    %327 = math.exp %326 : vector<2x16xf32>
    %cst_102 = arith.constant 1.000000e+00 : f32
    %328 = vector.broadcast %cst_102 : f32 to vector<2x16xf32>
    %329 = arith.addf %328, %327 : vector<2x16xf32>
    %330 = arith.divf %328, %329 : vector<2x16xf32>
    %331 = vector.extract_strided_slice %294 {offsets = [0, 76], sizes = [2, 16], strides = [1, 1]} : vector<2x92xf32> to vector<2x16xf32>
    %332 = math.tanh %331 : vector<2x16xf32>
    %333 = tpu.concatenate %305, %305 in 1 : vector<2x16xf32>, vector<2x16xf32> -> vector<2x32xf32>
    %334 = arith.mulf %333, %19 : vector<2x32xf32>
    %cst_103 = arith.constant dense<0.000000e+00> : vector<32x16xf32>
    %335 = tpu.matmul %334, %311, %cst_103 {dimension_numbers = #tpu.dot_dimension_numbers<[0], [0], [1], [1], [0, 1, 1, 1], [], []>} : vector<2x32xf32>, vector<2x16xf32>, vector<32x16xf32> -> vector<32x16xf32>
    %cst_104 = arith.constant dense<0.000000e+00> : vector<32x16xf32>
    %336 = tpu.matmul %334, %313, %cst_104 {dimension_numbers = #tpu.dot_dimension_numbers<[0], [0], [1], [1], [0, 1, 1, 1], [], []>} : vector<2x32xf32>, vector<2x16xf32>, vector<32x16xf32> -> vector<32x16xf32>
    %cst_105 = arith.constant 1.000000e+00 : f32
    %337 = vector.broadcast %cst_105 : f32 to vector<32x16xf32>
    %338 = arith.subf %337, %335 : vector<32x16xf32>
    %339 = arith.mulf %191, %338 : vector<32x16xf32>
    %340 = arith.addf %339, %336 : vector<32x16xf32>
    %341 = tpu.concatenate %324, %324 in 1 : vector<2x12xf32>, vector<2x12xf32> -> vector<2x24xf32>
    %342 = arith.mulf %341, %33 : vector<2x24xf32>
    %cst_106 = arith.constant dense<0.000000e+00> : vector<24x16xf32>
    %343 = tpu.matmul %342, %330, %cst_106 {dimension_numbers = #tpu.dot_dimension_numbers<[0], [0], [1], [1], [0, 1, 1, 1], [], []>} : vector<2x24xf32>, vector<2x16xf32>, vector<24x16xf32> -> vector<24x16xf32>
    %cst_107 = arith.constant dense<0.000000e+00> : vector<24x16xf32>
    %344 = tpu.matmul %342, %332, %cst_107 {dimension_numbers = #tpu.dot_dimension_numbers<[0], [0], [1], [1], [0, 1, 1, 1], [], []>} : vector<2x24xf32>, vector<2x16xf32>, vector<24x16xf32> -> vector<24x16xf32>
    %cst_108 = arith.constant 1.000000e+00 : f32
    %345 = vector.broadcast %cst_108 : f32 to vector<24x16xf32>
    %346 = arith.subf %345, %343 : vector<24x16xf32>
    %347 = arith.mulf %199, %346 : vector<24x16xf32>
    %348 = arith.addf %347, %344 : vector<24x16xf32>
    %cst_109 = arith.constant dense<0.000000e+00> : vector<24x12xf32>
    %349 = tpu.matmul %193, %324, %cst_109 {dimension_numbers = #tpu.dot_dimension_numbers<[0], [0], [1], [1], [0, 1, 1, 1], [], []>} : vector<2x24xf32>, vector<2x12xf32>, vector<24x12xf32> -> vector<24x12xf32>
    %350 = arith.addf %201, %349 : vector<24x12xf32>
    %c2 = arith.constant 2 : index
    %c0_110 = arith.constant 0 : index
    %c0_111 = arith.constant 0 : index
    %351 = vector.load %arg0[%c2, %c0_110, %c0_111] : memref<4x2x8xf32, #tpu.memory_space<vmem>>, vector<1x2x8xf32>
    %352 = vector.shape_cast %351 : vector<1x2x8xf32> to vector<2x8xf32>
    %cst_112 = arith.constant dense<0.000000e+00> : vector<2x32xf32>
    %353 = tpu.matmul %352, %0, %cst_112 {dimension_numbers = #tpu.dot_dimension_numbers<[1], [0], [0], [1], [0, 0, 1, 1], [], []>} : vector<2x8xf32>, vector<8x32xf32>, vector<2x32xf32> -> vector<2x32xf32>
    %354 = vector.broadcast %1 : vector<1x32xf32> to vector<2x32xf32>
    %355 = arith.addf %353, %354 : vector<2x32xf32>
    %356 = vector.extract_strided_slice %355 {offsets = [0, 0], sizes = [2, 16], strides = [1, 1]} : vector<2x32xf32> to vector<2x16xf32>
    %357 = vector.extract_strided_slice %355 {offsets = [0, 16], sizes = [2, 16], strides = [1, 1]} : vector<2x32xf32> to vector<2x16xf32>
    %358 = arith.mulf %340, %340 : vector<32x16xf32>
    %cst_113 = arith.constant dense<0.000000e+00> : vector<32xf32>
    %359 = vector.multi_reduction <add>, %358, %cst_113 [1] : vector<32x16xf32> to vector<32xf32>
    %360 = vector.shape_cast %359 : vector<32xf32> to vector<32x1xf32>
    %cst_114 = arith.constant 1.000000e-16 : f32
    %361 = vector.broadcast %cst_114 : f32 to vector<32x1xf32>
    %362 = arith.maximumf %360, %361 : vector<32x1xf32>
    %363 = math.rsqrt %362 : vector<32x1xf32>
    %364 = vector.broadcast %363 : vector<32x1xf32> to vector<32x16xf32>
    %365 = arith.mulf %340, %364 : vector<32x16xf32>
    %366 = arith.mulf %356, %356 : vector<2x16xf32>
    %cst_115 = arith.constant dense<0.000000e+00> : vector<2xf32>
    %367 = vector.multi_reduction <add>, %366, %cst_115 [1] : vector<2x16xf32> to vector<2xf32>
    %368 = vector.shape_cast %367 : vector<2xf32> to vector<2x1xf32>
    %cst_116 = arith.constant 1.000000e-16 : f32
    %369 = vector.broadcast %cst_116 : f32 to vector<2x1xf32>
    %370 = arith.maximumf %368, %369 : vector<2x1xf32>
    %371 = math.rsqrt %370 : vector<2x1xf32>
    %372 = vector.broadcast %371 : vector<2x1xf32> to vector<2x16xf32>
    %373 = arith.mulf %356, %372 : vector<2x16xf32>
    %cst_117 = arith.constant dense<0.000000e+00> : vector<2x32xf32>
    %374 = tpu.matmul %373, %365, %cst_117 {dimension_numbers = #tpu.dot_dimension_numbers<[1], [1], [0], [0], [0, 0, 1, 0], [], []>} : vector<2x16xf32>, vector<32x16xf32>, vector<2x32xf32> -> vector<2x32xf32>
    %375 = vector.extract_strided_slice %374 {offsets = [0, 0], sizes = [1, 16], strides = [1, 1]} : vector<2x32xf32> to vector<1x16xf32>
    %376 = vector.extract_strided_slice %374 {offsets = [1, 16], sizes = [1, 16], strides = [1, 1]} : vector<2x32xf32> to vector<1x16xf32>
    %377 = tpu.concatenate %375, %376 in 0 : vector<1x16xf32>, vector<1x16xf32> -> vector<2x16xf32>
    %cst_118 = arith.constant dense<0xFF800000> : vector<2xf32>
    %378 = vector.multi_reduction <maximumf>, %377, %cst_118 [1] : vector<2x16xf32> to vector<2xf32>
    %379 = vector.shape_cast %378 : vector<2xf32> to vector<2x1xf32>
    %380 = vector.broadcast %379 : vector<2x1xf32> to vector<2x16xf32>
    %381 = arith.subf %377, %380 : vector<2x16xf32>
    %382 = math.exp %381 : vector<2x16xf32>
    %cst_119 = arith.constant dense<0.000000e+00> : vector<2xf32>
    %383 = vector.multi_reduction <add>, %382, %cst_119 [1] : vector<2x16xf32> to vector<2xf32>
    %384 = vector.shape_cast %383 : vector<2xf32> to vector<2x1xf32>
    %385 = tpu.reciprocal %384 {approx = true} : vector<2x1xf32> -> vector<2x1xf32>
    %386 = vector.broadcast %385 : vector<2x1xf32> to vector<2x16xf32>
    %387 = arith.mulf %382, %386 : vector<2x16xf32>
    %388 = tpu.concatenate %387, %387 in 1 : vector<2x16xf32>, vector<2x16xf32> -> vector<2x32xf32>
    %389 = arith.mulf %388, %19 : vector<2x32xf32>
    %cst_120 = arith.constant dense<0.000000e+00> : vector<2x16xf32>
    %390 = tpu.matmul %389, %340, %cst_120 {dimension_numbers = #tpu.dot_dimension_numbers<[1], [0], [0], [1], [0, 0, 1, 1], [], []>} : vector<2x32xf32>, vector<32x16xf32>, vector<2x16xf32> -> vector<2x16xf32>
    %391 = arith.mulf %348, %348 : vector<24x16xf32>
    %cst_121 = arith.constant dense<0.000000e+00> : vector<24xf32>
    %392 = vector.multi_reduction <add>, %391, %cst_121 [1] : vector<24x16xf32> to vector<24xf32>
    %393 = vector.shape_cast %392 : vector<24xf32> to vector<24x1xf32>
    %cst_122 = arith.constant 1.000000e-16 : f32
    %394 = vector.broadcast %cst_122 : f32 to vector<24x1xf32>
    %395 = arith.maximumf %393, %394 : vector<24x1xf32>
    %396 = math.rsqrt %395 : vector<24x1xf32>
    %397 = vector.broadcast %396 : vector<24x1xf32> to vector<24x16xf32>
    %398 = arith.mulf %348, %397 : vector<24x16xf32>
    %399 = arith.mulf %357, %357 : vector<2x16xf32>
    %cst_123 = arith.constant dense<0.000000e+00> : vector<2xf32>
    %400 = vector.multi_reduction <add>, %399, %cst_123 [1] : vector<2x16xf32> to vector<2xf32>
    %401 = vector.shape_cast %400 : vector<2xf32> to vector<2x1xf32>
    %cst_124 = arith.constant 1.000000e-16 : f32
    %402 = vector.broadcast %cst_124 : f32 to vector<2x1xf32>
    %403 = arith.maximumf %401, %402 : vector<2x1xf32>
    %404 = math.rsqrt %403 : vector<2x1xf32>
    %405 = vector.broadcast %404 : vector<2x1xf32> to vector<2x16xf32>
    %406 = arith.mulf %357, %405 : vector<2x16xf32>
    %cst_125 = arith.constant dense<0.000000e+00> : vector<2x24xf32>
    %407 = tpu.matmul %406, %398, %cst_125 {dimension_numbers = #tpu.dot_dimension_numbers<[1], [1], [0], [0], [0, 0, 1, 0], [], []>} : vector<2x16xf32>, vector<24x16xf32>, vector<2x24xf32> -> vector<2x24xf32>
    %408 = vector.extract_strided_slice %407 {offsets = [0, 0], sizes = [1, 12], strides = [1, 1]} : vector<2x24xf32> to vector<1x12xf32>
    %409 = vector.extract_strided_slice %407 {offsets = [1, 12], sizes = [1, 12], strides = [1, 1]} : vector<2x24xf32> to vector<1x12xf32>
    %410 = tpu.concatenate %408, %409 in 0 : vector<1x12xf32>, vector<1x12xf32> -> vector<2x12xf32>
    %cst_126 = arith.constant dense<0xFF800000> : vector<2xf32>
    %411 = vector.multi_reduction <maximumf>, %410, %cst_126 [1] : vector<2x12xf32> to vector<2xf32>
    %412 = vector.shape_cast %411 : vector<2xf32> to vector<2x1xf32>
    %413 = vector.broadcast %412 : vector<2x1xf32> to vector<2x12xf32>
    %414 = arith.subf %410, %413 : vector<2x12xf32>
    %415 = math.exp %414 : vector<2x12xf32>
    %cst_127 = arith.constant dense<0.000000e+00> : vector<2xf32>
    %416 = vector.multi_reduction <add>, %415, %cst_127 [1] : vector<2x12xf32> to vector<2xf32>
    %417 = vector.shape_cast %416 : vector<2xf32> to vector<2x1xf32>
    %418 = tpu.reciprocal %417 {approx = true} : vector<2x1xf32> -> vector<2x1xf32>
    %419 = vector.broadcast %418 : vector<2x1xf32> to vector<2x12xf32>
    %420 = arith.mulf %415, %419 : vector<2x12xf32>
    %421 = tpu.concatenate %420, %420 in 1 : vector<2x12xf32>, vector<2x12xf32> -> vector<2x24xf32>
    %422 = arith.mulf %421, %33 : vector<2x24xf32>
    %cst_128 = arith.constant dense<0.000000e+00> : vector<2x16xf32>
    %423 = tpu.matmul %422, %348, %cst_128 {dimension_numbers = #tpu.dot_dimension_numbers<[1], [0], [0], [1], [0, 0, 1, 1], [], []>} : vector<2x24xf32>, vector<24x16xf32>, vector<2x16xf32> -> vector<2x16xf32>
    %cst_129 = arith.constant dense<0.000000e+00> : vector<2x12xf32>
    %424 = tpu.matmul %422, %350, %cst_129 {dimension_numbers = #tpu.dot_dimension_numbers<[1], [0], [0], [1], [0, 0, 1, 1], [], []>} : vector<2x24xf32>, vector<24x12xf32>, vector<2x12xf32> -> vector<2x12xf32>
    %425 = tpu.concatenate %424, %424 in 1 : vector<2x12xf32>, vector<2x12xf32> -> vector<2x24xf32>
    %426 = arith.mulf %425, %33 : vector<2x24xf32>
    %cst_130 = arith.constant dense<0.000000e+00> : vector<2x16xf32>
    %427 = tpu.matmul %426, %348, %cst_130 {dimension_numbers = #tpu.dot_dimension_numbers<[1], [0], [0], [1], [0, 0, 1, 1], [], []>} : vector<2x24xf32>, vector<24x16xf32>, vector<2x16xf32> -> vector<2x16xf32>
    %cst_131 = arith.constant dense<0.000000e+00> : vector<24x2xf32>
    %428 = tpu.matmul %350, %420, %cst_131 {dimension_numbers = #tpu.dot_dimension_numbers<[1], [1], [0], [0], [0, 0, 1, 0], [], []>} : vector<24x12xf32>, vector<2x12xf32>, vector<24x2xf32> -> vector<24x2xf32>
    %429 = arith.mulf %428, %47 : vector<24x2xf32>
    %cst_132 = arith.constant dense<0.000000e+00> : vector<2x16xf32>
    %430 = tpu.matmul %429, %348, %cst_132 {dimension_numbers = #tpu.dot_dimension_numbers<[0], [0], [1], [1], [0, 1, 1, 1], [], []>} : vector<24x2xf32>, vector<24x16xf32>, vector<2x16xf32> -> vector<2x16xf32>
    %431 = tpu.concatenate %352, %390, %423, %427, %430, %286 in 1 : vector<2x8xf32>, vector<2x16xf32>, vector<2x16xf32>, vector<2x16xf32>, vector<2x16xf32>, vector<2x32xf32> -> vector<2x104xf32>
    %cst_133 = arith.constant dense<0.000000e+00> : vector<2x32xf32>
    %432 = tpu.matmul %431, %2, %cst_133 {dimension_numbers = #tpu.dot_dimension_numbers<[1], [0], [0], [1], [0, 0, 1, 1], [], []>} : vector<2x104xf32>, vector<104x32xf32>, vector<2x32xf32> -> vector<2x32xf32>
    %433 = vector.broadcast %3 : vector<1x32xf32> to vector<2x32xf32>
    %434 = arith.addf %432, %433 : vector<2x32xf32>
    %435 = math.tanh %434 : vector<2x32xf32>
    %cst_134 = arith.constant dense<0.000000e+00> : vector<2x100xf32>
    %436 = tpu.matmul %435, %4, %cst_134 {dimension_numbers = #tpu.dot_dimension_numbers<[1], [0], [0], [1], [0, 0, 1, 1], [], []>} : vector<2x32xf32>, vector<32x100xf32>, vector<2x100xf32> -> vector<2x100xf32>
    %437 = vector.broadcast %5 : vector<1x100xf32> to vector<2x100xf32>
    %438 = arith.addf %436, %437 : vector<2x100xf32>
    %439 = vector.extract_strided_slice %438 {offsets = [0, 0], sizes = [2, 8], strides = [1, 1]} : vector<2x100xf32> to vector<2x8xf32>
    %c2_135 = arith.constant 2 : index
    %c0_136 = arith.constant 0 : index
    %c0_137 = arith.constant 0 : index
    %440 = vector.load %arg7[%c2_135, %c0_136, %c0_137] : memref<4x2x8xf32, #tpu.memory_space<vmem>>, vector<1x2x8xf32>
    %441 = vector.shape_cast %440 : vector<1x2x8xf32> to vector<2x8xf32>
    %442 = vector.shape_cast %439 : vector<2x8xf32> to vector<1x2x8xf32>
    tpu.vector_store %arg7[%c2_135, %c0_136, %c0_137], %442 {strides = array<i32>} : memref<4x2x8xf32, #tpu.memory_space<vmem>>, vector<1x2x8xf32>,
    %443 = vector.extract_strided_slice %438 {offsets = [0, 8], sizes = [2, 92], strides = [1, 1]} : vector<2x100xf32> to vector<2x92xf32>
    %444 = vector.extract_strided_slice %443 {offsets = [0, 0], sizes = [2, 16], strides = [1, 1]} : vector<2x92xf32> to vector<2x16xf32>
    %cst_138 = arith.constant dense<0xFF800000> : vector<2xf32>
    %445 = vector.multi_reduction <maximumf>, %444, %cst_138 [1] : vector<2x16xf32> to vector<2xf32>
    %446 = vector.shape_cast %445 : vector<2xf32> to vector<2x1xf32>
    %447 = vector.broadcast %446 : vector<2x1xf32> to vector<2x16xf32>
    %448 = arith.subf %444, %447 : vector<2x16xf32>
    %449 = math.exp %448 : vector<2x16xf32>
    %cst_139 = arith.constant dense<0.000000e+00> : vector<2xf32>
    %450 = vector.multi_reduction <add>, %449, %cst_139 [1] : vector<2x16xf32> to vector<2xf32>
    %451 = vector.shape_cast %450 : vector<2xf32> to vector<2x1xf32>
    %452 = tpu.reciprocal %451 {approx = true} : vector<2x1xf32> -> vector<2x1xf32>
    %453 = vector.broadcast %452 : vector<2x1xf32> to vector<2x16xf32>
    %454 = arith.mulf %449, %453 : vector<2x16xf32>
    %455 = vector.extract_strided_slice %443 {offsets = [0, 16], sizes = [2, 16], strides = [1, 1]} : vector<2x92xf32> to vector<2x16xf32>
    %456 = arith.negf %455 : vector<2x16xf32>
    %457 = math.exp %456 : vector<2x16xf32>
    %cst_140 = arith.constant 1.000000e+00 : f32
    %458 = vector.broadcast %cst_140 : f32 to vector<2x16xf32>
    %459 = arith.addf %458, %457 : vector<2x16xf32>
    %460 = arith.divf %458, %459 : vector<2x16xf32>
    %461 = vector.extract_strided_slice %443 {offsets = [0, 32], sizes = [2, 16], strides = [1, 1]} : vector<2x92xf32> to vector<2x16xf32>
    %462 = math.tanh %461 : vector<2x16xf32>
    %463 = vector.extract_strided_slice %443 {offsets = [0, 48], sizes = [2, 12], strides = [1, 1]} : vector<2x92xf32> to vector<2x12xf32>
    %cst_141 = arith.constant dense<0xFF800000> : vector<2xf32>
    %464 = vector.multi_reduction <maximumf>, %463, %cst_141 [1] : vector<2x12xf32> to vector<2xf32>
    %465 = vector.shape_cast %464 : vector<2xf32> to vector<2x1xf32>
    %466 = vector.broadcast %465 : vector<2x1xf32> to vector<2x12xf32>
    %467 = arith.subf %463, %466 : vector<2x12xf32>
    %468 = math.exp %467 : vector<2x12xf32>
    %cst_142 = arith.constant dense<0.000000e+00> : vector<2xf32>
    %469 = vector.multi_reduction <add>, %468, %cst_142 [1] : vector<2x12xf32> to vector<2xf32>
    %470 = vector.shape_cast %469 : vector<2xf32> to vector<2x1xf32>
    %471 = tpu.reciprocal %470 {approx = true} : vector<2x1xf32> -> vector<2x1xf32>
    %472 = vector.broadcast %471 : vector<2x1xf32> to vector<2x12xf32>
    %473 = arith.mulf %468, %472 : vector<2x12xf32>
    %474 = vector.extract_strided_slice %443 {offsets = [0, 60], sizes = [2, 16], strides = [1, 1]} : vector<2x92xf32> to vector<2x16xf32>
    %475 = arith.negf %474 : vector<2x16xf32>
    %476 = math.exp %475 : vector<2x16xf32>
    %cst_143 = arith.constant 1.000000e+00 : f32
    %477 = vector.broadcast %cst_143 : f32 to vector<2x16xf32>
    %478 = arith.addf %477, %476 : vector<2x16xf32>
    %479 = arith.divf %477, %478 : vector<2x16xf32>
    %480 = vector.extract_strided_slice %443 {offsets = [0, 76], sizes = [2, 16], strides = [1, 1]} : vector<2x92xf32> to vector<2x16xf32>
    %481 = math.tanh %480 : vector<2x16xf32>
    %482 = tpu.concatenate %454, %454 in 1 : vector<2x16xf32>, vector<2x16xf32> -> vector<2x32xf32>
    %483 = arith.mulf %482, %19 : vector<2x32xf32>
    %cst_144 = arith.constant dense<0.000000e+00> : vector<32x16xf32>
    %484 = tpu.matmul %483, %460, %cst_144 {dimension_numbers = #tpu.dot_dimension_numbers<[0], [0], [1], [1], [0, 1, 1, 1], [], []>} : vector<2x32xf32>, vector<2x16xf32>, vector<32x16xf32> -> vector<32x16xf32>
    %cst_145 = arith.constant dense<0.000000e+00> : vector<32x16xf32>
    %485 = tpu.matmul %483, %462, %cst_145 {dimension_numbers = #tpu.dot_dimension_numbers<[0], [0], [1], [1], [0, 1, 1, 1], [], []>} : vector<2x32xf32>, vector<2x16xf32>, vector<32x16xf32> -> vector<32x16xf32>
    %cst_146 = arith.constant 1.000000e+00 : f32
    %486 = vector.broadcast %cst_146 : f32 to vector<32x16xf32>
    %487 = arith.subf %486, %484 : vector<32x16xf32>
    %488 = arith.mulf %340, %487 : vector<32x16xf32>
    %489 = arith.addf %488, %485 : vector<32x16xf32>
    %490 = tpu.concatenate %473, %473 in 1 : vector<2x12xf32>, vector<2x12xf32> -> vector<2x24xf32>
    %491 = arith.mulf %490, %33 : vector<2x24xf32>
    %cst_147 = arith.constant dense<0.000000e+00> : vector<24x16xf32>
    %492 = tpu.matmul %491, %479, %cst_147 {dimension_numbers = #tpu.dot_dimension_numbers<[0], [0], [1], [1], [0, 1, 1, 1], [], []>} : vector<2x24xf32>, vector<2x16xf32>, vector<24x16xf32> -> vector<24x16xf32>
    %cst_148 = arith.constant dense<0.000000e+00> : vector<24x16xf32>
    %493 = tpu.matmul %491, %481, %cst_148 {dimension_numbers = #tpu.dot_dimension_numbers<[0], [0], [1], [1], [0, 1, 1, 1], [], []>} : vector<2x24xf32>, vector<2x16xf32>, vector<24x16xf32> -> vector<24x16xf32>
    %cst_149 = arith.constant 1.000000e+00 : f32
    %494 = vector.broadcast %cst_149 : f32 to vector<24x16xf32>
    %495 = arith.subf %494, %492 : vector<24x16xf32>
    %496 = arith.mulf %348, %495 : vector<24x16xf32>
    %497 = arith.addf %496, %493 : vector<24x16xf32>
    %cst_150 = arith.constant dense<0.000000e+00> : vector<24x12xf32>
    %498 = tpu.matmul %342, %473, %cst_150 {dimension_numbers = #tpu.dot_dimension_numbers<[0], [0], [1], [1], [0, 1, 1, 1], [], []>} : vector<2x24xf32>, vector<2x12xf32>, vector<24x12xf32> -> vector<24x12xf32>
    %499 = arith.addf %350, %498 : vector<24x12xf32>
    %c3 = arith.constant 3 : index
    %c0_151 = arith.constant 0 : index
    %c0_152 = arith.constant 0 : index
    %500 = vector.load %arg0[%c3, %c0_151, %c0_152] : memref<4x2x8xf32, #tpu.memory_space<vmem>>, vector<1x2x8xf32>
    %501 = vector.shape_cast %500 : vector<1x2x8xf32> to vector<2x8xf32>
    %cst_153 = arith.constant dense<0.000000e+00> : vector<2x32xf32>
    %502 = tpu.matmul %501, %0, %cst_153 {dimension_numbers = #tpu.dot_dimension_numbers<[1], [0], [0], [1], [0, 0, 1, 1], [], []>} : vector<2x8xf32>, vector<8x32xf32>, vector<2x32xf32> -> vector<2x32xf32>
    %503 = vector.broadcast %1 : vector<1x32xf32> to vector<2x32xf32>
    %504 = arith.addf %502, %503 : vector<2x32xf32>
    %505 = vector.extract_strided_slice %504 {offsets = [0, 0], sizes = [2, 16], strides = [1, 1]} : vector<2x32xf32> to vector<2x16xf32>
    %506 = vector.extract_strided_slice %504 {offsets = [0, 16], sizes = [2, 16], strides = [1, 1]} : vector<2x32xf32> to vector<2x16xf32>
    %507 = arith.mulf %489, %489 : vector<32x16xf32>
    %cst_154 = arith.constant dense<0.000000e+00> : vector<32xf32>
    %508 = vector.multi_reduction <add>, %507, %cst_154 [1] : vector<32x16xf32> to vector<32xf32>
    %509 = vector.shape_cast %508 : vector<32xf32> to vector<32x1xf32>
    %cst_155 = arith.constant 1.000000e-16 : f32
    %510 = vector.broadcast %cst_155 : f32 to vector<32x1xf32>
    %511 = arith.maximumf %509, %510 : vector<32x1xf32>
    %512 = math.rsqrt %511 : vector<32x1xf32>
    %513 = vector.broadcast %512 : vector<32x1xf32> to vector<32x16xf32>
    %514 = arith.mulf %489, %513 : vector<32x16xf32>
    %515 = arith.mulf %505, %505 : vector<2x16xf32>
    %cst_156 = arith.constant dense<0.000000e+00> : vector<2xf32>
    %516 = vector.multi_reduction <add>, %515, %cst_156 [1] : vector<2x16xf32> to vector<2xf32>
    %517 = vector.shape_cast %516 : vector<2xf32> to vector<2x1xf32>
    %cst_157 = arith.constant 1.000000e-16 : f32
    %518 = vector.broadcast %cst_157 : f32 to vector<2x1xf32>
    %519 = arith.maximumf %517, %518 : vector<2x1xf32>
    %520 = math.rsqrt %519 : vector<2x1xf32>
    %521 = vector.broadcast %520 : vector<2x1xf32> to vector<2x16xf32>
    %522 = arith.mulf %505, %521 : vector<2x16xf32>
    %cst_158 = arith.constant dense<0.000000e+00> : vector<2x32xf32>
    %523 = tpu.matmul %522, %514, %cst_158 {dimension_numbers = #tpu.dot_dimension_numbers<[1], [1], [0], [0], [0, 0, 1, 0], [], []>} : vector<2x16xf32>, vector<32x16xf32>, vector<2x32xf32> -> vector<2x32xf32>
    %524 = vector.extract_strided_slice %523 {offsets = [0, 0], sizes = [1, 16], strides = [1, 1]} : vector<2x32xf32> to vector<1x16xf32>
    %525 = vector.extract_strided_slice %523 {offsets = [1, 16], sizes = [1, 16], strides = [1, 1]} : vector<2x32xf32> to vector<1x16xf32>
    %526 = tpu.concatenate %524, %525 in 0 : vector<1x16xf32>, vector<1x16xf32> -> vector<2x16xf32>
    %cst_159 = arith.constant dense<0xFF800000> : vector<2xf32>
    %527 = vector.multi_reduction <maximumf>, %526, %cst_159 [1] : vector<2x16xf32> to vector<2xf32>
    %528 = vector.shape_cast %527 : vector<2xf32> to vector<2x1xf32>
    %529 = vector.broadcast %528 : vector<2x1xf32> to vector<2x16xf32>
    %530 = arith.subf %526, %529 : vector<2x16xf32>
    %531 = math.exp %530 : vector<2x16xf32>
    %cst_160 = arith.constant dense<0.000000e+00> : vector<2xf32>
    %532 = vector.multi_reduction <add>, %531, %cst_160 [1] : vector<2x16xf32> to vector<2xf32>
    %533 = vector.shape_cast %532 : vector<2xf32> to vector<2x1xf32>
    %534 = tpu.reciprocal %533 {approx = true} : vector<2x1xf32> -> vector<2x1xf32>
    %535 = vector.broadcast %534 : vector<2x1xf32> to vector<2x16xf32>
    %536 = arith.mulf %531, %535 : vector<2x16xf32>
    %537 = tpu.concatenate %536, %536 in 1 : vector<2x16xf32>, vector<2x16xf32> -> vector<2x32xf32>
    %538 = arith.mulf %537, %19 : vector<2x32xf32>
    %cst_161 = arith.constant dense<0.000000e+00> : vector<2x16xf32>
    %539 = tpu.matmul %538, %489, %cst_161 {dimension_numbers = #tpu.dot_dimension_numbers<[1], [0], [0], [1], [0, 0, 1, 1], [], []>} : vector<2x32xf32>, vector<32x16xf32>, vector<2x16xf32> -> vector<2x16xf32>
    %540 = arith.mulf %497, %497 : vector<24x16xf32>
    %cst_162 = arith.constant dense<0.000000e+00> : vector<24xf32>
    %541 = vector.multi_reduction <add>, %540, %cst_162 [1] : vector<24x16xf32> to vector<24xf32>
    %542 = vector.shape_cast %541 : vector<24xf32> to vector<24x1xf32>
    %cst_163 = arith.constant 1.000000e-16 : f32
    %543 = vector.broadcast %cst_163 : f32 to vector<24x1xf32>
    %544 = arith.maximumf %542, %543 : vector<24x1xf32>
    %545 = math.rsqrt %544 : vector<24x1xf32>
    %546 = vector.broadcast %545 : vector<24x1xf32> to vector<24x16xf32>
    %547 = arith.mulf %497, %546 : vector<24x16xf32>
    %548 = arith.mulf %506, %506 : vector<2x16xf32>
    %cst_164 = arith.constant dense<0.000000e+00> : vector<2xf32>
    %549 = vector.multi_reduction <add>, %548, %cst_164 [1] : vector<2x16xf32> to vector<2xf32>
    %550 = vector.shape_cast %549 : vector<2xf32> to vector<2x1xf32>
    %cst_165 = arith.constant 1.000000e-16 : f32
    %551 = vector.broadcast %cst_165 : f32 to vector<2x1xf32>
    %552 = arith.maximumf %550, %551 : vector<2x1xf32>
    %553 = math.rsqrt %552 : vector<2x1xf32>
    %554 = vector.broadcast %553 : vector<2x1xf32> to vector<2x16xf32>
    %555 = arith.mulf %506, %554 : vector<2x16xf32>
    %cst_166 = arith.constant dense<0.000000e+00> : vector<2x24xf32>
    %556 = tpu.matmul %555, %547, %cst_166 {dimension_numbers = #tpu.dot_dimension_numbers<[1], [1], [0], [0], [0, 0, 1, 0], [], []>} : vector<2x16xf32>, vector<24x16xf32>, vector<2x24xf32> -> vector<2x24xf32>
    %557 = vector.extract_strided_slice %556 {offsets = [0, 0], sizes = [1, 12], strides = [1, 1]} : vector<2x24xf32> to vector<1x12xf32>
    %558 = vector.extract_strided_slice %556 {offsets = [1, 12], sizes = [1, 12], strides = [1, 1]} : vector<2x24xf32> to vector<1x12xf32>
    %559 = tpu.concatenate %557, %558 in 0 : vector<1x12xf32>, vector<1x12xf32> -> vector<2x12xf32>
    %cst_167 = arith.constant dense<0xFF800000> : vector<2xf32>
    %560 = vector.multi_reduction <maximumf>, %559, %cst_167 [1] : vector<2x12xf32> to vector<2xf32>
    %561 = vector.shape_cast %560 : vector<2xf32> to vector<2x1xf32>
    %562 = vector.broadcast %561 : vector<2x1xf32> to vector<2x12xf32>
    %563 = arith.subf %559, %562 : vector<2x12xf32>
    %564 = math.exp %563 : vector<2x12xf32>
    %cst_168 = arith.constant dense<0.000000e+00> : vector<2xf32>
    %565 = vector.multi_reduction <add>, %564, %cst_168 [1] : vector<2x12xf32> to vector<2xf32>
    %566 = vector.shape_cast %565 : vector<2xf32> to vector<2x1xf32>
    %567 = tpu.reciprocal %566 {approx = true} : vector<2x1xf32> -> vector<2x1xf32>
    %568 = vector.broadcast %567 : vector<2x1xf32> to vector<2x12xf32>
    %569 = arith.mulf %564, %568 : vector<2x12xf32>
    %570 = tpu.concatenate %569, %569 in 1 : vector<2x12xf32>, vector<2x12xf32> -> vector<2x24xf32>
    %571 = arith.mulf %570, %33 : vector<2x24xf32>
    %cst_169 = arith.constant dense<0.000000e+00> : vector<2x16xf32>
    %572 = tpu.matmul %571, %497, %cst_169 {dimension_numbers = #tpu.dot_dimension_numbers<[1], [0], [0], [1], [0, 0, 1, 1], [], []>} : vector<2x24xf32>, vector<24x16xf32>, vector<2x16xf32> -> vector<2x16xf32>
    %cst_170 = arith.constant dense<0.000000e+00> : vector<2x12xf32>
    %573 = tpu.matmul %571, %499, %cst_170 {dimension_numbers = #tpu.dot_dimension_numbers<[1], [0], [0], [1], [0, 0, 1, 1], [], []>} : vector<2x24xf32>, vector<24x12xf32>, vector<2x12xf32> -> vector<2x12xf32>
    %574 = tpu.concatenate %573, %573 in 1 : vector<2x12xf32>, vector<2x12xf32> -> vector<2x24xf32>
    %575 = arith.mulf %574, %33 : vector<2x24xf32>
    %cst_171 = arith.constant dense<0.000000e+00> : vector<2x16xf32>
    %576 = tpu.matmul %575, %497, %cst_171 {dimension_numbers = #tpu.dot_dimension_numbers<[1], [0], [0], [1], [0, 0, 1, 1], [], []>} : vector<2x24xf32>, vector<24x16xf32>, vector<2x16xf32> -> vector<2x16xf32>
    %cst_172 = arith.constant dense<0.000000e+00> : vector<24x2xf32>
    %577 = tpu.matmul %499, %569, %cst_172 {dimension_numbers = #tpu.dot_dimension_numbers<[1], [1], [0], [0], [0, 0, 1, 0], [], []>} : vector<24x12xf32>, vector<2x12xf32>, vector<24x2xf32> -> vector<24x2xf32>
    %578 = arith.mulf %577, %47 : vector<24x2xf32>
    %cst_173 = arith.constant dense<0.000000e+00> : vector<2x16xf32>
    %579 = tpu.matmul %578, %497, %cst_173 {dimension_numbers = #tpu.dot_dimension_numbers<[0], [0], [1], [1], [0, 1, 1, 1], [], []>} : vector<24x2xf32>, vector<24x16xf32>, vector<2x16xf32> -> vector<2x16xf32>
    %580 = tpu.concatenate %501, %539, %572, %576, %579, %435 in 1 : vector<2x8xf32>, vector<2x16xf32>, vector<2x16xf32>, vector<2x16xf32>, vector<2x16xf32>, vector<2x32xf32> -> vector<2x104xf32>
    %cst_174 = arith.constant dense<0.000000e+00> : vector<2x32xf32>
    %581 = tpu.matmul %580, %2, %cst_174 {dimension_numbers = #tpu.dot_dimension_numbers<[1], [0], [0], [1], [0, 0, 1, 1], [], []>} : vector<2x104xf32>, vector<104x32xf32>, vector<2x32xf32> -> vector<2x32xf32>
    %582 = vector.broadcast %3 : vector<1x32xf32> to vector<2x32xf32>
    %583 = arith.addf %581, %582 : vector<2x32xf32>
    %584 = math.tanh %583 : vector<2x32xf32>
    %cst_175 = arith.constant dense<0.000000e+00> : vector<2x100xf32>
    %585 = tpu.matmul %584, %4, %cst_175 {dimension_numbers = #tpu.dot_dimension_numbers<[1], [0], [0], [1], [0, 0, 1, 1], [], []>} : vector<2x32xf32>, vector<32x100xf32>, vector<2x100xf32> -> vector<2x100xf32>
    %586 = vector.broadcast %5 : vector<1x100xf32> to vector<2x100xf32>
    %587 = arith.addf %585, %586 : vector<2x100xf32>
    %588 = vector.extract_strided_slice %587 {offsets = [0, 0], sizes = [2, 8], strides = [1, 1]} : vector<2x100xf32> to vector<2x8xf32>
    %c3_176 = arith.constant 3 : index
    %c0_177 = arith.constant 0 : index
    %c0_178 = arith.constant 0 : index
    %589 = vector.load %arg7[%c3_176, %c0_177, %c0_178] : memref<4x2x8xf32, #tpu.memory_space<vmem>>, vector<1x2x8xf32>
    %590 = vector.shape_cast %589 : vector<1x2x8xf32> to vector<2x8xf32>
    %591 = vector.shape_cast %588 : vector<2x8xf32> to vector<1x2x8xf32>
    tpu.vector_store %arg7[%c3_176, %c0_177, %c0_178], %591 {strides = array<i32>} : memref<4x2x8xf32, #tpu.memory_space<vmem>>, vector<1x2x8xf32>,
    return
  }
}

</mosaic_0001>

<bundles_post_ra>
// kernel: dual_memory_ntm_forward.1
= control target key start
LH: loop header
LB: loop body
LE: loop exit
PB: predicated region body
PF: predicated region fallthrough
CT: control target
= control target key end

     0   :  { %vm89_vm0 = vcmask 64512   ;;  %v7442_v2 = vmov 0.0   ;;  %vm7443_vm1 = vmmov 0   ;;  %s8731_s0 = inlined_call_operand.vmem [shape: f32[4,2,8], index: 0, kind: input, shape index: {}]   ;;  %s8732_s1 = inlined_call_operand.vmem [shape: f32[8,32], index: 1, kind: input, shape index: {}]   ;;  %s8733_s2 = inlined_call_operand.vmem [shape: f32[1,32], index: 2, kind: input, shape index: {}]   ;;  %s8734_s3 = inlined_call_operand.vmem [shape: f32[104,32], index: 3, kind: input, shape index: {}]   ;;  %s8735_s4 = inlined_call_operand.vmem [shape: f32[1,32], index: 4, kind: input, shape index: {}]   ;;  %s8736_s5 = inlined_call_operand.vmem [shape: f32[32,100], index: 5, kind: input, shape index: {}]   ;;  %s8737_s6 = inlined_call_operand.vmem [shape: f32[1,100], index: 6, kind: input, shape index: {}]   ;;  %s8738_s7 = inlined_call_operand.hbm [shape: f32[4,2,8], index: 7, kind: output, shape index: {}]  }
   0x1   :  { %v7508_v0 = vld [vmem:[%s8732_s1] sm:$0xff]  ;;  %6405 = vmatprep.subr.mxu0 %v7442_v2  ;;  %6407 = vmatprep.mubr.msk.f32.mxu0 %vm7443_vm1, %v7442_v2 }
   0x2   :  { %v7513_v1 = vld [vmem:[%s8731_s0] sm:$0x3] }
   0x3   :  { %12 = vsyncpa [#allocation3], 0  ;;  %6406 = vmatpush3.msra.mxu0 %v7508_v0  ;;  %6418 = vmatprep.mubr.msk.f32.mxu1 %vm7443_vm1, %v7442_v2  ;;  %vm8744_vm2 = vcmask 130048   ;;  %v7530_v4 = vld [vmem:[%s8733_s2] ss:$0 sm:$0xff]  ;;  %s7444_s30 = smov 112   ;;  %v48_v43 = vlaneseq }
   0x4   :  { %6408 = vmatmul.mubr.msk.f32.vlgmr.msra.gmra.mrb[0].mxu0 %vm89_vm0, %v7513_v1  ;;  %v164_v3 = vsel %vm8744_vm2, 1e-12, %v7442_v2  ;;  %vm171_vm3 = vcmask 123904   ;;  %v7445_v13 = vmov 0.0|0.0   ;;  %vm7539_vm4 = vmpackc.low %vm8744_vm2, %vm8744_vm2  ;;  %s7446_s8 = smov 116   ;;  %vm8739_vm5 = vcmask 1040384  }
   0x5   :  { %6438 = vmatprep.mubr.msk.f32.mxu0 %vm7443_vm1, %v7442_v2  ;;  %165 = vadd.xlane.f32.xlu1 %v164_v3  ;;  %vm8740_vm6 = vcmask 91136   ;;  %s7447_s9 = smov 12   ;;  %v7570_v44 = vshrl.u32 %v48_v43, 7  ;;  %v7575_v46 = vand.u32 127, %v48_v43  ;;  %vm457_vm10 = vcmask 97280   ;;  %s7449_s10 = smov 16  }
   0x6   :  { %7052 = vmatprep.subr.bf16.mxu0 %v7445_v13  ;;  %7040 = vmatprep.subr.bf16.mxu1 %v7445_v13  ;;  %vm460_vm11 = vcmask 195584   ;;  %s7451_s17 = smov 8   ;;  %v32_v43 = vld [vmem:[%s8734_s3 + $0x18] sm:$0xff]  ;;  %s7452_s24 = smov 24  }
   0x7   :  { %v7573_v45 = vadd.s32 1, %v7570_v44  ;;  %v59_v47 = vmul.u32 12, %v7570_v44  ;;  %s7453_s14 = smov 40   ;;  %s7454_s22 = smov 56  }
   0x8   :  { %s7455_s18 = smov 120   ;;  %s7456_s19 = smov 72  }
   0x9   :  { %v61_v48 = vmul.u32 12, %v7573_v45  ;;  %vm60_vm7 = vcmp.ge.s32.totalorder %v7575_v46, %v59_v47  ;;  %s7457_s20 = smov 88   ;;  %s7458_s21 = smov 84  }
   0xa   :  { %s7459_s23 = smov 104   ;;  %s7460_s25 = smov 44  }
   0xb   :  { %vm62_vm8 = vcmp.lt.s32.totalorder %v7575_v46, %v61_v48  ;;  %s7461_s28 = smov 60  }
   0xc   :  { %vm63_vm9 = vmand %vm60_vm7, %vm62_vm8 }
   0xd   :  { %v7582_v49 = vsel %vm63_vm9, 1.0, %v7442_v2 }
  0x92   :  { %v166_v11 = vpop.xlane.xlu1 %165 }
  0x93   :  { %v167_v12 = vmax.f32 %v166_v11, 1e-16 }
  0x95   :  { %7271 = vrsqrt.f32 %v167_v12 }
  0x9f   :  { %v7272_v14 = vpop.eup %7271 }
  0xa0   :  { %v169_v15 = vmul.f32 1e-06, %v7272_v14  ;;  %v71_v14 = vadd.s32 1, %v7575_v46 }
  0xa2   :  { %v7041_v17 = vpack.c.bf16 %v169_v15, %v169_v15 }
  0xa4   :  { %7055 = vmatpush3.bf16.xpose.msk.msra.mxu0 %vm7539_vm4, %v7041_v17  ;;  %7043 = vmatpush3.bf16.xpose.msk.msra.mxu1 %vm7539_vm4, %v7041_v17 }
  0xa5   :  { %6436 = vmatprep.subr.mxu0 %v7442_v2  ;;  %7044 = vmatprep.subr.bf16.mxu1 %v7445_v13 }
  0xac   :  { %6437 = vmatpush3.xpose.msk.msra.mxu0 %vm8744_vm2, %v169_v15  ;;  %7047 = vmatpush3.bf16.xpose.msk.msra.mxu1 %vm7539_vm4, %v7041_v17  ;;  %v67_v15 = vmul.u32 12, %v7575_v46  ;;  %v72_v17 = vmul.u32 12, %v71_v14 }
  0xad   :  { %6450 = vmatprep.subr.mxu0 %v7442_v2  ;;  %7048 = vmatprep.subr.bf16.mxu1 %v7445_v13 }
  0xae   :  { %vm68_vm12 = vcmp.ge.s32.totalorder %v7570_v44, %v67_v15  ;;  %vm73_vm13 = vcmp.lt.s32.totalorder %v7570_v44, %v72_v17 }
  0xaf   :  { %vm76_vm14 = vmand %vm68_vm12, %vm73_vm13 }
  0xd7   :  { %v159_v5 = vpop.f32.mrb[0].mxu0 }
  0xd8   :  { %v160_v6 = vadd.f32 %v7530_v4, %v159_v5  ;;  %v6409_v7 = vpop.f32.mrb[1].mxu0 }
  0xda   :  { %v170_v8 = vmul.f32 %v160_v6, %v160_v6 }
  0xdc   :  { %352 = vrot.lane.b32.xlu0 %v170_v8, %s7444_s30  ;;  %v172_v22 = vsel %vm171_vm3, %v170_v8, 0.0 }
 0x14e   :  { %v353_v9 = vpop.permute.xlu0 %352 }
 0x14f   :  { %v355_v10 = vsel %vm171_vm3, %v353_v9, 0.0  ;;  %v7448_v9 = vmov 9.983778e-07|9.983778e-07  }
 0x150   :  { %356 = vadd.xlane.f32.xlu0 %v355_v10 }
 0x1dd   :  { %v357_v18 = vpop.xlane.xlu0 %356 }
 0x1de   :  { %v358_v19 = vmax.f32 %v357_v18, 1e-16  ;;  %v65_v18 = vadd.s32 8, %v7570_v44 }
 0x1e0   :  { %7273 = vrsqrt.f32 %v358_v19  ;;  %vm69_vm15 = vcmp.ge.s32.totalorder %v65_v18, %v67_v15  ;;  %vm74_vm7 = vcmp.lt.s32.totalorder %v65_v18, %v72_v17  ;;  %v66_v19 = vadd.s32 16, %v7570_v44 }
 0x1e1   :  { %vm77_vm8 = vmand %vm69_vm15, %vm74_vm7  ;;  %vm8749_vm15 = vcmask 457728   ;;  %vm8748_vm7 = vcmask 588800  }
 0x1e2   :  { %vm70_vm9 = vcmp.ge.s32.totalorder %v66_v19, %v67_v15  ;;  %v44_v15 = vld [vmem:[%s8736_s5 + $0x8] sm:$0xff] }
 0x1ea   :  { %v7274_v20 = vpop.eup %7273 }
 0x1eb   :  { %v360_v21 = vmul.f32 %v7274_v20, %v160_v6  ;;  %v7620_v20 = vsel %vm76_vm14, 1.0, %v7442_v2 }
 0x1ed   :  { %362 = vrot.lane.b32.xlu1 %v360_v21, %s7444_s30 }
 0x211   :  { %173 = vadd.xlane.f32.xlu1 %v172_v22  ;;  %v7624_v22 = vsel %vm77_vm8, 1.0, %v7442_v2  ;;  %vm8747_vm8 = vcmask 850944  }
 0x25f   :  { %v363_v23 = vpop.permute.xlu1 %362 }
 0x260   :  { %6439 = vmatmul.mubr.msk.f32.vlgmr.msra.gmra.mrb[2].mxu0 %vm8744_vm2, %v363_v23 }
 0x261   :  { %6451 = vmatpush3.msra.mxu0 %v7442_v2  ;;  %6452 = vmatprep.mubr.msk.f32.mxu0 %vm7443_vm1, %v7442_v2 }
 0x262   :  { %6464 = vmatprep.subr.mxu0 %v7442_v2 }
 0x29e   :  { %v174_v24 = vpop.xlane.xlu1 %173 }
 0x29f   :  { %v175_v25 = vmax.f32 %v174_v24, 1e-16 }
 0x2a1   :  { %7275 = vrsqrt.f32 %v175_v25 }
 0x2ab   :  { %v7276_v26 = vpop.eup %7275 }
 0x2ac   :  { %v177_v27 = vmul.f32 %v7276_v26, %v160_v6  ;;  %v52_v26 = vmul.u32 16, %v7570_v44 }
 0x2ae   :  { %6419 = vmatmul.mubr.msk.f32.vlgmr.msra.gmra.mrb[0].mxu1 %vm8744_vm2, %v177_v27  ;;  %v55_v27 = vmul.u32 16, %v7573_v45  ;;  %vm53_vm12 = vcmp.ge.s32.totalorder %v7575_v46, %v52_v26  ;;  %v33_v45 = vld [vmem:[%s8734_s3 + $0x20] sm:$0xff] }
 0x2af   :  { %6429 = vmatprep.mubr.msk.f32.mxu1 %vm7443_vm1, %v7442_v2  ;;  %7049 = vmatpush3.bf16.msra.mxu1 %v7448_v9 }
 0x2b0   :  { %7050 = vmatprep.subr.bf16.mxu1 %v7445_v13  ;;  %vm56_vm13 = vcmp.lt.s32.totalorder %v7575_v46, %v55_v27  ;;  %v34_v46 = vld [vmem:[%s8734_s3 + $0x28] sm:$0xff] }
 0x2b1   :  { %vm57_vm14 = vmand %vm53_vm12, %vm56_vm13  ;;  %vm8745_vm12 = vcmask 189504   ;;  %vm8741_vm13 = vcmask 58368  }
 0x2b3   :  { %7051 = vmatpush3.bf16.msra.mxu1 %v7448_v9 }
 0x2b4   :  { %7056 = vmatprep.subr.bf16.mxu1 %v7445_v13 }
 0x333   :  { %v432_v28 = vpop.f32.mrb[2].mxu0 }
 0x334   :  { %437 = vrot.lane.b32.xlu0 %v432_v28, %s7446_s8  ;;  %v6440_v29 = vpop.f32.mrb[3].mxu0 }
 0x381   :  { %v250_v30 = vpop.f32.mrb[0].mxu1 }
 0x382   :  { %v6420_v31 = vpop.f32.mrb[1].mxu1 }
 0x3a6   :  { %v438_v32 = vpop.permute.xlu0 %437 }
 0x3a7   :  { %v440_v33 = vsel %vm8739_vm5, %v432_v28, %v438_v32  ;;  %v7636_v28 = vsel %vm57_vm14, 1.0, %v7442_v2  ;;  %vm8752_vm14 = vcmask 91136  }
 0x3a8   :  { %v442_v34 = vsel %vm8740_vm6, %v440_v33, -inf }
 0x3a9   :  { %443 = vmax.xlane.f32.xlu0 %v442_v34 }
 0x436   :  { %v444_v35 = vpop.xlane.xlu0 %443 }
 0x437   :  { %v445_v36 = vsub.f32 %v440_v33, %v444_v35  ;;  %v7450_v33 = vmov 1e-06  }
 0x439   :  { %v446_v37 = vmul.f32 1.442695, %v445_v36 }
 0x43b   :  { %7277 = vpow2.f32 %v446_v37 }
 0x445   :  { %v7278_v38 = vpop.eup %7277 }
 0x446   :  { %v448_v39 = vsel %vm8740_vm6, %v7278_v38, 0.0 }
 0x447   :  { %449 = vadd.xlane.f32.xlu1 %v448_v39  ;;  %v30_v39 = vld [vmem:[%s8734_s3 + $0x8] sm:$0xff] }
 0x4d4   :  { %v450_v40 = vpop.xlane.xlu1 %449 }
 0x4d5   :  { %7279 = vrcp.f32 %v450_v40  ;;  %v31_v40 = vld [vmem:[%s8734_s3 + $0x10] sm:$0xff] }
 0x4d6   :  { %v7678_v44 = vpack.c.bf16 %v32_v43, %v31_v40 }
 0x4df   :  { %v7280_v41 = vpop.eup %7279 }
 0x4e0   :  { %v452_v42 = vmul.f32 %v7280_v41, %v7278_v38  ;;  %v29_v38 = vld [vmem:[%s8734_s3] sm:$0xff] }
 0x4e2   :  { %454 = vrot.lane.b32.xlu1 %v452_v42, %s7447_s9 }
 0x4e6   :  { %255 = vrot.lane.b32.xlu1 %v250_v30, %s7444_s30 }
 0x554   :  { %v455_v50 = vpop.permute.xlu1 %454 }
 0x555   :  { %v458_v51 = vsel %vm457_vm10, %v452_v42, %v455_v50  ;;  %v7689_v50 = vpack.c.bf16 %v34_v46, %v33_v45 }
 0x556   :  { %v7586_v52 = vmul.f32 %v458_v51, %v7582_v49  ;;  %v35_v51 = vld [vmem:[%s8734_s3 + $0x30] sm:$0xff] }
 0x558   :  { %6453 = vmatmul.mubr.msk.f32.vlgmr.msra.gmra.mrb[4].mxu0 %vm460_vm11, %v7586_v52  ;;  %v256_v53 = vpop.permute.xlu1 %255 }
 0x559   :  { %6465 = vmatpush3.xpose.msk.msra.mxu0 %vm457_vm10, %v452_v42  ;;  %v259_v54 = vsel %vm8739_vm5, %v250_v30, %v256_v53  ;;  %6466 = vmatprep.mubr.msk.f32.mxu0 %vm7443_vm1, %v7442_v2  ;;  %vm75_vm5 = vcmp.lt.s32.totalorder %v66_v19, %v72_v17  ;;  %v7672_v42 = vpack.c.bf16 %v30_v39, %v29_v38  ;;  %v45_v17 = vld [vmem:[%s8736_s5 + $0x10] sm:$0xff]  ;;  %v46_v19 = vld [vmem:[%s8736_s5 + $0x18] sm:$0xff] }
 0x55a   :  { %v260_v55 = vsel %vm171_vm3, %v259_v54, -inf  ;;  %7062 = vmatprep.subr.bf16.mxu0 %v7445_v13  ;;  %vm78_vm6 = vmand %vm70_vm9, %vm75_vm5  ;;  %vm277_vm5 = vcmask 261120   ;;  %vm8746_vm9 = vcmask 550336  }
 0x55b   :  { %261 = vmax.xlane.f32.xlu1 %v260_v55  ;;  %v7628_v24 = vsel %vm78_vm6, 1.0, %v7442_v2  ;;  %v37_v55 = vld [vmem:[%s8734_s3 + $0x40] sm:$0xff]  ;;  %vm894_vm6 = vcmask 326656  }
 0x55c   :  { %6467 = vmatmul.mubr.f32.vlgmr.msra.gmra.mrb[6].mxu0 %v7442_v2 }
 0x55d   :  { %6469 = vmatprep.mubr.msk.f32.mxu0 %vm7443_vm1, %v7442_v2  ;;  %7064 = vmatpush3.bf16.msra.mxu0 %v7672_v42 }
 0x55e   :  { %7065 = vmatprep.subr.bf16.mxu0 %v7445_v13 }
 0x560   :  { %6470 = vmatmul.mubr.f32.gmra.mrb[8].mxu0 %v7442_v2 }
 0x561   :  { %6472 = vmatprep.mubr.msk.f32.mxu0 %vm7443_vm1, %v7442_v2  ;;  %7067 = vmatpush3.bf16.msra.mxu0 %v7678_v44 }
 0x562   :  { %7068 = vmatprep.subr.bf16.mxu0 %v7445_v13 }
 0x564   :  { %6473 = vmatmul.mubr.f32.gmra.mrb[10].mxu0 %v7442_v2 }
 0x565   :  { %6510 = vmatprep.mubr.msk.f32.mxu0 %vm7443_vm1, %v7442_v2  ;;  %7070 = vmatpush3.bf16.msra.mxu0 %v7689_v50 }
 0x566   :  { %7071 = vmatprep.subr.bf16.mxu0 %v7445_v13 }
 0x5e8   :  { %v262_v56 = vpop.xlane.xlu1 %261 }
 0x5e9   :  { %v263_v57 = vsub.f32 %v259_v54, %v262_v56  ;;  %v38_v56 = vld [vmem:[%s8734_s3 + $0x48] sm:$0xff] }
 0x5eb   :  { %v264_v58 = vmul.f32 1.442695, %v263_v57 }
 0x5ed   :  { %7281 = vpow2.f32 %v264_v58  ;;  %v7710_v58 = vpack.c.bf16 %v38_v56, %v37_v55 }
 0x5f7   :  { %v7282_v59 = vpop.eup %7281 }
 0x5f8   :  { %v266_v60 = vsel %vm171_vm3, %v7282_v59, 0.0 }
 0x5f9   :  { %267 = vadd.xlane.f32.xlu0 %v266_v60  ;;  %v40_v60 = vld [vmem:[%s8734_s3 + $0x58] sm:$0xff] }
 0x62b   :  { %v7606_v61 = vpop.f32.mrb[4].mxu0 }
 0x62c   :  { %v6454_v62 = vpop.f32.mrb[5].mxu0 }
 0x62d   :  { %v7728_v62 = vld [vmem:[%s8734_s3 + $0x60] sm:$0xff] }
 0x62f   :  { %v754_v63 = vpop.f32.mrb[6].mxu0 }
 0x630   :  { %v6468_v3 = vpop.f32.mrb[7].mxu0  ;;  %v768_v21 = vmul.f32 %v754_v63, %v7620_v20 }
 0x633   :  { %v759_v5 = vpop.f32.mrb[8].mxu0 }
 0x634   :  { %v6471_v6 = vpop.f32.mrb[9].mxu0  ;;  %v769_v23 = vmul.f32 %v759_v5, %v7624_v22 }
 0x637   :  { %v764_v7 = vpop.f32.mrb[10].mxu0 }
 0x638   :  { %v6474_v8 = vpop.f32.mrb[11].mxu0  ;;  %v770_v25 = vmul.f32 %v764_v7, %v7628_v24 }
 0x686   :  { %v268_v10 = vpop.xlane.xlu0 %267 }
 0x687   :  { %7283 = vrcp.f32 %v268_v10 }
 0x691   :  { %v7284_v11 = vpop.eup %7283 }
 0x692   :  { %v270_v12 = vmul.f32 %v7284_v11, %v7282_v59  ;;  %v39_v59 = vld [vmem:[%s8734_s3 + $0x50] sm:$0xff] }
 0x694   :  { %272 = vrot.lane.b32.xlu0 %v270_v12, %s7449_s10 }
 0x698   :  { %605 = vrot.lane.b32.xlu0 %v7606_v61, %s7447_s9 }
 0x6b6   :  { %771 = vxpose.xlu0.b32.start [1/3] (short) (narrow) %v768_v21, 8  ;;  %v7757_v21 = vpack.c.bf16 %v46_v19, %v45_v17 }
 0x6ba   :  { %772 = vxpose.xlu0.b32.cont [2/3] (short) (narrow) %v769_v23, 8  ;;  %v7764_v23 = vld [vmem:[%s8735_s4] ss:$0 sm:$0xff] }
 0x6be   :  { %773 = vxpose.xlu0.b32.end [3/3] (short) (narrow) %v770_v25, 8 }
 0x706   :  { %v273_v29 = vpop.permute.xlu0 %272 }
 0x707   :  { %v275_v30 = vsel %vm8744_vm2, %v270_v12, %v273_v29 }
 0x708   :  { %v276_v31 = vmul.f32 %v275_v30, %v7636_v28  ;;  %v7774_v30 = vld [vmem:[%s8737_s6] ss:$0 sm:$0xff] }
 0x70a   :  { %6430 = vmatmul.mubr.msk.f32.vlgmr.msra.gmra.mrb[2].mxu1 %vm277_vm5, %v276_v31  ;;  %v606_v32 = vpop.permute.xlu0 %605 }
 0x70b   :  { %7057 = vmatpush3.bf16.msra.mxu1 %v7448_v9  ;;  %6447 = vmatprep.mubr.msk.f32.mxu1 %vm7443_vm1, %v7442_v2  ;;  %v608_v34 = vsel %vm457_vm10, %v7606_v61, %v606_v32  ;;  %v7720_v61 = vpack.c.bf16 %v40_v60, %v39_v59 }
 0x70c   :  { %6445 = vmatprep.subr.mxu1 %v7442_v2  ;;  %v609_v35 = vmul.f32 %v608_v34, %v7582_v49 }
 0x70f   :  { %6446 = vmatpush3.msra.mxu1 %v7450_v33 }
 0x710   :  { %6448 = vmatmul.mubr.msk.f32.vlgmr.msra.gmra.mrb[4].mxu1 %vm460_vm11, %v7586_v52  ;;  %7058 = vmatprep.subr.bf16.mxu1 %v7445_v13  ;;  %v36_v52 = vld [vmem:[%s8734_s3 + $0x38] sm:$0xff] }
 0x711   :  { %7059 = vmatpush3.bf16.msra.mxu1 %v7448_v9  ;;  %6461 = vmatprep.mubr.msk.f32.mxu1 %vm7443_vm1, %v7442_v2  ;;  %v7699_v53 = vpack.c.bf16 %v36_v52, %v35_v51 }
 0x712   :  { %6459 = vmatprep.subr.mxu1 %v7442_v2 }
 0x713   :  { %7073 = vmatpush3.bf16.msra.mxu0 %v7699_v53 }
 0x714   :  { %7074 = vmatprep.subr.bf16.mxu0 %v7445_v13 }
 0x715   :  { %6460 = vmatpush3.msra.mxu1 %v7450_v33 }
 0x716   :  { %6462 = vmatmul.mubr.msk.f32.vlgmr.msra.gmra.mrb[6].mxu1 %vm460_vm11, %v609_v35  ;;  %7060 = vmatprep.subr.bf16.mxu1 %v7445_v13 }
 0x717   :  { %7061 = vmatpush3.bf16.msra.mxu1 %v7448_v9  ;;  %6481 = vmatprep.mubr.msk.f32.mxu1 %vm7443_vm1, %v7442_v2 }
 0x718   :  { %6479 = vmatprep.subr.mxu1 %v7442_v2  ;;  %7076 = vmatpush3.bf16.msra.mxu0 %v7710_v58 }
 0x719   :  { %7077 = vmatprep.subr.bf16.mxu0 %v7445_v13 }
 0x71b   :  { %6480 = vmatpush3.msra.mxu1 %v7450_v33 }
 0x71c   :  { %7080 = vmatprep.subr.bf16.mxu1 %v7445_v13  ;;  %7079 = vmatpush3.bf16.msra.mxu0 %v7720_v61 }
 0x71d   :  { %6508 = vmatprep.subr.mxu0 %v7442_v2 }
 0x720   :  { %6509 = vmatpush3.msra.mxu0 %v7728_v62 }
 0x721   :  { %6540 = vmatprep.subr.mxu0 %v7442_v2 }
 0x736   :  { %v787_v36 = vpop.trf.xlu0 }
 0x737   :  { %6482 = vmatmul.mubr.msk.f32.vlgmr.msra.gmra.mrb[8].mxu1 %vm460_vm11, %v787_v36 }
 0x738   :  { %6521 = vmatprep.mubr.msk.f32.mxu1 %vm7443_vm1, %v7442_v2 }
 0x7dd   :  { %v347_v37 = vpop.f32.mrb[2].mxu1 }
 0x7de   :  { %877 = vrot.lane.b32.xlu1 %v347_v37, %s7451_s17  ;;  %v6431_v41 = vpop.f32.mrb[3].mxu1 }
 0x7e3   :  { %v530_v47 = vpop.f32.mrb[4].mxu1 }
 0x7e4   :  { %881 = vrot.lane.b32.xlu1 %v530_v47, %s7452_s24  ;;  %v6449_v48 = vpop.f32.mrb[5].mxu1 }
 0x7e9   :  { %v679_v54 = vpop.f32.mrb[6].mxu1 }
 0x7ea   :  { %885 = vrot.lane.b32.xlu1 %v679_v54, %s7453_s14  ;;  %v6463_v57 = vpop.f32.mrb[7].mxu1 }
 0x80a   :  { %v872_v63 = vpop.f32.mrb[8].mxu1 }
 0x80b   :  { %889 = vrot.lane.b32.xlu1 %v872_v63, %s7454_s22  ;;  %v6483_v3 = vpop.f32.mrb[9].mxu1 }
 0x850   :  { %v878_v5 = vpop.permute.xlu1 %877 }
 0x851   :  { %v892_v8 = vsel %vm89_vm0, %v7513_v1, %v878_v5  ;;  %v43_v1 = vld [vmem:[%s8736_s5] sm:$0xff] }
 0x852   :  { %v7751_v18 = vpack.c.bf16 %v44_v15, %v43_v1 }
 0x854   :  { %7082 = vmatpush3.bf16.msra.mxu1 %v7751_v18 }
 0x855   :  { %7083 = vmatprep.subr.bf16.mxu1 %v7445_v13 }
 0x856   :  { %v882_v6 = vpop.permute.xlu1 %881 }
 0x857   :  { %v893_v9 = vsel %vm460_vm11, %v892_v8, %v882_v6 }
 0x858   :  { %7085 = vmatpush3.bf16.msra.mxu1 %v7757_v21 }
 0x85c   :  { %v886_v7 = vpop.permute.xlu1 %885 }
 0x85d   :  { %v895_v10 = vsel %vm894_vm6, %v893_v9, %v886_v7 }
 0x87d   :  { %v890_v11 = vpop.permute.xlu1 %889 }
 0x87e   :  { %v897_v12 = vsel %vm8749_vm15, %v895_v10, %v890_v11 }
 0x87f   :  { %v899_v14 = vsel %vm8748_vm7, %v897_v12, 0.0 }
 0x880   :  { %6511 = vmatmul.mubr.msk.f32.vlgmr.msra.gmra.mrb[12].mxu0 %vm8747_vm8, %v899_v14 }
 0x881   :  { %6542 = vmatprep.mubr.msk.f32.mxu0 %vm7443_vm1, %v7442_v2 }
 0x953   :  { %v976_v25 = vpop.f32.mrb[12].mxu0 }
 0x954   :  { %v977_v26 = vadd.f32 %v7764_v23, %v976_v25  ;;  %v6512_v27 = vpop.f32.mrb[13].mxu0 }
 0x956   :  { %7285 = vtanh.f32 %v977_v26 }
 0x960   :  { %v7767_v29 = vpop.eup %7285 }
 0x961   :  { %6522 = vmatmul.mubr.msk.f32.vlgmr.msra.gmra.mrb[10].mxu1 %vm277_vm5, %v7767_v29 }
 0xa34   :  { %v1056_v31 = vpop.f32.mrb[10].mxu1 }
 0xa35   :  { %v1057_v32 = vadd.f32 %v7774_v30, %v1056_v31  ;;  %v6523_v33 = vpop.f32.mrb[11].mxu1 }
 0xa37   :  { %v1086_v34 = vsel %vm8746_vm9, %v1057_v32, -inf  ;;  %v1063_v35 = vsel %vm8745_vm12, %v1057_v32, -inf  ;;  %1061 = vst.msk [vmem:[#allocation2] sm:$0x3] %vm8741_vm13, %v1057_v32  ;;  %v5986_v54 = vmul.f32 -1.442695, %v1057_v32 }
 0xa38   :  { %1087 = vmax.xlane.f32.xlu0 %v1086_v34  ;;  %1064 = vmax.xlane.f32.xlu1 %v1063_v35  ;;  %vm8742_vm13 = vcmask 15360  }
 0xac5   :  { %v1088_v36 = vpop.xlane.xlu0 %1087  ;;  %v1065_v37 = vpop.xlane.xlu1 %1064 }
 0xac6   :  { %v1066_v38 = vsub.f32 %v1057_v32, %v1065_v37  ;;  %v1089_v39 = vsub.f32 %v1057_v32, %v1088_v36 }
 0xac8   :  { %v1067_v40 = vmul.f32 1.442695, %v1066_v38  ;;  %v1090_v41 = vmul.f32 1.442695, %v1089_v39 }
 0xaca   :  { %7287 = vpow2.f32 %v1067_v40 }
 0xacb   :  { %7289 = vpow2.f32 %v1090_v41 }
 0xacc   :  { %7291 = vtanh.f32 %v1057_v32 }
 0xad4   :  { %v7288_v43 = vpop.eup %7287 }
 0xad5   :  { %1070 = vrot.lane.b32.xlu1 %v7288_v43, %s7455_s18  ;;  %v7290_v45 = vpop.eup %7289 }
 0xad6   :  { %v7292_v52 = vpop.eup %7291 }
 0xad9   :  { %1093 = vrot.lane.b32.xlu1 %v7290_v45, %s7456_s19 }
 0xb47   :  { %v1071_v46 = vpop.permute.xlu1 %1070 }
 0xb48   :  { %v1073_v47 = vsel %vm171_vm3, %v1071_v46, 0.0 }
 0xb49   :  { %1074 = vadd.xlane.f32.xlu0 %v1073_v47 }
 0xb4b   :  { %v1094_v48 = vpop.permute.xlu1 %1093 }
 0xb4c   :  { %v1096_v51 = vsel %vm8752_vm14, %v1094_v48, 0.0  ;;  %vm8743_vm14 = vcmask 1041408  }
 0xb4d   :  { %1097 = vadd.xlane.f32.xlu1 %v1096_v51 }
 0xb5e   :  { %1247 = vrot.lane.b32.xlu1 %v7292_v52, %s7457_s20 }
 0xbd6   :  { %v1075_v55 = vpop.xlane.xlu0 %1074 }
 0xbd7   :  { %7293 = vrcp.f32 %v1075_v55 }
 0xbd8   :  { %7295 = vpow2.f32 %v5986_v54 }
 0xbda   :  { %v1098_v56 = vpop.xlane.xlu1 %1097 }
 0xbdb   :  { %7297 = vrcp.f32 %v1098_v56 }
 0xbde   :  { %v1248_v17 = vpop.permute.xlu1 %1247 }
 0xbe1   :  { %v7294_v57 = vpop.eup %7293 }
 0xbe2   :  { %v7296_v59 = vpop.eup %7295  ;;  %v1077_v60 = vmul.f32 %v7294_v57, %v7288_v43 }
 0xbe3   :  { %v1081_v63 = vadd.f32 1.0, %v7296_v59 }
 0xbe4   :  { %1102 = vrot.lane.b32.xlu0 %v1077_v60, %s7455_s18 }
 0xbe5   :  { %v7298_v3 = vpop.eup %7297  ;;  %7299 = vrcp.f32 %v1081_v63 }
 0xbe6   :  { %v1100_v5 = vmul.f32 %v7298_v3, %v7290_v45 }
 0xbe8   :  { %1105 = vrot.lane.b32.xlu0 %v1077_v60, %s7451_s17 }
 0xbec   :  { %1349 = vrot.lane.b32.xlu0 %v1100_v5, %s7456_s19 }
 0xbef   :  { %v7789_v6 = vpop.eup %7299 }
 0xbf0   :  { %1352 = vrot.lane.b32.xlu0 %v1100_v5, %s7458_s21 }
 0xbf4   :  { %1143 = vrot.lane.b32.xlu0 %v7789_v6, %s7459_s23 }
 0xbf8   :  { %1482 = vrot.lane.b32.xlu0 %v7292_v52, %s7460_s25 }
 0xc56   :  { %v1103_v7 = vpop.permute.xlu0 %1102 }
 0xc5a   :  { %v1106_v8 = vpop.permute.xlu0 %1105 }
 0xc5b   :  { %v1108_v9 = vsel %vm8744_vm2, %v1103_v7, %v1106_v8 }
 0xc5c   :  { %v1109_v10 = vmul.f32 %v1108_v9, %v7636_v28 }
 0xc5e   :  { %1110 = vxpose.xlu0.b32.start.end [1/1] (short) (narrow) %v1109_v10, 32  ;;  %v7796_v11 = vpop.permute.xlu0 %1349 }
 0xc62   :  { %v1353_v12 = vpop.permute.xlu0 %1352 }
 0xc63   :  { %v1355_v14 = vsel %vm457_vm10, %v7796_v11, %v1353_v12 }
 0xc64   :  { %v1356_v1 = vmul.f32 %v1355_v14, %v7582_v49 }
 0xc66   :  { %1357 = vxpose.xlu1.b32.start.end [1/1] (short) (narrow) %v1356_v1, 24  ;;  %v1144_v15 = vpop.permute.xlu0 %1143 }
 0xc67   :  { %6524 = vmatprep.subr.msk.mxu1 %vm8743_vm14, %v1144_v15 }
 0xc68   :  { %6525 = vmatpush3.msk.msra.mxu1 %vm8743_vm14, %v1144_v15 }
 0xc69   :  { %6532 = vmatprep.subr.msk.mxu1 %vm8743_vm14, %v1248_v17 }
 0xc6a   :  { %v1483_v19 = vpop.permute.xlu0 %1482 }
 0xcde   :  { %v1126_v25 = vpop.trf.xlu0 }
 0xcdf   :  { %6526 = vmatprep.mubr.msk.f32.mxu1 %vm8742_vm13, %v1126_v25 }
 0xce2   :  { %v1127_v26 = vpop.trf.xlu0 }
 0xce3   :  { %6527 = vmatmul.mubr.msk.f32.vlgmr.msra.gmra.mrb[12].mxu1 %vm8742_vm13, %v1127_v26 }
 0xce4   :  { %6533 = vmatpush3.msk.msra.mxu1 %vm8743_vm14, %v1248_v17 }
 0xce5   :  { %6551 = vmatprep.subr.mxu1 %v7442_v2 }
 0xce6   :  { %v1128_v27 = vpop.trf.xlu0  ;;  %v7814_v32 = vpop.trf.xlu1 }
 0xce7   :  { %6529 = vmatprep.mubr.msk.f32.mxu1 %vm8742_vm13, %v1128_v27 }
 0xcea   :  { %v1129_v31 = vpop.trf.xlu0  ;;  %v7820_v33 = vpop.trf.xlu1 }
 0xceb   :  { %6530 = vmatmul.mubr.msk.f32.gmra.mrb[14].mxu1 %vm8742_vm13, %v1129_v31 }
 0xcec   :  { %6534 = vmatprep.mubr.msk.f32.mxu1 %vm8742_vm13, %v1126_v25 }
 0xcee   :  { %v7832_v34 = vpop.trf.xlu1 }
 0xcef   :  { %6535 = vmatmul.mubr.msk.f32.vlgmr.msra.gmra.mrb[16].mxu1 %vm8742_vm13, %v1127_v26 }
 0xcf0   :  { %6552 = vmatpush3.msk.msra.mxu1 %vm8743_vm14, %v1483_v19  ;;  %6537 = vmatprep.mubr.msk.f32.mxu1 %vm8742_vm13, %v1128_v27 }
 0xcf1   :  { %6573 = vmatprep.subr.mxu1 %v7442_v2 }
 0xcf3   :  { %6538 = vmatmul.mubr.msk.f32.gmra.mrb[18].mxu1 %vm8742_vm13, %v1129_v31 }
 0xcf4   :  { %6553 = vmatprep.mubr.msk.f32.mxu1 %vm7443_vm1, %v7442_v2 }
 0xcf7   :  { %6554 = vmatmul.mubr.msk.f32.vlgmr.msra.gmra.mrb[20].mxu1 %vm8742_vm13, %v7814_v32 }
 0xcf8   :  { %6556 = vmatprep.mubr.msk.f32.mxu1 %vm7443_vm1, %v7442_v2  ;;  %6574 = vmatpush3.msra.mxu1 %v7508_v0  ;;  %v7841_v0 = vld [vmem:[%s8731_s0 + $0x2] sm:$0x3] }
 0xcf9   :  { %7094 = vmatprep.subr.bf16.mxu1 %v7445_v13 }
 0xcfb   :  { %6557 = vmatmul.mubr.msk.f32.gmra.mrb[22].mxu1 %vm8742_vm13, %v7820_v33 }
 0xcfc   :  { %6559 = vmatprep.mubr.msk.f32.mxu1 %vm7443_vm1, %v7442_v2 }
 0xcff   :  { %6560 = vmatmul.mubr.msk.f32.gmra.mrb[24].mxu1 %vm8742_vm13, %v7832_v34 }
 0xd00   :  { %6575 = vmatprep.mubr.msk.f32.mxu1 %vm7443_vm1, %v7442_v2 }
 0xd03   :  { %6576 = vmatmul.mubr.msk.f32.vlgmr.msra.gmra.mrb[26].mxu1 %vm89_vm0, %v7841_v0 }
 0xd04   :  { %6597 = vmatprep.mubr.msk.f32.mxu1 %vm7443_vm1, %v7442_v2 }
 0xdb6   :  { %v6528_v35 = vpop.f32.mrb[12].mxu1 }
 0xdb7   :  { %v1227_v36 = vpop.f32.mrb[13].mxu1  ;;  %v1337_v37 = vsub.f32 1.0, %v6528_v35 }
 0xdb8   :  { %v1336_v38 = vsub.f32 1.0, %v1227_v36 }
 0xdb9   :  { %v1341_v41 = vmul.f32 1e-06, %v1337_v37 }
 0xdba   :  { %v1340_v45 = vmul.f32 1e-06, %v1336_v38 }
 0xdbe   :  { %v6531_v39 = vpop.f32.mrb[14].mxu1 }
 0xdbf   :  { %v1237_v40 = vpop.f32.mrb[15].mxu1  ;;  %v1339_v43 = vsub.f32 1.0, %v6531_v39 }
 0xdc0   :  { %v1338_v46 = vsub.f32 1.0, %v1237_v40 }
 0xdc1   :  { %v1343_v54 = vmul.f32 1e-06, %v1339_v43 }
 0xdc2   :  { %v6536_v47 = vpop.f32.mrb[16].mxu1  ;;  %v1342_v56 = vmul.f32 1e-06, %v1338_v46 }
 0xdc3   :  { %v7847_v48 = vadd.f32 %v6536_v47, %v1341_v41  ;;  %v1317_v51 = vpop.f32.mrb[17].mxu1 }
 0xdc4   :  { %v7849_v52 = vadd.f32 %v1340_v45, %v1317_v51 }
 0xdc5   :  { %v1774_v55 = vmul.f32 %v7847_v48, %v7847_v48 }
 0xdc6   :  { %v6539_v57 = vpop.f32.mrb[18].mxu1  ;;  %v7095_v59 = vpack.c.bf16 %v7847_v48, %v7849_v52  ;;  %v1773_v60 = vmul.f32 %v7849_v52, %v7849_v52 }
 0xdc7   :  { %v7857_v63 = vadd.f32 %v6539_v57, %v1343_v54  ;;  %v1327_v3 = vpop.f32.mrb[19].mxu1  ;;  %v1780_v5 = vsel %vm8744_vm2, %v1774_v55, 0.0 }
 0xdc8   :  { %v7860_v7 = vadd.f32 %v1342_v56, %v1327_v3  ;;  %1781 = vadd.xlane.f32.xlu1 %v1780_v5  ;;  %7096 = vmatpush3.bf16.msra.mxu1 %v7095_v59  ;;  %v1777_v8 = vsel %vm8744_vm2, %v1773_v60, 0.0 }
 0xdc9   :  { %1778 = vadd.xlane.f32.xlu0 %v1777_v8  ;;  %7097 = vmatprep.subr.bf16.mxu1 %v7445_v13  ;;  %v1776_v15 = vmul.f32 %v7857_v63, %v7857_v63 }
 0xdca   :  { %v7864_v9 = vpop.f32.mrb[20].mxu1  ;;  %v7098_v10 = vpack.c.bf16 %v7857_v63, %v7860_v7  ;;  %v1775_v12 = vmul.f32 %v7860_v7, %v7860_v7 }
 0xdcb   :  { %v6555_v14 = vpop.f32.mrb[21].mxu1  ;;  %v1786_v25 = vsel %vm8744_vm2, %v1776_v15, 0.0 }
 0xdcc   :  { %7099 = vmatpush3.bf16.msra.mxu1 %v7098_v10  ;;  %v1783_v1 = vsel %vm8744_vm2, %v1775_v12, 0.0 }
 0xdcd   :  { %1784 = vadd.xlane.f32.xlu0 %v1783_v1  ;;  %7100 = vmatprep.subr.bf16.mxu1 %v7445_v13 }
 0xdce   :  { %v7874_v17 = vpop.f32.mrb[22].mxu1 }
 0xdcf   :  { %v6558_v19 = vpop.f32.mrb[23].mxu1 }
 0xdd1   :  { %1787 = vadd.xlane.f32.xlu0 %v1786_v25 }
 0xdd2   :  { %v7877_v26 = vpop.f32.mrb[24].mxu1 }
 0xdd3   :  { %v6561_v27 = vpop.f32.mrb[25].mxu1 }
 0xdd6   :  { %v1769_v31 = vpop.f32.mrb[26].mxu1 }
 0xdd7   :  { %v7880_v35 = vadd.f32 %v7530_v4, %v1769_v31  ;;  %v6577_v36 = vpop.f32.mrb[27].mxu1 }
 0xdd9   :  { %1389 = vrot.lane.b32.xlu1 %v7789_v6, %s7461_s28  ;;  %v7886_v37 = vmul.f32 %v7880_v35, %v7880_v35 }
 0xddb   :  { %v1802_v38 = vsel %vm171_vm3, %v7886_v37, 0.0 }
 0xddc   :  { %1803 = vadd.xlane.f32.xlu0 %v1802_v38 }
 0xe55   :  { %v1782_v39 = vpop.xlane.xlu1 %1781 }
 0xe56   :  { %v1790_v40 = vmax.f32 %v1782_v39, 1e-16  ;;  %v1779_v41 = vpop.xlane.xlu0 %1778 }
 0xe57   :  { %v1789_v43 = vmax.f32 %v1779_v41, 1e-16 }
 0xe58   :  { %7301 = vrsqrt.f32 %v1790_v40 }
 0xe59   :  { %7303 = vrsqrt.f32 %v1789_v43  ;;  %v1390_v4 = vpop.permute.xlu1 %1389 }
 0xe5a   :  { %6541 = vmatpush3.msk.msra.mxu0 %vm8743_vm14, %v1390_v4  ;;  %v1785_v45 = vpop.xlane.xlu0 %1784 }
 0xe5b   :  { %v1791_v46 = vmax.f32 %v1785_v45, 1e-16  ;;  %6543 = vmatmul.mubr.msk.f32.vlgmr.msra.gmra.mrb[14].mxu0 %vm8742_vm13, %v7814_v32  ;;  %6562 = vmatprep.subr.mxu0 %v7442_v2 }
 0xe5c   :  { %6563 = vmatpush3.msk.msra.mxu0 %vm8743_vm14, %v7796_v11  ;;  %6545 = vmatprep.mubr.msk.f32.mxu0 %vm7443_vm1, %v7442_v2  ;;  %vm8754_vm14 = vcmask 91136  }
 0xe5d   :  { %7086 = vmatprep.subr.bf16.mxu0 %v7445_v13  ;;  %7305 = vrsqrt.f32 %v1791_v46 }
 0xe5e   :  { %v1788_v6 = vpop.xlane.xlu0 %1787 }
 0xe5f   :  { %v1792_v47 = vmax.f32 %v1788_v6, 1e-16  ;;  %6546 = vmatmul.mubr.msk.f32.gmra.mrb[16].mxu0 %vm8742_vm13, %v7820_v33 }
 0xe60   :  { %6548 = vmatprep.mubr.msk.f32.mxu0 %vm7443_vm1, %v7442_v2 }
 0xe61   :  { %7307 = vrsqrt.f32 %v1792_v47 }
 0xe62   :  { %v7302_v51 = vpop.eup %7301 }
 0xe63   :  { %v7304_v54 = vpop.eup %7303  ;;  %v1798_v55 = vmul.f32 %v7302_v51, %v7847_v48  ;;  %6549 = vmatmul.mubr.msk.f32.gmra.mrb[18].mxu0 %vm8742_vm13, %v7832_v34 }
 0xe64   :  { %v1797_v11 = vmul.f32 %v7304_v54, %v7849_v52  ;;  %6564 = vmatprep.mubr.msk.f32.mxu0 %vm7443_vm1, %v7442_v2 }
 0xe66   :  { %v7087_v56 = vpack.c.bf16 %v1798_v55, %v1797_v11 }
 0xe67   :  { %6565 = vmatmul.mubr.msk.f32.vlgmr.msra.gmra.mrb[20].mxu0 %vm8742_vm13, %v7442_v2  ;;  %v7306_v57 = vpop.eup %7305 }
 0xe68   :  { %7089 = vmatpush3.bf16.xpose.msk.msra.mxu0 %vm7539_vm4, %v7087_v56  ;;  %6567 = vmatprep.mubr.msk.f32.mxu0 %vm7443_vm1, %v7442_v2  ;;  %v1799_v5 = vmul.f32 %v7306_v57, %v7860_v7 }
 0xe69   :  { %v1804_v59 = vpop.xlane.xlu0 %1803  ;;  %7090 = vmatprep.subr.bf16.mxu0 %v7445_v13 }
 0xe6a   :  { %v1805_v60 = vmax.f32 %v1804_v59, 1e-16 }
 0xe6b   :  { %v7308_v3 = vpop.eup %7307  ;;  %6568 = vmatmul.mubr.msk.f32.gmra.mrb[22].mxu0 %vm8742_vm13, %v7442_v2 }
 0xe6c   :  { %v1800_v8 = vmul.f32 %v7308_v3, %v7857_v63  ;;  %7309 = vrsqrt.f32 %v1805_v60  ;;  %6570 = vmatprep.mubr.msk.f32.mxu0 %vm7443_vm1, %v7442_v2 }
 0xe6e   :  { %v7091_v10 = vpack.c.bf16 %v1800_v8, %v1799_v5 }
 0xe6f   :  { %6571 = vmatmul.mubr.msk.f32.gmra.mrb[24].mxu0 %vm8742_vm13, %v7442_v2  ;;  %vm8753_vm13 = vcmask 1040384  }
 0xe70   :  { %7093 = vmatpush3.bf16.xpose.msk.msra.mxu0 %vm7539_vm4, %v7091_v10  ;;  %6586 = vmatprep.mubr.msk.f32.mxu0 %vm7443_vm1, %v7442_v2 }
 0xe71   :  { %7104 = vmatprep.subr.bf16.mxu0 %v7445_v13 }
 0xe76   :  { %v7310_v12 = vpop.eup %7309 }
 0xe77   :  { %v1807_v14 = vmul.f32 %v7310_v12, %v7880_v35 }
 0xe79   :  { %6587 = vmatmul.mubr.msk.f32.vlgmr.msra.gmra.mrb[26].mxu0 %vm8744_vm2, %v1807_v14 }
 0xe7a   :  { %6615 = vmatprep.mubr.msk.f32.mxu0 %vm7443_vm1, %v7442_v2 }
 0xf2e   :  { %v1468_v1 = vpop.f32.mrb[14].mxu0 }
 0xf2f   :  { %v1566_v15 = vsub.f32 1.0, %v1468_v1  ;;  %v6544_v19 = vpop.f32.mrb[15].mxu0 }
 0xf31   :  { %v1569_v25 = vmul.f32 1e-06, %v1566_v15 }
 0xf32   :  { %v1473_v27 = vpop.f32.mrb[16].mxu0 }
 0xf33   :  { %v7934_v31 = vadd.f32 %v1569_v25, %v7864_v9  ;;  %v1567_v36 = vsub.f32 1.0, %v1473_v27  ;;  %v6547_v38 = vpop.f32.mrb[17].mxu0 }
 0xf35   :  { %v1570_v39 = vmul.f32 1e-06, %v1567_v36  ;;  %v1988_v8 = vmul.f32 %v7934_v31, %v7934_v31 }
 0xf36   :  { %v1478_v40 = vpop.f32.mrb[18].mxu0 }
 0xf37   :  { %v7937_v41 = vadd.f32 %v1570_v39, %v7874_v17  ;;  %v1568_v43 = vsub.f32 1.0, %v1478_v40  ;;  %v6550_v4 = vpop.f32.mrb[19].mxu0  ;;  %v1991_v10 = vsel %vm8744_vm2, %v1988_v8, 0.0 }
 0xf39   :  { %v1571_v45 = vmul.f32 1e-06, %v1568_v43  ;;  %v7941_v46 = vpack.c.bf16 %v7937_v41, %v7934_v31  ;;  %v1989_v38 = vmul.f32 %v7937_v41, %v7937_v41 }
 0xf3a   :  { %v7943_v6 = vpop.f32.mrb[20].mxu0 }
 0xf3b   :  { %v7946_v47 = vadd.f32 %v1571_v45, %v7877_v26  ;;  %7106 = vmatpush3.bf16.msra.mxu0 %v7941_v46  ;;  %v6566_v9 = vpop.f32.mrb[21].mxu0  ;;  %v1994_v43 = vsel %vm8744_vm2, %v1989_v38, 0.0 }
 0xf3c   :  { %6613 = vmatprep.subr.mxu0 %v7442_v2 }
 0xf3d   :  { %v1990_v12 = vmul.f32 %v7946_v47, %v7946_v47 }
 0xf3e   :  { %v7950_v51 = vpop.f32.mrb[22].mxu0 }
 0xf3f   :  { %v7108_v17 = vpack.c.bf16 %v7950_v51, %v7943_v6  ;;  %6614 = vmatpush3.msra.mxu0 %v7946_v47  ;;  %v6569_v54 = vpop.f32.mrb[23].mxu0 }
 0xf40   :  { %7107 = vmatprep.subr.bf16.mxu0 %v7445_v13 }
 0xf42   :  { %v7956_v55 = vpop.f32.mrb[24].mxu0 }
 0xf43   :  { %v6572_v11 = vpop.f32.mrb[25].mxu0 }
 0xf4c   :  { %v1889_v26 = vpop.f32.mrb[26].mxu0 }
 0xf4d   :  { %1894 = vrot.lane.b32.xlu0 %v1889_v26, %s7444_s30  ;;  %v6588_v56 = vpop.f32.mrb[27].mxu0 }
 0xf51   :  { %2010 = vrot.lane.b32.xlu0 %v7886_v37, %s7444_s30  ;;  %v1997_v37 = vsel %vm8744_vm2, %v1990_v12, 0.0 }
 0xfbf   :  { %v1895_v57 = vpop.permute.xlu0 %1894 }
 0xfc0   :  { %v1897_v59 = vsel %vm8753_vm13, %v1889_v26, %v1895_v57 }
 0xfc1   :  { %v1898_v60 = vsel %vm171_vm3, %v1897_v59, -inf }
 0xfc2   :  { %1899 = vmax.xlane.f32.xlu1 %v1898_v60 }
 0xfc3   :  { %v2011_v3 = vpop.permute.xlu0 %2010 }
 0xfc4   :  { %v2013_v5 = vsel %vm171_vm3, %v2011_v3, 0.0 }
 0xfc6   :  { %2014 = vadd.xlane.f32.xlu1 %v2013_v5 }
 0xfca   :  { %1992 = vadd.xlane.f32.xlu1 %v1991_v10 }
 0xfce   :  { %1998 = vadd.xlane.f32.xlu1 %v1997_v37 }
0x104f   :  { %v1900_v14 = vpop.xlane.xlu1 %1899 }
0x1050   :  { %v1901_v1 = vsub.f32 %v1897_v59, %v1900_v14 }
0x1052   :  { %v1902_v15 = vmul.f32 1.442695, %v1901_v1 }
0x1053   :  { %v2015_v19 = vpop.xlane.xlu1 %2014 }
0x1054   :  { %7311 = vpow2.f32 %v1902_v15  ;;  %v2016_v25 = vmax.f32 %v2015_v19, 1e-16 }
0x1056   :  { %7313 = vrsqrt.f32 %v2016_v25 }
0x1057   :  { %v1993_v11 = vpop.xlane.xlu1 %1992 }
0x1058   :  { %v2000_v56 = vmax.f32 %v1993_v11, 1e-16 }
0x105b   :  { %v1999_v57 = vpop.xlane.xlu1 %1998 }
0x105c   :  { %v2002_v59 = vmax.f32 %v1999_v57, 1e-16 }
0x105e   :  { %v7312_v27 = vpop.eup %7311 }
0x105f   :  { %v1904_v36 = vsel %vm171_vm3, %v7312_v27, 0.0 }
0x1060   :  { %v7314_v39 = vpop.eup %7313  ;;  %1905 = vadd.xlane.f32.xlu0 %v1904_v36 }
0x1061   :  { %v2018_v40 = vmul.f32 %v7314_v39, %v7880_v35 }
0x1063   :  { %2020 = vrot.lane.b32.xlu1 %v2018_v40, %s7444_s30 }
0x1064   :  { %1995 = vadd.xlane.f32.xlu0 %v1994_v43 }
0x10d5   :  { %v2021_v15 = vpop.permute.xlu1 %2020 }
0x10ed   :  { %v1906_v4 = vpop.xlane.xlu0 %1905 }
0x10ee   :  { %7315 = vrcp.f32 %v1906_v4 }
0x10f1   :  { %v1996_v54 = vpop.xlane.xlu0 %1995 }
0x10f2   :  { %v2001_v26 = vmax.f32 %v1996_v54, 1e-16 }
0x10f4   :  { %7317 = vrsqrt.f32 %v2001_v26 }
0x10f5   :  { %7319 = vrsqrt.f32 %v2000_v56 }
0x10f6   :  { %7321 = vrsqrt.f32 %v2002_v59 }
0x10f8   :  { %v7316_v45 = vpop.eup %7315 }
0x10f9   :  { %v1908_v9 = vmul.f32 %v7316_v45, %v7312_v27 }
0x10fb   :  { %1910 = vrot.lane.b32.xlu0 %v1908_v9, %s7449_s10 }
0x10fe   :  { %v7318_v35 = vpop.eup %7317 }
0x10ff   :  { %v7320_v60 = vpop.eup %7319  ;;  %v2007_v3 = vmul.f32 %v7318_v35, %v7937_v41 }
0x1100   :  { %v2006_v8 = vmul.f32 %v7320_v60, %v7934_v31  ;;  %v7322_v14 = vpop.eup %7321 }
0x1101   :  { %v2008_v1 = vmul.f32 %v7322_v14, %v7946_v47 }
0x1102   :  { %v7101_v37 = vpack.c.bf16 %v2007_v3, %v2006_v8 }
0x116d   :  { %v1911_v5 = vpop.permute.xlu0 %1910 }
0x116e   :  { %v1913_v10 = vsel %vm8744_vm2, %v1908_v9, %v1911_v5 }
0x116f   :  { %v1914_v12 = vmul.f32 %v1913_v10, %v7636_v28 }
0x1171   :  { %6598 = vmatmul.mubr.msk.f32.vlgmr.msra.gmra.mrb[28].mxu1 %vm277_vm5, %v1914_v12 }
0x1172   :  { %7103 = vmatpush3.bf16.xpose.msk.msra.mxu1 %vm7539_vm4, %v7101_v37  ;;  %6606 = vmatprep.mubr.msk.f32.mxu1 %vm7443_vm1, %v7442_v2 }
0x1173   :  { %6604 = vmatprep.subr.mxu1 %v7442_v2 }
0x117a   :  { %6605 = vmatpush3.xpose.msk.msra.mxu1 %vm8744_vm2, %v2008_v1 }
0x117b   :  { %7110 = vmatprep.subr.bf16.mxu1 %v7445_v13 }
0x117d   :  { %6607 = vmatmul.mubr.msk.f32.vlgmr.msra.gmra.mrb[30].mxu1 %vm8744_vm2, %v2021_v15  ;;  %vm8755_vm2 = vmmov %vm8754_vm14 }
0x117e   :  { %7112 = vmatpush3.bf16.msra.mxu1 %v7941_v46  ;;  %6633 = vmatprep.mubr.msk.f32.mxu1 %vm7443_vm1, %v7442_v2 }
0x117f   :  { %6631 = vmatprep.subr.mxu1 %v7442_v2 }
0x1182   :  { %6632 = vmatpush3.msra.mxu1 %v7946_v47 }
0x1183   :  { %7113 = vmatprep.subr.bf16.mxu1 %v7445_v13 }
0x1244   :  { %v1984_v19 = vpop.f32.mrb[28].mxu1 }
0x1245   :  { %v6599_v25 = vpop.f32.mrb[29].mxu1 }
0x1250   :  { %v2099_v27 = vpop.f32.mrb[30].mxu1 }
0x1251   :  { %2104 = vrot.lane.b32.xlu1 %v2099_v27, %s7446_s8  ;;  %v6608_v36 = vpop.f32.mrb[31].mxu1 }
0x12c3   :  { %v2105_v38 = vpop.permute.xlu1 %2104 }
0x12c4   :  { %v2107_v39 = vsel %vm8753_vm13, %v2099_v27, %v2105_v38  ;;  %vm8757_vm13 = vcmask 130048  }
0x12c5   :  { %v2108_v40 = vsel %vm8754_vm14, %v2107_v39, -inf }
0x12c6   :  { %2109 = vmax.xlane.f32.xlu0 %v2108_v40 }
0x1353   :  { %v2110_v43 = vpop.xlane.xlu0 %2109 }
0x1354   :  { %v2111_v4 = vsub.f32 %v2107_v39, %v2110_v43 }
0x1356   :  { %v2112_v45 = vmul.f32 1.442695, %v2111_v4 }
0x1358   :  { %7323 = vpow2.f32 %v2112_v45 }
0x1362   :  { %v7324_v9 = vpop.eup %7323 }
0x1363   :  { %v2114_v54 = vsel %vm8755_vm2, %v7324_v9, 0.0  ;;  %vm8756_vm2 = vcmask 58368  }
0x1364   :  { %2115 = vadd.xlane.f32.xlu1 %v2114_v54 }
0x13f1   :  { %v2116_v11 = vpop.xlane.xlu1 %2115 }
0x13f2   :  { %7325 = vrcp.f32 %v2116_v11 }
0x13fc   :  { %v7326_v26 = vpop.eup %7325 }
0x13fd   :  { %v2118_v56 = vmul.f32 %v7326_v26, %v7324_v9 }
0x13ff   :  { %2120 = vrot.lane.b32.xlu0 %v2118_v56, %s7447_s9 }
0x1471   :  { %v2121_v57 = vpop.permute.xlu0 %2120 }
0x1472   :  { %v2123_v59 = vsel %vm457_vm10, %v2118_v56, %v2121_v57 }
0x1473   :  { %v2124_v35 = vmul.f32 %v2123_v59, %v7582_v49 }
0x1475   :  { %6616 = vmatmul.mubr.msk.f32.vlgmr.msra.gmra.mrb[28].mxu0 %vm460_vm11, %v2124_v35 }
0x1476   :  { %7109 = vmatpush3.bf16.msra.mxu0 %v7108_v17  ;;  %6624 = vmatprep.mubr.msk.f32.mxu0 %vm7443_vm1, %v7442_v2 }
0x1477   :  { %6622 = vmatprep.subr.mxu0 %v7442_v2 }
0x147a   :  { %6623 = vmatpush3.msra.mxu0 %v7956_v55 }
0x147b   :  { %6625 = vmatmul.mubr.msk.f32.vlgmr.msra.gmra.mrb[30].mxu0 %vm460_vm11, %v2124_v35  ;;  %6636 = vmatprep.subr.mxu0 %v7442_v2 }
0x147c   :  { %6638 = vmatprep.mubr.msk.f32.mxu0 %vm7443_vm1, %v7442_v2 }
0x1481   :  { %6637 = vmatpush3.xpose.msk.msra.mxu0 %vm457_vm10, %v2118_v56 }
0x1482   :  { %7116 = vmatprep.subr.bf16.mxu0 %v7445_v13 }
0x1484   :  { %6639 = vmatmul.mubr.msk.f32.vlgmr.msra.gmra.mrb[32].mxu0 %vm457_vm10, %v7943_v6 }
0x1485   :  { %6641 = vmatprep.mubr.msk.f32.mxu0 %vm7443_vm1, %v7442_v2  ;;  %7118 = vmatpush3.bf16.msra.mxu0 %v7672_v42 }
0x1486   :  { %7119 = vmatprep.subr.bf16.mxu0 %v7445_v13 }
0x1488   :  { %6642 = vmatmul.mubr.msk.f32.gmra.mrb[34].mxu0 %vm457_vm10, %v7950_v51 }
0x1489   :  { %6644 = vmatprep.mubr.msk.f32.mxu0 %vm7443_vm1, %v7442_v2  ;;  %7121 = vmatpush3.bf16.msra.mxu0 %v7678_v44 }
0x148a   :  { %7122 = vmatprep.subr.bf16.mxu0 %v7445_v13 }
0x148c   :  { %6645 = vmatmul.mubr.msk.f32.gmra.mrb[36].mxu0 %vm457_vm10, %v7956_v55 }
0x148d   :  { %7124 = vmatpush3.bf16.msra.mxu0 %v7689_v50  ;;  %6682 = vmatprep.mubr.msk.f32.mxu0 %vm7443_vm1, %v7442_v2 }
0x148e   :  { %7125 = vmatprep.subr.bf16.mxu0 %v7445_v13 }
0x1491   :  { %7127 = vmatpush3.bf16.msra.mxu0 %v7699_v53 }
0x1492   :  { %7128 = vmatprep.subr.bf16.mxu0 %v7445_v13 }
0x1495   :  { %7130 = vmatpush3.bf16.msra.mxu0 %v7710_v58 }
0x1496   :  { %7131 = vmatprep.subr.bf16.mxu0 %v7445_v13 }
0x1499   :  { %7133 = vmatpush3.bf16.msra.mxu0 %v7720_v61 }
0x149a   :  { %6680 = vmatprep.subr.mxu0 %v7442_v2 }
0x149d   :  { %6681 = vmatpush3.msra.mxu0 %v7728_v62 }
0x149e   :  { %6712 = vmatprep.subr.mxu0 %v7442_v2 }
0x1548   :  { %v2194_v17 = vpop.f32.mrb[28].mxu0 }
0x1549   :  { %v6617_v60 = vpop.f32.mrb[29].mxu0 }
0x154e   :  { %v2264_v3 = vpop.f32.mrb[30].mxu0 }
0x154f   :  { %2269 = vrot.lane.b32.xlu1 %v2264_v3, %s7447_s9  ;;  %v6626_v5 = vpop.f32.mrb[31].mxu0 }
0x1553   :  { %2547 = vrot.lane.b32.xlu1 %v1984_v19, %s7451_s17 }
0x1557   :  { %2551 = vrot.lane.b32.xlu1 %v2194_v17, %s7452_s24  ;;  %v2424_v8 = vpop.f32.mrb[32].mxu0 }
0x1558   :  { %v2438_v10 = vmul.f32 %v2424_v8, %v7620_v20  ;;  %v6640_v12 = vpop.f32.mrb[33].mxu0 }
0x155a   :  { %2441 = vxpose.xlu0.b32.start [1/3] (short) (narrow) %v2438_v10, 8 }
0x155b   :  { %v2429_v37 = vpop.f32.mrb[34].mxu0 }
0x155c   :  { %v2439_v62 = vmul.f32 %v2429_v37, %v7624_v22  ;;  %v6643_v14 = vpop.f32.mrb[35].mxu0 }
0x155e   :  { %2442 = vxpose.xlu0.b32.cont [2/3] (short) (narrow) %v2439_v62, 8 }
0x155f   :  { %v2434_v1 = vpop.f32.mrb[36].mxu0 }
0x1560   :  { %v2440_v15 = vmul.f32 %v2434_v1, %v7628_v24  ;;  %v6646_v25 = vpop.f32.mrb[37].mxu0 }
0x1562   :  { %2443 = vxpose.xlu0.b32.end [3/3] (short) (narrow) %v2440_v15, 8 }
0x15c1   :  { %v2270_v27 = vpop.permute.xlu1 %2269 }
0x15c2   :  { %v2272_v19 = vsel %vm457_vm10, %v2264_v3, %v2270_v27 }
0x15c3   :  { %v2273_v36 = vmul.f32 %v2272_v19, %v7582_v49 }
0x15c5   :  { %6634 = vmatmul.mubr.msk.f32.vlgmr.msra.gmra.mrb[32].mxu1 %vm460_vm11, %v2273_v36  ;;  %v2548_v4 = vpop.permute.xlu1 %2547 }
0x15c6   :  { %7115 = vmatpush3.bf16.msra.mxu1 %v7941_v46  ;;  %6653 = vmatprep.mubr.msk.f32.mxu1 %vm7443_vm1, %v7442_v2  ;;  %v2565_v11 = vsel %vm89_vm0, %v7841_v0, %v2548_v4 }
0x15c7   :  { %6651 = vmatprep.subr.mxu1 %v7442_v2 }
0x15c9   :  { %v2552_v45 = vpop.permute.xlu1 %2551 }
0x15ca   :  { %6652 = vmatpush3.msra.mxu1 %v7946_v47  ;;  %v2566_v26 = vsel %vm460_vm11, %v2565_v11, %v2552_v45 }
0x15cb   :  { %7134 = vmatprep.subr.bf16.mxu1 %v7445_v13 }
0x15da   :  { %v2457_v38 = vpop.trf.xlu0 }
0x15db   :  { %6654 = vmatmul.mubr.msk.f32.vlgmr.msra.gmra.mrb[34].mxu1 %vm460_vm11, %v2457_v38 }
0x15dc   :  { %7136 = vmatpush3.bf16.msra.mxu1 %v7751_v18  ;;  %6693 = vmatprep.mubr.msk.f32.mxu1 %vm7443_vm1, %v7442_v2 }
0x15dd   :  { %7137 = vmatprep.subr.bf16.mxu1 %v7445_v13 }
0x15e0   :  { %7139 = vmatpush3.bf16.msra.mxu1 %v7757_v21 }
0x1698   :  { %v2343_v46 = vpop.f32.mrb[32].mxu1 }
0x1699   :  { %2555 = vrot.lane.b32.xlu1 %v2343_v46, %s7453_s14  ;;  %v6635_v39 = vpop.f32.mrb[33].mxu1 }
0x16ae   :  { %v2542_v40 = vpop.f32.mrb[34].mxu1 }
0x16af   :  { %2559 = vrot.lane.b32.xlu1 %v2542_v40, %s7454_s22  ;;  %v6655_v43 = vpop.f32.mrb[35].mxu1 }
0x16b3   :  { %2562 = vrot.lane.b32.xlu1 %v7767_v29, %s7456_s19 }
0x170b   :  { %v2556_v9 = vpop.permute.xlu1 %2555 }
0x170c   :  { %v2567_v56 = vsel %vm894_vm6, %v2566_v26, %v2556_v9 }
0x1721   :  { %v2560_v54 = vpop.permute.xlu1 %2559 }
0x1722   :  { %v2568_v57 = vsel %vm8749_vm15, %v2567_v56, %v2560_v54 }
0x1725   :  { %v2563_v59 = vpop.permute.xlu1 %2562 }
0x1726   :  { %v2569_v35 = vsel %vm8748_vm7, %v2568_v57, %v2563_v59 }
0x1727   :  { %6683 = vmatmul.mubr.msk.f32.vlgmr.msra.gmra.mrb[38].mxu0 %vm8747_vm8, %v2569_v35 }
0x1728   :  { %6714 = vmatprep.mubr.msk.f32.mxu0 %vm7443_vm1, %v7442_v2 }
0x17fa   :  { %v2639_v29 = vpop.f32.mrb[38].mxu0 }
0x17fb   :  { %v2640_v17 = vadd.f32 %v7764_v23, %v2639_v29  ;;  %v6684_v60 = vpop.f32.mrb[39].mxu0 }
0x17fd   :  { %7327 = vtanh.f32 %v2640_v17 }
0x1807   :  { %v8079_v0 = vpop.eup %7327 }
0x1808   :  { %6694 = vmatmul.mubr.msk.f32.vlgmr.msra.gmra.mrb[36].mxu1 %vm277_vm5, %v8079_v0 }
0x18db   :  { %v2713_v3 = vpop.f32.mrb[36].mxu1 }
0x18dc   :  { %v2714_v5 = vadd.f32 %v7774_v30, %v2713_v3  ;;  %v6695_v8 = vpop.f32.mrb[37].mxu1 }
0x18de   :  { %v2741_v10 = vsel %vm8746_vm9, %v2714_v5, -inf  ;;  %v2719_v12 = vsel %vm8745_vm12, %v2714_v5, -inf  ;;  %2718 = vst.msk [vmem:[#allocation2 + $0x2] sm:$0x3] %vm8756_vm2, %v2714_v5  ;;  %v6031_v46 = vmul.f32 -1.442695, %v2714_v5 }
0x18df   :  { %2742 = vmax.xlane.f32.xlu0 %v2741_v10  ;;  %2720 = vmax.xlane.f32.xlu1 %v2719_v12  ;;  %vm8758_vm2 = vcmask 1041408  }
0x18e0   :  { %vm8760_vm12 = vmmov %vm8758_vm2 }
0x18e1   :  { %vm8763_vm8 = vmmov %vm8758_vm2 }
0x18e2   :  { %vm8768_vm15 = vmmov %vm8763_vm8 }
0x196c   :  { %v2743_v23 = vpop.xlane.xlu0 %2742  ;;  %v2721_v37 = vpop.xlane.xlu1 %2720 }
0x196d   :  { %v2722_v62 = vsub.f32 %v2714_v5, %v2721_v37  ;;  %v2744_v14 = vsub.f32 %v2714_v5, %v2743_v23 }
0x196f   :  { %v2723_v1 = vmul.f32 1.442695, %v2722_v62  ;;  %v2745_v15 = vmul.f32 1.442695, %v2744_v14 }
0x1971   :  { %7329 = vpow2.f32 %v2723_v1 }
0x1972   :  { %7331 = vpow2.f32 %v2745_v15 }
0x1973   :  { %7333 = vpow2.f32 %v6031_v46 }
0x197b   :  { %v7330_v25 = vpop.eup %7329 }
0x197c   :  { %2726 = vrot.lane.b32.xlu1 %v7330_v25, %s7455_s18  ;;  %v7332_v30 = vpop.eup %7331 }
0x197d   :  { %v7334_v43 = vpop.eup %7333 }
0x197e   :  { %v2737_v45 = vadd.f32 1.0, %v7334_v43 }
0x1980   :  { %2748 = vrot.lane.b32.xlu1 %v7332_v30, %s7456_s19 }
0x19ee   :  { %v2727_v27 = vpop.permute.xlu1 %2726 }
0x19ef   :  { %v2729_v19 = vsel %vm171_vm3, %v2727_v27, 0.0  ;;  %v8153_v27 = vld [vmem:[%s8731_s0 + $0x4] sm:$0x3] }
0x19f0   :  { %2730 = vadd.xlane.f32.xlu1 %v2729_v19 }
0x19f2   :  { %v2749_v36 = vpop.permute.xlu1 %2748 }
0x19f3   :  { %v2751_v38 = vsel %vm8754_vm14, %v2749_v36, 0.0  ;;  %vm8759_vm14 = vmmov %vm8758_vm2 }
0x19f4   :  { %2752 = vadd.xlane.f32.xlu0 %v2751_v38 }
0x1a7d   :  { %v2731_v39 = vpop.xlane.xlu1 %2730 }
0x1a7e   :  { %7335 = vrcp.f32 %v2731_v39 }
0x1a81   :  { %v2753_v40 = vpop.xlane.xlu0 %2752 }
0x1a82   :  { %7337 = vrcp.f32 %v2753_v40 }
0x1a83   :  { %7339 = vrcp.f32 %v2737_v45 }
0x1a84   :  { %7341 = vtanh.f32 %v2714_v5 }
0x1a88   :  { %v7336_v4 = vpop.eup %7335 }
0x1a89   :  { %v2733_v9 = vmul.f32 %v7336_v4, %v7330_v25  ;;  %v8136_v25 = vld [vmem:[%s8732_s1] sm:$0xff] }
0x1a8b   :  { %2757 = vrot.lane.b32.xlu0 %v2733_v9, %s7455_s18 }
0x1a8c   :  { %v7338_v54 = vpop.eup %7337 }
0x1a8d   :  { %v2755_v11 = vmul.f32 %v7338_v54, %v7332_v30  ;;  %v8095_v26 = vpop.eup %7339 }
0x1a8e   :  { %v7342_v56 = vpop.eup %7341 }
0x1a8f   :  { %3005 = vrot.lane.b32.xlu1 %v2755_v11, %s7458_s21  ;;  %2760 = vrot.lane.b32.xlu0 %v2733_v9, %s7451_s17 }
0x1a93   :  { %3002 = vrot.lane.b32.xlu0 %v2755_v11, %s7456_s19 }
0x1a97   :  { %2798 = vrot.lane.b32.xlu0 %v8095_v26, %s7459_s23 }
0x1a9b   :  { %2900 = vrot.lane.b32.xlu0 %v7342_v56, %s7457_s20 }
0x1a9f   :  { %3135 = vrot.lane.b32.xlu0 %v7342_v56, %s7460_s25 }
0x1afd   :  { %v2758_v57 = vpop.permute.xlu0 %2757 }
0x1b01   :  { %v2761_v59 = vpop.permute.xlu0 %2760  ;;  %v3006_v17 = vpop.permute.xlu1 %3005 }
0x1b02   :  { %v2763_v35 = vsel %vm8757_vm13, %v2758_v57, %v2761_v59  ;;  %vm8761_vm13 = vcmask 15360  }
0x1b03   :  { %v2764_v29 = vmul.f32 %v2763_v35, %v7636_v28  ;;  %vm8762_vm9 = vmmov %vm8761_vm13 }
0x1b04   :  { %vm8764_vm7 = vmmov %vm8762_vm9 }
0x1b05   :  { %2765 = vxpose.xlu0.b32.start.end [1/1] (short) (narrow) %v2764_v29, 32  ;;  %v8103_v60 = vpop.permute.xlu0 %3002 }
0x1b06   :  { %v3008_v3 = vsel %vm457_vm10, %v8103_v60, %v3006_v17 }
0x1b07   :  { %v3009_v5 = vmul.f32 %v3008_v3, %v7582_v49 }
0x1b09   :  { %v2799_v8 = vpop.permute.xlu0 %2798  ;;  %3010 = vxpose.xlu1.b32.start.end [1/1] (short) (narrow) %v3009_v5, 24 }
0x1b0a   :  { %6696 = vmatprep.subr.msk.mxu1 %vm8758_vm2, %v2799_v8  ;;  %vm8765_vm2 = vmmov %vm8764_vm7 }
0x1b0b   :  { %6697 = vmatpush3.msk.msra.mxu1 %vm8759_vm14, %v2799_v8  ;;  %vm8766_vm14 = vmmov %vm8765_vm2 }
0x1b0d   :  { %v2901_v10 = vpop.permute.xlu0 %2900 }
0x1b0e   :  { %6704 = vmatprep.subr.msk.mxu1 %vm8760_vm12, %v2901_v10  ;;  %vm8767_vm12 = vmmov %vm8765_vm2 }
0x1b11   :  { %v3136_v12 = vpop.permute.xlu0 %3135 }
0x1b85   :  { %v2781_v23 = vpop.trf.xlu0 }
0x1b86   :  { %6698 = vmatprep.mubr.msk.f32.mxu1 %vm8761_vm13, %v2781_v23  ;;  %vm8769_vm13 = vmmov %vm8765_vm2 }
0x1b89   :  { %v2782_v37 = vpop.trf.xlu0  ;;  %v8121_v1 = vpop.trf.xlu1 }
0x1b8a   :  { %6699 = vmatmul.mubr.msk.f32.vlgmr.msra.gmra.mrb[38].mxu1 %vm8762_vm9, %v2782_v37  ;;  %vm8773_vm9 = vmmov %vm8765_vm2 }
0x1b8b   :  { %6705 = vmatpush3.msk.msra.mxu1 %vm8763_vm8, %v2901_v10  ;;  %vm8770_vm8 = vmmov %vm8765_vm2 }
0x1b8c   :  { %6723 = vmatprep.subr.mxu1 %v7442_v2 }
0x1b8d   :  { %v2783_v62 = vpop.trf.xlu0  ;;  %v8127_v15 = vpop.trf.xlu1 }
0x1b8e   :  { %6701 = vmatprep.mubr.msk.f32.mxu1 %vm8764_vm7, %v2783_v62  ;;  %vm8771_vm7 = vmmov %vm8765_vm2 }
0x1b91   :  { %v2784_v14 = vpop.trf.xlu0  ;;  %v8144_v30 = vpop.trf.xlu1 }
0x1b92   :  { %6702 = vmatmul.mubr.msk.f32.gmra.mrb[40].mxu1 %vm8765_vm2, %v2784_v14 }
0x1b93   :  { %6706 = vmatprep.mubr.msk.f32.mxu1 %vm8766_vm14, %v2781_v23 }
0x1b96   :  { %6707 = vmatmul.mubr.msk.f32.vlgmr.msra.gmra.mrb[42].mxu1 %vm8767_vm12, %v2782_v37 }
0x1b97   :  { %6724 = vmatpush3.msk.msra.mxu1 %vm8768_vm15, %v3136_v12  ;;  %6709 = vmatprep.mubr.msk.f32.mxu1 %vm8769_vm13, %v2783_v62  ;;  %vm8772_vm15 = vmmov %vm8765_vm2  ;;  %vm8774_vm2 = vcmask 130048  }
0x1b98   :  { %6745 = vmatprep.subr.mxu1 %v7442_v2  ;;  %vm8775_vm14 = vmmov %vm8774_vm2 }
0x1b99   :  { %vm8776_vm12 = vmmov %vm8774_vm2 }
0x1b9a   :  { %6710 = vmatmul.mubr.msk.f32.gmra.mrb[44].mxu1 %vm8770_vm8, %v2784_v14  ;;  %vm8777_vm13 = vmmov %vm8774_vm2  ;;  %vm8778_vm8 = vcmask 1041408  }
0x1b9b   :  { %6725 = vmatprep.mubr.msk.f32.mxu1 %vm7443_vm1, %v7442_v2 }
0x1b9e   :  { %6726 = vmatmul.mubr.msk.f32.vlgmr.msra.gmra.mrb[46].mxu1 %vm8771_vm7, %v8121_v1 }
0x1b9f   :  { %6728 = vmatprep.mubr.msk.f32.mxu1 %vm7443_vm1, %v7442_v2  ;;  %6746 = vmatpush3.msra.mxu1 %v8136_v25 }
0x1ba0   :  { %7148 = vmatprep.subr.bf16.mxu1 %v7445_v13 }
0x1ba2   :  { %6729 = vmatmul.mubr.msk.f32.gmra.mrb[48].mxu1 %vm8772_vm15, %v8127_v15  ;;  %vm8779_vm15 = vmmov %vm8778_vm8 }
0x1ba3   :  { %6731 = vmatprep.mubr.msk.f32.mxu1 %vm7443_vm1, %v7442_v2 }
0x1ba6   :  { %6732 = vmatmul.mubr.msk.f32.gmra.mrb[50].mxu1 %vm8773_vm9, %v8144_v30  ;;  %vm8780_vm9 = vmmov %vm8771_vm7 }
0x1ba7   :  { %6747 = vmatprep.mubr.msk.f32.mxu1 %vm7443_vm1, %v7442_v2 }
0x1baa   :  { %6748 = vmatmul.mubr.msk.f32.vlgmr.msra.gmra.mrb[52].mxu1 %vm89_vm0, %v8153_v27 }
0x1bab   :  { %6769 = vmatprep.mubr.msk.f32.mxu1 %vm7443_vm1, %v7442_v2 }
0x1c5d   :  { %v6700_v19 = vpop.f32.mrb[38].mxu1 }
0x1c5e   :  { %v2880_v36 = vpop.f32.mrb[39].mxu1  ;;  %v2990_v38 = vsub.f32 1.0, %v6700_v19 }
0x1c5f   :  { %v2989_v46 = vsub.f32 1.0, %v2880_v36 }
0x1c60   :  { %v2994_v4 = vmul.f32 %v2990_v38, %v7847_v48 }
0x1c61   :  { %v2993_v54 = vmul.f32 %v2989_v46, %v7849_v52 }
0x1c65   :  { %v6703_v39 = vpop.f32.mrb[40].mxu1 }
0x1c66   :  { %v2890_v40 = vpop.f32.mrb[41].mxu1  ;;  %v2992_v43 = vsub.f32 1.0, %v6703_v39 }
0x1c67   :  { %v2991_v45 = vsub.f32 1.0, %v2890_v40 }
0x1c68   :  { %v2996_v59 = vmul.f32 %v2992_v43, %v7857_v63  ;;  %v8198_v43 = vld [vmem:[%s8733_s2] ss:$0 sm:$0xff] }
0x1c69   :  { %v6708_v9 = vpop.f32.mrb[42].mxu1  ;;  %v2995_v17 = vmul.f32 %v2991_v45, %v7860_v7 }
0x1c6a   :  { %v8161_v11 = vadd.f32 %v6708_v9, %v2994_v4  ;;  %v2970_v56 = vpop.f32.mrb[43].mxu1 }
0x1c6b   :  { %v8163_v57 = vadd.f32 %v2993_v54, %v2970_v56 }
0x1c6c   :  { %v3389_v35 = vmul.f32 %v8161_v11, %v8161_v11 }
0x1c6d   :  { %v6711_v29 = vpop.f32.mrb[44].mxu1  ;;  %v7149_v48 = vpack.c.bf16 %v8161_v11, %v8163_v57  ;;  %v3388_v3 = vmul.f32 %v8163_v57, %v8163_v57 }
0x1c6e   :  { %v8173_v52 = vadd.f32 %v6711_v29, %v2996_v59  ;;  %v2980_v5 = vpop.f32.mrb[45].mxu1  ;;  %v3395_v8 = vsel %vm8774_vm2, %v3389_v35, 0.0  ;;  %vm8781_vm2 = vmmov %vm8771_vm7 }
0x1c6f   :  { %v8176_v10 = vadd.f32 %v2995_v17, %v2980_v5  ;;  %3396 = vadd.xlane.f32.xlu1 %v3395_v8  ;;  %7150 = vmatpush3.bf16.msra.mxu1 %v7149_v48  ;;  %v3392_v63 = vsel %vm8775_vm14, %v3388_v3, 0.0  ;;  %vm8782_vm14 = vmmov %vm8781_vm2 }
0x1c70   :  { %3393 = vadd.xlane.f32.xlu0 %v3392_v63  ;;  %7151 = vmatprep.subr.bf16.mxu1 %v7445_v13  ;;  %v3391_v7 = vmul.f32 %v8173_v52, %v8173_v52 }
0x1c71   :  { %v7152_v12 = vpack.c.bf16 %v8173_v52, %v8176_v10  ;;  %v8184_v23 = vpop.f32.mrb[46].mxu1  ;;  %v3390_v14 = vmul.f32 %v8176_v10, %v8176_v10 }
0x1c72   :  { %v3401_v37 = vsel %vm8776_vm12, %v3391_v7, 0.0  ;;  %v6727_v62 = vpop.f32.mrb[47].mxu1  ;;  %vm8783_vm12 = vmmov %vm8781_vm2 }
0x1c73   :  { %7153 = vmatpush3.bf16.msra.mxu1 %v7152_v12  ;;  %v3398_v38 = vsel %vm8777_vm13, %v3390_v14, 0.0  ;;  %vm8784_vm13 = vmmov %vm8781_vm2 }
0x1c74   :  { %3402 = vadd.xlane.f32.xlu0 %v3401_v37  ;;  %7154 = vmatprep.subr.bf16.mxu1 %v7445_v13 }
0x1c75   :  { %v8190_v19 = vpop.f32.mrb[48].mxu1 }
0x1c76   :  { %v6730_v36 = vpop.f32.mrb[49].mxu1 }
0x1c78   :  { %3399 = vadd.xlane.f32.xlu0 %v3398_v38 }
0x1c79   :  { %v8193_v46 = vpop.f32.mrb[50].mxu1 }
0x1c7a   :  { %v6733_v39 = vpop.f32.mrb[51].mxu1 }
0x1c7d   :  { %v3384_v40 = vpop.f32.mrb[52].mxu1 }
0x1c7e   :  { %v8201_v4 = vadd.f32 %v8198_v43, %v3384_v40  ;;  %v6749_v45 = vpop.f32.mrb[53].mxu1 }
0x1c80   :  { %v3416_v9 = vmul.f32 %v8201_v4, %v8201_v4 }
0x1c82   :  { %v3417_v54 = vsel %vm171_vm3, %v3416_v9, 0.0 }
0x1c83   :  { %3418 = vadd.xlane.f32.xlu1 %v3417_v54 }
0x1c8e   :  { %3042 = vrot.lane.b32.xlu0 %v8095_v26, %s7461_s28 }
0x1c92   :  { %3625 = vrot.lane.b32.xlu0 %v3416_v9, %s7444_s30 }
0x1cfc   :  { %v3397_v56 = vpop.xlane.xlu1 %3396 }
0x1cfd   :  { %v3394_v59 = vpop.xlane.xlu0 %3393  ;;  %v3405_v35 = vmax.f32 %v3397_v56, 1e-16 }
0x1cfe   :  { %v3404_v29 = vmax.f32 %v3394_v59, 1e-16 }
0x1cff   :  { %7343 = vrsqrt.f32 %v3405_v35 }
0x1d00   :  { %7345 = vrsqrt.f32 %v3404_v29 }
0x1d01   :  { %v3403_v17 = vpop.xlane.xlu0 %3402 }
0x1d02   :  { %v3407_v8 = vmax.f32 %v3403_v17, 1e-16 }
0x1d05   :  { %v3400_v48 = vpop.xlane.xlu0 %3399 }
0x1d06   :  { %v3406_v3 = vmax.f32 %v3400_v48, 1e-16 }
0x1d08   :  { %7347 = vrsqrt.f32 %v3406_v3 }
0x1d09   :  { %v3043_v5 = vpop.permute.xlu0 %3042  ;;  %v7344_v26 = vpop.eup %7343  ;;  %7349 = vrsqrt.f32 %v3407_v8 }
0x1d0a   :  { %6713 = vmatpush3.msk.msra.mxu0 %vm8778_vm8, %v3043_v5  ;;  %v7346_v63 = vpop.eup %7345  ;;  %v3413_v12 = vmul.f32 %v7344_v26, %v8161_v11  ;;  %vm8785_vm8 = vcmask 130048  }
0x1d0b   :  { %6715 = vmatmul.mubr.msk.f32.vlgmr.msra.gmra.mrb[40].mxu0 %vm8771_vm7, %v8121_v1  ;;  %6734 = vmatprep.subr.mxu0 %v7442_v2  ;;  %vm8786_vm7 = vcmask 1040384  }
0x1d0c   :  { %6735 = vmatpush3.msk.msra.mxu0 %vm8779_vm15, %v8103_v60  ;;  %6717 = vmatprep.mubr.msk.f32.mxu0 %vm7443_vm1, %v7442_v2  ;;  %v3412_v60 = vmul.f32 %v7346_v63, %v8163_v57  ;;  %vm8787_vm15 = vmmov %vm8785_vm8 }
0x1d0d   :  { %7140 = vmatprep.subr.bf16.mxu0 %v7445_v13 }
0x1d0e   :  { %v7141_v62 = vpack.c.bf16 %v3413_v12, %v3412_v60 }
0x1d0f   :  { %6718 = vmatmul.mubr.msk.f32.gmra.mrb[42].mxu0 %vm8780_vm9, %v8127_v15  ;;  %vm8788_vm9 = vmmov %vm8785_vm8 }
0x1d10   :  { %6720 = vmatprep.mubr.msk.f32.mxu0 %vm7443_vm1, %v7442_v2  ;;  %v3419_v7 = vpop.xlane.xlu1 %3418 }
0x1d11   :  { %v3420_v37 = vmax.f32 %v3419_v7, 1e-16 }
0x1d12   :  { %v7348_v14 = vpop.eup %7347 }
0x1d13   :  { %6721 = vmatmul.mubr.msk.f32.gmra.mrb[44].mxu0 %vm8781_vm2, %v8144_v30  ;;  %7351 = vrsqrt.f32 %v3420_v37  ;;  %v7350_v36 = vpop.eup %7349  ;;  %v3414_v38 = vmul.f32 %v7348_v14, %v8176_v10  ;;  %vm8789_vm2 = vmmov %vm8785_vm8 }
0x1d14   :  { %6736 = vmatprep.mubr.msk.f32.mxu0 %vm7443_vm1, %v7442_v2  ;;  %v3415_v39 = vmul.f32 %v7350_v36, %v8173_v52 }
0x1d17   :  { %6737 = vmatmul.mubr.msk.f32.vlgmr.msra.gmra.mrb[46].mxu0 %vm8782_vm14, %v7814_v32  ;;  %v7145_v32 = vpack.c.bf16 %v3415_v39, %v3414_v38  ;;  %v3626_v38 = vpop.permute.xlu0 %3625  ;;  %vm8790_vm14 = vmmov %vm8789_vm2 }
0x1d18   :  { %7143 = vmatpush3.bf16.xpose.msk.msra.mxu0 %vm7539_vm4, %v7141_v62  ;;  %6739 = vmatprep.mubr.msk.f32.mxu0 %vm7443_vm1, %v7442_v2  ;;  %v3628_v39 = vsel %vm171_vm3, %v3626_v38, 0.0 }
0x1d19   :  { %7144 = vmatprep.subr.bf16.mxu0 %v7445_v13 }
0x1d1b   :  { %6740 = vmatmul.mubr.msk.f32.gmra.mrb[48].mxu0 %vm8783_vm12, %v7820_v33  ;;  %vm8791_vm12 = vmmov %vm8789_vm2 }
0x1d1c   :  { %6742 = vmatprep.mubr.msk.f32.mxu0 %vm7443_vm1, %v7442_v2 }
0x1d1d   :  { %v7352_v40 = vpop.eup %7351 }
0x1d1e   :  { %v3422_v33 = vmul.f32 %v7352_v40, %v8201_v4 }
0x1d1f   :  { %6743 = vmatmul.mubr.msk.f32.gmra.mrb[50].mxu0 %vm8784_vm13, %v7832_v34  ;;  %vm8792_vm13 = vmmov %vm8789_vm2 }
0x1d20   :  { %7147 = vmatpush3.bf16.xpose.msk.msra.mxu0 %vm7539_vm4, %v7145_v32  ;;  %6758 = vmatprep.mubr.msk.f32.mxu0 %vm7443_vm1, %v7442_v2 }
0x1d21   :  { %7158 = vmatprep.subr.bf16.mxu0 %v7445_v13 }
0x1d27   :  { %6759 = vmatmul.mubr.msk.f32.vlgmr.msra.gmra.mrb[52].mxu0 %vm8785_vm8, %v3422_v33  ;;  %vm8793_vm8 = vmmov %vm8786_vm7 }
0x1d28   :  { %6787 = vmatprep.mubr.msk.f32.mxu0 %vm7443_vm1, %v7442_v2 }
0x1dde   :  { %v3121_v45 = vpop.f32.mrb[40].mxu0 }
0x1ddf   :  { %v3219_v9 = vsub.f32 1.0, %v3121_v45  ;;  %v6716_v54 = vpop.f32.mrb[41].mxu0 }
0x1de1   :  { %v3222_v34 = vmul.f32 %v3219_v9, %v7934_v31 }
0x1de2   :  { %v3126_v56 = vpop.f32.mrb[42].mxu0 }
0x1de3   :  { %v8254_v59 = vadd.f32 %v3222_v34, %v8184_v23  ;;  %v3220_v35 = vsub.f32 1.0, %v3126_v56  ;;  %v6719_v29 = vpop.f32.mrb[43].mxu0 }
0x1de5   :  { %v3223_v17 = vmul.f32 %v3220_v35, %v7937_v41  ;;  %v3603_v34 = vmul.f32 %v8254_v59, %v8254_v59 }
0x1de6   :  { %v3131_v48 = vpop.f32.mrb[44].mxu0 }
0x1de7   :  { %v8258_v3 = vadd.f32 %v3223_v17, %v8190_v19  ;;  %v3221_v5 = vsub.f32 1.0, %v3131_v48  ;;  %v6722_v8 = vpop.f32.mrb[45].mxu0  ;;  %v3606_v56 = vsel %vm8788_vm9, %v3603_v34, 0.0  ;;  %vm8796_vm9 = vcmask 457728  }
0x1de9   :  { %v3224_v26 = vmul.f32 %v3221_v5, %v7946_v47  ;;  %v8263_v63 = vpack.c.bf16 %v8258_v3, %v8254_v59  ;;  %v3604_v32 = vmul.f32 %v8258_v3, %v8258_v3 }
0x1dea   :  { %v3296_v31 = vpop.f32.mrb[46].mxu0 }
0x1deb   :  { %v8266_v23 = vadd.f32 %v3224_v26, %v8193_v46  ;;  %v8269_v7 = vadd.f32 %v3296_v31, %v7943_v6  ;;  %v6738_v41 = vpop.f32.mrb[47].mxu0  ;;  %7160 = vmatpush3.bf16.msra.mxu0 %v8263_v63 }
0x1dec   :  { %6785 = vmatprep.subr.mxu0 %v7442_v2 }
0x1ded   :  { %v3605_v35 = vmul.f32 %v8266_v23, %v8266_v23 }
0x1dee   :  { %v3301_v19 = vpop.f32.mrb[48].mxu0 }
0x1def   :  { %v8274_v12 = vadd.f32 %v3301_v19, %v7950_v51  ;;  %v6741_v47 = vpop.f32.mrb[49].mxu0  ;;  %6786 = vmatpush3.msra.mxu0 %v8266_v23  ;;  %v3612_v29 = vsel %vm8789_vm2, %v3605_v35, 0.0  ;;  %vm8797_vm2 = vcmask 588800  }
0x1df0   :  { %7164 = vmatprep.subr.bf16.mxu0 %v7445_v13 }
0x1df2   :  { %v3306_v60 = vpop.f32.mrb[50].mxu0 }
0x1df3   :  { %v8279_v46 = vadd.f32 %v3306_v60, %v7956_v55  ;;  %v6744_v6 = vpop.f32.mrb[51].mxu0  ;;  %v3609_v55 = vsel %vm8787_vm15, %v3604_v32, 0.0 }
0x1dfa   :  { %v3504_v37 = vpop.f32.mrb[52].mxu0 }
0x1dfb   :  { %3509 = vrot.lane.b32.xlu1 %v3504_v37, %s7444_s30  ;;  %v6760_v62 = vpop.f32.mrb[53].mxu0 }
0x1e6d   :  { %v3510_v14 = vpop.permute.xlu1 %3509 }
0x1e6e   :  { %v3512_v36 = vsel %vm8786_vm7, %v3504_v37, %v3510_v14  ;;  %vm8794_vm7 = vcmask 91136  }
0x1e6f   :  { %v3513_v51 = vsel %vm171_vm3, %v3512_v36, -inf  ;;  %vm8795_vm15 = vmmov %vm8794_vm7 }
0x1e70   :  { %3514 = vmax.xlane.f32.xlu1 %v3513_v51 }
0x1e74   :  { %3629 = vadd.xlane.f32.xlu1 %v3628_v39 }
0x1e78   :  { %3610 = vadd.xlane.f32.xlu1 %v3609_v55 }
0x1efd   :  { %v3515_v40 = vpop.xlane.xlu1 %3514 }
0x1efe   :  { %v3516_v33 = vsub.f32 %v3512_v36, %v3515_v40 }
0x1f00   :  { %v3517_v45 = vmul.f32 1.442695, %v3516_v33 }
0x1f01   :  { %v3630_v17 = vpop.xlane.xlu1 %3629 }
0x1f02   :  { %7353 = vpow2.f32 %v3517_v45  ;;  %v3631_v48 = vmax.f32 %v3630_v17, 1e-16  ;;  %v7162_v45 = vpack.c.bf16 %v8274_v12, %v8269_v7 }
0x1f04   :  { %7355 = vrsqrt.f32 %v3631_v48 }
0x1f05   :  { %v3611_v47 = vpop.xlane.xlu1 %3610 }
0x1f06   :  { %v3616_v6 = vmax.f32 %v3611_v47, 1e-16 }
0x1f0c   :  { %v7354_v9 = vpop.eup %7353 }
0x1f0d   :  { %v3519_v54 = vsel %vm171_vm3, %v7354_v9, 0.0 }
0x1f0e   :  { %3520 = vadd.xlane.f32.xlu0 %v3519_v54  ;;  %v7356_v5 = vpop.eup %7355 }
0x1f0f   :  { %v3633_v8 = vmul.f32 %v7356_v5, %v8201_v4 }
0x1f12   :  { %3607 = vadd.xlane.f32.xlu0 %v3606_v56 }
0x1f16   :  { %3613 = vadd.xlane.f32.xlu0 %v3612_v29 }
0x1f2c   :  { %3635 = vrot.lane.b32.xlu0 %v3633_v8, %s7444_s30 }
0x1f9b   :  { %v3521_v26 = vpop.xlane.xlu0 %3520 }
0x1f9c   :  { %7357 = vrcp.f32 %v3521_v26 }
0x1f9f   :  { %v3608_v19 = vpop.xlane.xlu0 %3607 }
0x1fa0   :  { %v3615_v60 = vmax.f32 %v3608_v19, 1e-16 }
0x1fa2   :  { %7359 = vrsqrt.f32 %v3615_v60 }
0x1fa3   :  { %7361 = vrsqrt.f32 %v3616_v6  ;;  %v3614_v37 = vpop.xlane.xlu0 %3613 }
0x1fa4   :  { %v3617_v62 = vmax.f32 %v3614_v37, 1e-16 }
0x1fa6   :  { %v7358_v31 = vpop.eup %7357  ;;  %7363 = vrsqrt.f32 %v3617_v62 }
0x1fa7   :  { %v3523_v41 = vmul.f32 %v7358_v31, %v7354_v9  ;;  %v3636_v9 = vpop.permute.xlu0 %3635 }
0x1fa9   :  { %3525 = vrot.lane.b32.xlu1 %v3523_v41, %s7449_s10 }
0x1fac   :  { %v7360_v14 = vpop.eup %7359 }
0x1fad   :  { %v7362_v36 = vpop.eup %7361  ;;  %v3621_v4 = vmul.f32 %v7360_v14, %v8254_v59  ;;  %v8366_v14 = vld [vmem:[%s8734_s3 + $0x60] sm:$0xff] }
0x1fae   :  { %v3622_v38 = vmul.f32 %v7362_v36, %v8258_v3 }
0x1fb0   :  { %v7155_v55 = vpack.c.bf16 %v3622_v38, %v3621_v4  ;;  %v7364_v40 = vpop.eup %7363 }
0x1fb1   :  { %v3623_v33 = vmul.f32 %v7364_v40, %v8266_v23 }
0x201b   :  { %v3526_v51 = vpop.permute.xlu1 %3525 }
0x201c   :  { %v3528_v39 = vsel %vm8790_vm14, %v3523_v41, %v3526_v51  ;;  %vm8798_vm14 = vcmask 850944  }
0x201d   :  { %v3529_v32 = vmul.f32 %v3528_v39, %v7636_v28 }
0x201f   :  { %6770 = vmatmul.mubr.msk.f32.vlgmr.msra.gmra.mrb[54].mxu1 %vm277_vm5, %v3529_v32 }
0x2020   :  { %7157 = vmatpush3.bf16.xpose.msk.msra.mxu1 %vm7539_vm4, %v7155_v55  ;;  %6778 = vmatprep.mubr.msk.f32.mxu1 %vm7443_vm1, %v7442_v2 }
0x2021   :  { %6776 = vmatprep.subr.mxu1 %v7442_v2 }
0x2028   :  { %6777 = vmatpush3.xpose.msk.msra.mxu1 %vm8791_vm12, %v3623_v33  ;;  %vm8799_vm12 = vcmask 550336  }
0x2029   :  { %7161 = vmatprep.subr.bf16.mxu1 %v7445_v13 }
0x202b   :  { %6779 = vmatmul.mubr.msk.f32.vlgmr.msra.gmra.mrb[56].mxu1 %vm8792_vm13, %v3636_v9  ;;  %vm8800_vm13 = vcmask 189504  }
0x202c   :  { %7163 = vmatpush3.bf16.msra.mxu1 %v7162_v45  ;;  %6796 = vmatprep.mubr.msk.f32.mxu1 %vm7443_vm1, %v7442_v2 }
0x202d   :  { %6794 = vmatprep.subr.mxu1 %v7442_v2 }
0x2030   :  { %6795 = vmatpush3.msra.mxu1 %v8279_v46 }
0x2031   :  { %6808 = vmatprep.subr.mxu1 %v7442_v2 }
0x20f2   :  { %v3599_v54 = vpop.f32.mrb[54].mxu1 }
0x20f3   :  { %v6771_v34 = vpop.f32.mrb[55].mxu1 }
0x20fe   :  { %v3714_v56 = vpop.f32.mrb[56].mxu1 }
0x20ff   :  { %3719 = vrot.lane.b32.xlu1 %v3714_v56, %s7446_s8  ;;  %v6780_v35 = vpop.f32.mrb[57].mxu1 }
0x2171   :  { %v3720_v29 = vpop.permute.xlu1 %3719 }
0x2172   :  { %v3722_v17 = vsel %vm8793_vm8, %v3714_v56, %v3720_v29  ;;  %vm8801_vm8 = vcmask 58368  }
0x2173   :  { %v3723_v48 = vsel %vm8794_vm7, %v3722_v17, -inf }
0x2174   :  { %3724 = vmax.xlane.f32.xlu1 %v3723_v48 }
0x2201   :  { %v3725_v5 = vpop.xlane.xlu1 %3724 }
0x2202   :  { %v3726_v8 = vsub.f32 %v3722_v17, %v3725_v5 }
0x2204   :  { %v3727_v26 = vmul.f32 1.442695, %v3726_v8 }
0x2206   :  { %7365 = vpow2.f32 %v3727_v26 }
0x2210   :  { %v7366_v31 = vpop.eup %7365 }
0x2211   :  { %v3729_v41 = vsel %vm8795_vm15, %v7366_v31, 0.0  ;;  %vm8802_vm15 = vcmask 130048  }
0x2212   :  { %3730 = vadd.xlane.f32.xlu0 %v3729_v41 }
0x229f   :  { %v3731_v19 = vpop.xlane.xlu0 %3730 }
0x22a0   :  { %7367 = vrcp.f32 %v3731_v19 }
0x22aa   :  { %v7368_v47 = vpop.eup %7367 }
0x22ab   :  { %v3733_v60 = vmul.f32 %v7368_v47, %v7366_v31 }
0x22ad   :  { %3735 = vrot.lane.b32.xlu0 %v3733_v60, %s7447_s9 }
0x22b1   :  { %4162 = vrot.lane.b32.xlu0 %v3599_v54, %s7451_s17 }
0x231f   :  { %v3736_v6 = vpop.permute.xlu0 %3735 }
0x2320   :  { %v3738_v37 = vsel %vm457_vm10, %v3733_v60, %v3736_v6 }
0x2321   :  { %v3739_v62 = vmul.f32 %v3738_v37, %v7582_v49 }
0x2323   :  { %6788 = vmatmul.mubr.msk.f32.vlgmr.msra.gmra.mrb[54].mxu0 %vm460_vm11, %v3739_v62  ;;  %6797 = vmatmul.mubr.msk.f32.vlgmr.msra.gmra.mrb[58].mxu1 %vm460_vm11, %v3739_v62  ;;  %v4163_v26 = vpop.permute.xlu0 %4162 }
0x2324   :  { %7166 = vmatpush3.bf16.msra.mxu0 %v8263_v63  ;;  %6809 = vmatpush3.xpose.msk.msra.mxu1 %vm457_vm10, %v3733_v60  ;;  %v4180_v47 = vsel %vm89_vm0, %v8153_v27, %v4163_v26 }
0x2325   :  { %6803 = vmatprep.subr.mxu0 %v7442_v2  ;;  %6810 = vmatprep.mubr.msk.f32.mxu1 %vm7443_vm1, %v7442_v2 }
0x2326   :  { %6805 = vmatprep.mubr.msk.f32.mxu0 %vm7443_vm1, %v7442_v2  ;;  %7170 = vmatprep.subr.bf16.mxu1 %v7445_v13 }
0x2327   :  { %6811 = vmatmul.mubr.msk.f32.vlgmr.msra.gmra.mrb[60].mxu1 %vm457_vm10, %v8269_v7 }
0x2328   :  { %6804 = vmatpush3.msra.mxu0 %v8266_v23  ;;  %6813 = vmatprep.mubr.msk.f32.mxu1 %vm7443_vm1, %v7442_v2 }
0x2329   :  { %7167 = vmatprep.subr.bf16.mxu0 %v7445_v13  ;;  %7172 = vmatpush3.bf16.msra.mxu1 %v7672_v42 }
0x232a   :  { %7173 = vmatprep.subr.bf16.mxu1 %v7445_v13 }
0x232b   :  { %6814 = vmatmul.mubr.msk.f32.gmra.mrb[62].mxu1 %vm457_vm10, %v8274_v12 }
0x232c   :  { %6816 = vmatprep.mubr.msk.f32.mxu1 %vm7443_vm1, %v7442_v2 }
0x232d   :  { %7175 = vmatpush3.bf16.msra.mxu1 %v7678_v44 }
0x232e   :  { %7176 = vmatprep.subr.bf16.mxu1 %v7445_v13 }
0x232f   :  { %6817 = vmatmul.mubr.msk.f32.gmra.mrb[64].mxu1 %vm457_vm10, %v8279_v46 }
0x2330   :  { %6854 = vmatprep.mubr.msk.f32.mxu1 %vm7443_vm1, %v7442_v2 }
0x2331   :  { %7178 = vmatpush3.bf16.msra.mxu1 %v7689_v50 }
0x2332   :  { %7179 = vmatprep.subr.bf16.mxu1 %v7445_v13 }
0x2335   :  { %7181 = vmatpush3.bf16.msra.mxu1 %v7699_v53 }
0x2336   :  { %7182 = vmatprep.subr.bf16.mxu1 %v7445_v13 }
0x2339   :  { %7184 = vmatpush3.bf16.msra.mxu1 %v7710_v58 }
0x233a   :  { %7185 = vmatprep.subr.bf16.mxu1 %v7445_v13 }
0x233d   :  { %7187 = vmatpush3.bf16.msra.mxu1 %v7720_v61 }
0x233e   :  { %6852 = vmatprep.subr.mxu1 %v7442_v2 }
0x2341   :  { %6853 = vmatpush3.msra.mxu1 %v8366_v14 }
0x2342   :  { %6884 = vmatprep.subr.mxu1 %v7442_v2 }
0x23f6   :  { %v3809_v36 = vpop.f32.mrb[54].mxu0  ;;  %v3879_v4 = vpop.f32.mrb[58].mxu1 }
0x23f7   :  { %3884 = vrot.lane.b32.xlu1 %v3879_v4, %s7447_s9  ;;  %v6798_v51 = vpop.f32.mrb[59].mxu1  ;;  %4166 = vrot.lane.b32.xlu0 %v3809_v36, %s7452_s24  ;;  %v6789_v38 = vpop.f32.mrb[55].mxu0 }
0x23fa   :  { %v4039_v39 = vpop.f32.mrb[60].mxu1 }
0x23fb   :  { %v6812_v32 = vpop.f32.mrb[61].mxu1  ;;  %v4053_v9 = vmul.f32 %v4039_v39, %v7620_v20 }
0x23fc   :  { %v8416_v32 = vld [vmem:[%s8737_s6] ss:$0 sm:$0xff] }
0x23fe   :  { %v4044_v55 = vpop.f32.mrb[62].mxu1 }
0x23ff   :  { %v6815_v40 = vpop.f32.mrb[63].mxu1  ;;  %v4054_v54 = vmul.f32 %v4044_v55, %v7624_v22 }
0x2402   :  { %v4049_v33 = vpop.f32.mrb[64].mxu1 }
0x2403   :  { %v6818_v45 = vpop.f32.mrb[65].mxu1  ;;  %v4055_v34 = vmul.f32 %v4049_v33, %v7628_v24 }
0x2420   :  { %4056 = vxpose.xlu1.b32.start [1/3] (short) (narrow) %v4053_v9, 8 }
0x2424   :  { %4057 = vxpose.xlu1.b32.cont [2/3] (short) (narrow) %v4054_v54, 8 }
0x2428   :  { %4058 = vxpose.xlu1.b32.end [3/3] (short) (narrow) %v4055_v34, 8 }
0x2469   :  { %v3885_v56 = vpop.permute.xlu1 %3884  ;;  %v4167_v31 = vpop.permute.xlu0 %4166 }
0x246a   :  { %v3887_v35 = vsel %vm457_vm10, %v3879_v4, %v3885_v56  ;;  %v4181_v60 = vsel %vm460_vm11, %v4180_v47, %v4167_v31  ;;  %v8406_v4 = vld [vmem:[%s8735_s4] ss:$0 sm:$0xff] }
0x246b   :  { %v3888_v29 = vmul.f32 %v3887_v35, %v7582_v49 }
0x246d   :  { %6806 = vmatmul.mubr.msk.f32.vlgmr.msra.gmra.mrb[56].mxu0 %vm460_vm11, %v3888_v29 }
0x246e   :  { %7169 = vmatpush3.bf16.msra.mxu0 %v8263_v63  ;;  %6825 = vmatprep.mubr.msk.f32.mxu0 %vm7443_vm1, %v7442_v2 }
0x246f   :  { %6823 = vmatprep.subr.mxu0 %v7442_v2 }
0x2472   :  { %6824 = vmatpush3.msra.mxu0 %v8266_v23 }
0x2473   :  { %7188 = vmatprep.subr.bf16.mxu0 %v7445_v13 }
0x24a0   :  { %v4072_v17 = vpop.trf.xlu1 }
0x24a1   :  { %6826 = vmatmul.mubr.msk.f32.vlgmr.msra.gmra.mrb[58].mxu0 %vm460_vm11, %v4072_v17 }
0x24a2   :  { %7190 = vmatpush3.bf16.msra.mxu0 %v7751_v18  ;;  %6865 = vmatprep.mubr.msk.f32.mxu0 %vm7443_vm1, %v7442_v2 }
0x24a3   :  { %7191 = vmatprep.subr.bf16.mxu0 %v7445_v13 }
0x24a6   :  { %7193 = vmatpush3.bf16.msra.mxu0 %v7757_v21 }
0x2540   :  { %v3958_v63 = vpop.f32.mrb[56].mxu0 }
0x2541   :  { %4170 = vrot.lane.b32.xlu0 %v3958_v63, %s7453_s14  ;;  %v6807_v48 = vpop.f32.mrb[57].mxu0 }
0x2574   :  { %v4157_v5 = vpop.f32.mrb[58].mxu0 }
0x2575   :  { %4174 = vrot.lane.b32.xlu0 %v4157_v5, %s7454_s22  ;;  %v6827_v8 = vpop.f32.mrb[59].mxu0 }
0x2579   :  { %4177 = vrot.lane.b32.xlu0 %v8079_v0, %s7456_s19 }
0x25b3   :  { %v4171_v41 = vpop.permute.xlu0 %4170 }
0x25b4   :  { %v4182_v6 = vsel %vm894_vm6, %v4181_v60, %v4171_v41 }
0x25e7   :  { %v4175_v19 = vpop.permute.xlu0 %4174 }
0x25e8   :  { %v4183_v37 = vsel %vm8796_vm9, %v4182_v6, %v4175_v19  ;;  %vm8803_vm9 = vcmask 1041408  }
0x25eb   :  { %v4178_v62 = vpop.permute.xlu0 %4177 }
0x25ec   :  { %v4184_v36 = vsel %vm8797_vm2, %v4183_v37, %v4178_v62  ;;  %vm8804_vm2 = vmmov %vm8803_vm9 }
0x25ed   :  { %6855 = vmatmul.mubr.msk.f32.vlgmr.msra.gmra.mrb[66].mxu1 %vm8798_vm14, %v4184_v36  ;;  %vm8805_vm14 = vmmov %vm8804_vm2 }
0x25ee   :  { %6886 = vmatprep.mubr.msk.f32.mxu1 %vm7443_vm1, %v7442_v2 }
0x26c0   :  { %v4254_v0 = vpop.f32.mrb[66].mxu1 }
0x26c1   :  { %v4255_v27 = vadd.f32 %v8406_v4, %v4254_v0  ;;  %v6856_v51 = vpop.f32.mrb[67].mxu1 }
0x26c3   :  { %7369 = vtanh.f32 %v4255_v27 }
0x26cd   :  { %v8409_v38 = vpop.eup %7369 }
0x26ce   :  { %6866 = vmatmul.mubr.msk.f32.vlgmr.msra.gmra.mrb[60].mxu0 %vm277_vm5, %v8409_v38 }
0x27a1   :  { %v4328_v39 = vpop.f32.mrb[60].mxu0 }
0x27a2   :  { %v4329_v55 = vadd.f32 %v8416_v32, %v4328_v39  ;;  %v6867_v40 = vpop.f32.mrb[61].mxu0 }
0x27a4   :  { %v4356_v33 = vsel %vm8799_vm12, %v4329_v55, -inf  ;;  %v4334_v45 = vsel %vm8800_vm13, %v4329_v55, -inf  ;;  %4333 = vst.msk [vmem:[#allocation2 + $0x4] sm:$0x3] %vm8801_vm8, %v4329_v55  ;;  %v6076_v31 = vmul.f32 -1.442695, %v4329_v55  ;;  %vm8808_vm8 = vmmov %vm8804_vm2 }
0x27a5   :  { %4357 = vmax.xlane.f32.xlu1 %v4356_v33  ;;  %4335 = vmax.xlane.f32.xlu0 %v4334_v45  ;;  %vm8806_vm12 = vcmask 15360  }
0x27a6   :  { %vm8807_vm13 = vmmov %vm8806_vm12 }
0x2832   :  { %v4358_v9 = vpop.xlane.xlu1 %4357  ;;  %v4336_v54 = vpop.xlane.xlu0 %4335 }
0x2833   :  { %v4337_v34 = vsub.f32 %v4329_v55, %v4336_v54  ;;  %v4359_v56 = vsub.f32 %v4329_v55, %v4358_v9 }
0x2835   :  { %v4338_v35 = vmul.f32 1.442695, %v4337_v34  ;;  %v4360_v29 = vmul.f32 1.442695, %v4359_v56 }
0x2837   :  { %7371 = vpow2.f32 %v4338_v35 }
0x2838   :  { %7373 = vpow2.f32 %v4360_v29 }
0x2839   :  { %7375 = vpow2.f32 %v6076_v31 }
0x2841   :  { %v7372_v17 = vpop.eup %7371 }
0x2842   :  { %4341 = vrot.lane.b32.xlu0 %v7372_v17, %s7455_s18  ;;  %v7374_v63 = vpop.eup %7373 }
0x2843   :  { %v7376_v19 = vpop.eup %7375 }
0x2844   :  { %v4352_v60 = vadd.f32 1.0, %v7376_v19 }
0x2846   :  { %4363 = vrot.lane.b32.xlu0 %v7374_v63, %s7456_s19 }
0x28b4   :  { %v4342_v48 = vpop.permute.xlu0 %4341 }
0x28b5   :  { %v4344_v5 = vsel %vm171_vm3, %v4342_v48, 0.0 }
0x28b6   :  { %4345 = vadd.xlane.f32.xlu0 %v4344_v5 }
0x28b8   :  { %v4364_v8 = vpop.permute.xlu0 %4363 }
0x28b9   :  { %v4366_v26 = vsel %vm8794_vm7, %v4364_v8, 0.0  ;;  %vm8809_vm7 = vmmov %vm8806_vm12 }
0x28ba   :  { %4367 = vadd.xlane.f32.xlu1 %v4366_v26 }
0x2943   :  { %v4346_v41 = vpop.xlane.xlu0 %4345 }
0x2944   :  { %7377 = vrcp.f32 %v4346_v41 }
0x2947   :  { %v4368_v47 = vpop.xlane.xlu1 %4367 }
0x2948   :  { %7379 = vrcp.f32 %v4368_v47 }
0x2949   :  { %7381 = vrcp.f32 %v4352_v60 }
0x294a   :  { %7383 = vtanh.f32 %v4329_v55 }
0x294e   :  { %v7378_v6 = vpop.eup %7377 }
0x294f   :  { %v4348_v37 = vmul.f32 %v7378_v6, %v7372_v17 }
0x2951   :  { %4372 = vrot.lane.b32.xlu1 %v4348_v37, %s7455_s18 }
0x2952   :  { %v7380_v62 = vpop.eup %7379 }
0x2953   :  { %v4370_v36 = vmul.f32 %v7380_v62, %v7374_v63  ;;  %v8429_v0 = vpop.eup %7381 }
0x2954   :  { %v7384_v27 = vpop.eup %7383 }
0x2955   :  { %4617 = vrot.lane.b32.xlu0 %v4370_v36, %s7456_s19  ;;  %4375 = vrot.lane.b32.xlu1 %v4348_v37, %s7451_s17 }
0x2959   :  { %4413 = vrot.lane.b32.xlu1 %v8429_v0, %s7459_s23 }
0x295d   :  { %4515 = vrot.lane.b32.xlu1 %v7384_v27, %s7457_s20 }
0x2961   :  { %4620 = vrot.lane.b32.xlu1 %v4370_v36, %s7458_s21 }
0x2965   :  { %4750 = vrot.lane.b32.xlu1 %v7384_v27, %s7460_s25 }
0x29c3   :  { %v4373_v51 = vpop.permute.xlu1 %4372 }
0x29c7   :  { %v4376_v39 = vpop.permute.xlu1 %4375  ;;  %v8441_v9 = vpop.permute.xlu0 %4617 }
0x29c8   :  { %v4378_v55 = vsel %vm8802_vm15, %v4373_v51, %v4376_v39  ;;  %vm8810_vm15 = vmmov %vm8809_vm7 }
0x29c9   :  { %v4379_v40 = vmul.f32 %v4378_v55, %v7636_v28 }
0x29cb   :  { %4380 = vxpose.xlu1.b32.start.end [1/1] (short) (narrow) %v4379_v40, 32  ;;  %v4414_v33 = vpop.permute.xlu1 %4413 }
0x29cc   :  { %6868 = vmatprep.subr.msk.mxu0 %vm8803_vm9, %v4414_v33  ;;  %vm8811_vm9 = vmmov %vm8809_vm7 }
0x29cd   :  { %6869 = vmatpush3.msk.msra.mxu0 %vm8804_vm2, %v4414_v33  ;;  %vm8812_vm2 = vmmov %vm8809_vm7 }
0x29cf   :  { %v4516_v45 = vpop.permute.xlu1 %4515 }
0x29d0   :  { %6876 = vmatprep.subr.msk.mxu0 %vm8805_vm14, %v4516_v45  ;;  %vm8813_vm14 = vmmov %vm8808_vm8 }
0x29d3   :  { %v4621_v54 = vpop.permute.xlu1 %4620 }
0x29d4   :  { %v4623_v34 = vsel %vm457_vm10, %v8441_v9, %v4621_v54 }
0x29d5   :  { %v4624_v56 = vmul.f32 %v4623_v34, %v7582_v49 }
0x29d7   :  { %4625 = vxpose.xlu0.b32.start.end [1/1] (short) (narrow) %v4624_v56, 24  ;;  %v4751_v35 = vpop.permute.xlu1 %4750 }
0x2a4b   :  { %v4396_v29 = vpop.trf.xlu1 }
0x2a4c   :  { %6870 = vmatprep.mubr.msk.f32.mxu0 %vm8806_vm12, %v4396_v29  ;;  %vm8814_vm12 = vmmov %vm8812_vm2 }
0x2a4f   :  { %v4397_v17 = vpop.trf.xlu1 }
0x2a50   :  { %6871 = vmatmul.mubr.msk.f32.vlgmr.msra.gmra.mrb[62].mxu0 %vm8807_vm13, %v4397_v17  ;;  %vm8815_vm13 = vmmov %vm8812_vm2 }
0x2a51   :  { %6877 = vmatpush3.msk.msra.mxu0 %vm8808_vm8, %v4516_v45  ;;  %vm8816_vm8 = vmmov %vm8812_vm2 }
0x2a52   :  { %6895 = vmatprep.subr.mxu0 %v7442_v2 }
0x2a53   :  { %v4398_v63 = vpop.trf.xlu1 }
0x2a54   :  { %6873 = vmatprep.mubr.msk.f32.mxu0 %vm8809_vm7, %v4398_v63  ;;  %vm8817_vm7 = vmmov %vm8812_vm2 }
0x2a57   :  { %v4399_v48 = vpop.trf.xlu1  ;;  %v8456_v5 = vpop.trf.xlu0 }
0x2a58   :  { %6874 = vmatmul.mubr.msk.f32.gmra.mrb[64].mxu0 %vm8810_vm15, %v4399_v48  ;;  %vm8818_vm15 = vmmov %vm8812_vm2 }
0x2a59   :  { %6878 = vmatprep.mubr.msk.f32.mxu0 %vm8811_vm9, %v4396_v29  ;;  %vm8819_vm9 = vcmask 130048  }
0x2a5b   :  { %v8462_v8 = vpop.trf.xlu0 }
0x2a5c   :  { %6879 = vmatmul.mubr.msk.f32.vlgmr.msra.gmra.mrb[66].mxu0 %vm8812_vm2, %v4397_v17  ;;  %vm8820_vm2 = vmmov %vm8819_vm9 }
0x2a5d   :  { %6896 = vmatpush3.msk.msra.mxu0 %vm8813_vm14, %v4751_v35  ;;  %6881 = vmatprep.mubr.msk.f32.mxu0 %vm8814_vm12, %v4398_v63  ;;  %vm8821_vm14 = vmmov %vm8820_vm2 }
0x2a5e   :  { %6917 = vmatprep.subr.mxu0 %v7442_v2  ;;  %vm8822_vm12 = vmmov %vm8820_vm2 }
0x2a5f   :  { %v8474_v26 = vpop.trf.xlu0 }
0x2a60   :  { %6882 = vmatmul.mubr.msk.f32.gmra.mrb[68].mxu0 %vm8815_vm13, %v4399_v48  ;;  %vm8823_vm13 = vcmask 1041408  }
0x2a61   :  { %6897 = vmatprep.mubr.msk.f32.mxu0 %vm7443_vm1, %v7442_v2 }
0x2a64   :  { %6898 = vmatmul.mubr.msk.f32.vlgmr.msra.gmra.mrb[70].mxu0 %vm8816_vm8, %v8456_v5  ;;  %vm8824_vm8 = vmmov %vm8817_vm7 }
0x2a65   :  { %6900 = vmatprep.mubr.msk.f32.mxu0 %vm7443_vm1, %v7442_v2  ;;  %6918 = vmatpush3.msra.mxu0 %v8136_v25  ;;  %v8483_v25 = vld [vmem:[%s8731_s0 + $0x6] sm:$0x3]  ;;  %s7462_s0 = smov [#allocation2]  }
0x2a66   :  { %7202 = vmatprep.subr.bf16.mxu0 %v7445_v13 }
0x2a68   :  { %6901 = vmatmul.mubr.msk.f32.gmra.mrb[72].mxu0 %vm8817_vm7, %v8462_v8  ;;  %vm8825_vm7 = vmmov %vm8823_vm13 }
0x2a69   :  { %6903 = vmatprep.mubr.msk.f32.mxu0 %vm7443_vm1, %v7442_v2 }
0x2a6c   :  { %6904 = vmatmul.mubr.msk.f32.gmra.mrb[74].mxu0 %vm8818_vm15, %v8474_v26  ;;  %vm8826_vm15 = vmmov %vm8824_vm8 }
0x2a6d   :  { %6919 = vmatprep.mubr.msk.f32.mxu0 %vm7443_vm1, %v7442_v2 }
0x2a70   :  { %6920 = vmatmul.mubr.msk.f32.vlgmr.msra.gmra.mrb[76].mxu0 %vm89_vm0, %v8483_v25 }
0x2a71   :  { %6941 = vmatprep.mubr.msk.f32.mxu0 %vm7443_vm1, %v7442_v2 }
0x2b23   :  { %v6872_v31 = vpop.f32.mrb[62].mxu0 }
0x2b24   :  { %v4495_v41 = vpop.f32.mrb[63].mxu0  ;;  %v4605_v19 = vsub.f32 1.0, %v6872_v31 }
0x2b25   :  { %v4604_v47 = vsub.f32 1.0, %v4495_v41 }
0x2b26   :  { %v4609_v62 = vmul.f32 %v4605_v19, %v8161_v11 }
0x2b27   :  { %v4608_v51 = vmul.f32 %v4604_v47, %v8163_v57 }
0x2b2b   :  { %v6875_v60 = vpop.f32.mrb[64].mxu0 }
0x2b2c   :  { %v4505_v6 = vpop.f32.mrb[65].mxu0  ;;  %v4607_v37 = vsub.f32 1.0, %v6875_v60 }
0x2b2d   :  { %v4606_v36 = vsub.f32 1.0, %v4505_v6 }
0x2b2e   :  { %v4611_v33 = vmul.f32 %v4607_v37, %v8173_v52 }
0x2b2f   :  { %v6880_v27 = vpop.f32.mrb[66].mxu0  ;;  %v4610_v56 = vmul.f32 %v4606_v36, %v8176_v10 }
0x2b30   :  { %v8491_v39 = vadd.f32 %v6880_v27, %v4609_v62  ;;  %v4585_v55 = vpop.f32.mrb[67].mxu0 }
0x2b31   :  { %v4612_v40 = vadd.f32 %v4608_v51, %v4585_v55 }
0x2b32   :  { %v5004_v45 = vmul.f32 %v8491_v39, %v8491_v39 }
0x2b33   :  { %v7203_v54 = vpack.c.bf16 %v8491_v39, %v4612_v40  ;;  %v6883_v34 = vpop.f32.mrb[68].mxu0  ;;  %v5003_v35 = vmul.f32 %v4612_v40, %v4612_v40 }
0x2b34   :  { %v8498_v11 = vadd.f32 %v6883_v34, %v4611_v33  ;;  %v4595_v29 = vpop.f32.mrb[69].mxu0  ;;  %v5010_v57 = vsel %vm8819_vm9, %v5004_v45, 0.0  ;;  %vm8827_vm9 = vmmov %vm8824_vm8 }
0x2b35   :  { %v8501_v17 = vadd.f32 %v4610_v56, %v4595_v29  ;;  %5011 = vadd.xlane.f32.xlu1 %v5010_v57  ;;  %7204 = vmatpush3.bf16.msra.mxu0 %v7203_v54  ;;  %v5007_v52 = vsel %vm8820_vm2, %v5003_v35, 0.0  ;;  %vm8828_vm2 = vmmov %vm8824_vm8 }
0x2b36   :  { %5008 = vadd.xlane.f32.xlu0 %v5007_v52  ;;  %7205 = vmatprep.subr.bf16.mxu0 %v7445_v13  ;;  %v5006_v63 = vmul.f32 %v8498_v11, %v8498_v11 }
0x2b37   :  { %v7206_v10 = vpack.c.bf16 %v8498_v11, %v8501_v17  ;;  %v8509_v48 = vpop.f32.mrb[70].mxu0  ;;  %v5005_v31 = vmul.f32 %v8501_v17, %v8501_v17 }
0x2b38   :  { %v5016_v41 = vsel %vm8821_vm14, %v5006_v63, 0.0  ;;  %v6899_v19 = vpop.f32.mrb[71].mxu0  ;;  %vm8829_vm14 = vmmov %vm8828_vm2 }
0x2b39   :  { %5017 = vadd.xlane.f32.xlu1 %v5016_v41  ;;  %7207 = vmatpush3.bf16.msra.mxu0 %v7206_v10  ;;  %v5013_v47 = vsel %vm8822_vm12, %v5005_v31, 0.0  ;;  %vm8830_vm12 = vmmov %vm8828_vm2 }
0x2b3a   :  { %5014 = vadd.xlane.f32.xlu0 %v5013_v47  ;;  %7208 = vmatprep.subr.bf16.mxu0 %v7445_v13 }
0x2b3b   :  { %v8516_v60 = vpop.f32.mrb[72].mxu0 }
0x2b3c   :  { %v6902_v6 = vpop.f32.mrb[73].mxu0 }
0x2b3f   :  { %v8518_v37 = vpop.f32.mrb[74].mxu0 }
0x2b40   :  { %v6905_v62 = vpop.f32.mrb[75].mxu0 }
0x2b43   :  { %v4999_v36 = vpop.f32.mrb[76].mxu0 }
0x2b44   :  { %v8521_v27 = vadd.f32 %v8198_v43, %v4999_v36  ;;  %v6921_v51 = vpop.f32.mrb[77].mxu0 }
0x2b46   :  { %v8525_v55 = vmul.f32 %v8521_v27, %v8521_v27 }
0x2b48   :  { %v5032_v33 = vsel %vm171_vm3, %v8525_v55, 0.0 }
0x2b49   :  { %5033 = vadd.xlane.f32.xlu0 %v5032_v33 }
0x2b4a   :  { %4657 = vrot.lane.b32.xlu1 %v8429_v0, %s7461_s28 }
0x2bc2   :  { %v5012_v45 = vpop.xlane.xlu1 %5011 }
0x2bc3   :  { %v5020_v54 = vmax.f32 %v5012_v45, 1e-16  ;;  %v5009_v34 = vpop.xlane.xlu0 %5008 }
0x2bc4   :  { %v5019_v56 = vmax.f32 %v5009_v34, 1e-16 }
0x2bc5   :  { %7385 = vrsqrt.f32 %v5020_v54 }
0x2bc6   :  { %7387 = vrsqrt.f32 %v5019_v56  ;;  %v5018_v43 = vpop.xlane.xlu1 %5017 }
0x2bc7   :  { %v5015_v35 = vpop.xlane.xlu0 %5014  ;;  %v5022_v29 = vmax.f32 %v5018_v43, 1e-16 }
0x2bc8   :  { %v5021_v57 = vmax.f32 %v5015_v35, 1e-16 }
0x2bc9   :  { %7389 = vrsqrt.f32 %v5022_v29 }
0x2bca   :  { %v4658_v52 = vpop.permute.xlu1 %4657  ;;  %7391 = vrsqrt.f32 %v5021_v57 }
0x2bcb   :  { %6885 = vmatpush3.msk.msra.mxu1 %vm8823_vm13, %v4658_v52  ;;  %vm8831_vm13 = vcmask 130048  }
0x2bcc   :  { %6887 = vmatmul.mubr.msk.f32.vlgmr.msra.gmra.mrb[68].mxu1 %vm8824_vm8, %v8456_v5  ;;  %6906 = vmatprep.subr.mxu1 %v7442_v2  ;;  %vm8832_vm8 = vcmask 1040384  }
0x2bcd   :  { %6907 = vmatpush3.msk.msra.mxu1 %vm8825_vm7, %v8441_v9  ;;  %6889 = vmatprep.mubr.msk.f32.mxu1 %vm7443_vm1, %v7442_v2  ;;  %vm8833_vm7 = vmmov %vm8831_vm13 }
0x2bce   :  { %7194 = vmatprep.subr.bf16.mxu1 %v7445_v13 }
0x2bcf   :  { %v7386_v0 = vpop.eup %7385 }
0x2bd0   :  { %v7388_v63 = vpop.eup %7387  ;;  %6890 = vmatmul.mubr.msk.f32.gmra.mrb[70].mxu1 %vm8826_vm15, %v8462_v8  ;;  %v5028_v5 = vmul.f32 %v7386_v0, %v8491_v39  ;;  %vm8834_vm15 = vmmov %vm8833_vm7 }
0x2bd1   :  { %6892 = vmatprep.mubr.msk.f32.mxu1 %vm7443_vm1, %v7442_v2  ;;  %v5027_v10 = vmul.f32 %v7388_v63, %v4612_v40 }
0x2bd3   :  { %v7390_v31 = vpop.eup %7389  ;;  %v7195_v19 = vpack.c.bf16 %v5028_v5, %v5027_v10 }
0x2bd4   :  { %6893 = vmatmul.mubr.msk.f32.gmra.mrb[72].mxu1 %vm8827_vm9, %v8474_v26  ;;  %v7392_v47 = vpop.eup %7391  ;;  %v5030_v8 = vmul.f32 %v7390_v31, %v8498_v11  ;;  %vm8835_vm9 = vmmov %vm8833_vm7 }
0x2bd5   :  { %6908 = vmatprep.mubr.msk.f32.mxu1 %vm7443_vm1, %v7442_v2  ;;  %v5029_v26 = vmul.f32 %v7392_v47, %v8501_v17 }
0x2bd6   :  { %v5034_v9 = vpop.xlane.xlu0 %5033 }
0x2bd7   :  { %v5035_v41 = vmax.f32 %v5034_v9, 1e-16 }
0x2bd8   :  { %6909 = vmatmul.mubr.msk.f32.vlgmr.msra.gmra.mrb[74].mxu1 %vm8828_vm2, %v8121_v1  ;;  %v7199_v1 = vpack.c.bf16 %v5030_v8, %v5029_v26 }
0x2bd9   :  { %7393 = vrsqrt.f32 %v5035_v41  ;;  %7197 = vmatpush3.bf16.xpose.msk.msra.mxu1 %vm7539_vm4, %v7195_v19  ;;  %6911 = vmatprep.mubr.msk.f32.mxu1 %vm7443_vm1, %v7442_v2 }
0x2bda   :  { %7198 = vmatprep.subr.bf16.mxu1 %v7445_v13 }
0x2bdc   :  { %6912 = vmatmul.mubr.msk.f32.gmra.mrb[76].mxu1 %vm8829_vm14, %v8127_v15  ;;  %vm8839_vm14 = vmmov %vm8832_vm8 }
0x2bdd   :  { %6914 = vmatprep.mubr.msk.f32.mxu1 %vm7443_vm1, %v7442_v2 }
0x2be0   :  { %6915 = vmatmul.mubr.msk.f32.gmra.mrb[78].mxu1 %vm8830_vm12, %v8144_v30  ;;  %vm8840_vm12 = vcmask 91136  }
0x2be1   :  { %7201 = vmatpush3.bf16.xpose.msk.msra.mxu1 %vm7539_vm4, %v7199_v1  ;;  %6930 = vmatprep.mubr.msk.f32.mxu1 %vm7443_vm1, %v7442_v2 }
0x2be2   :  { %7212 = vmatprep.subr.bf16.mxu1 %v7445_v13 }
0x2be3   :  { %v7394_v39 = vpop.eup %7393 }
0x2be4   :  { %v5037_v40 = vmul.f32 %v7394_v39, %v8521_v27 }
0x2be8   :  { %6931 = vmatmul.mubr.msk.f32.vlgmr.msra.gmra.mrb[80].mxu1 %vm8831_vm13, %v5037_v40  ;;  %vm8841_vm13 = vmmov %vm8840_vm12 }
0x2be9   :  { %6959 = vmatprep.mubr.msk.f32.mxu1 %vm7443_vm1, %v7442_v2 }
0x2c9f   :  { %v4736_v15 = vpop.f32.mrb[68].mxu1 }
0x2ca0   :  { %v4834_v11 = vsub.f32 1.0, %v4736_v15  ;;  %v6888_v17 = vpop.f32.mrb[69].mxu1 }
0x2ca2   :  { %v4837_v30 = vmul.f32 %v4834_v11, %v8254_v59 }
0x2ca3   :  { %v4741_v6 = vpop.f32.mrb[70].mxu1 }
0x2ca4   :  { %v8575_v62 = vadd.f32 %v4837_v30, %v8509_v48  ;;  %v4835_v36 = vsub.f32 1.0, %v4741_v6  ;;  %v6891_v51 = vpop.f32.mrb[71].mxu1 }
0x2ca6   :  { %v4838_v33 = vmul.f32 %v4835_v36, %v8258_v3  ;;  %v5218_v31 = vmul.f32 %v8575_v62, %v8575_v62 }
0x2ca7   :  { %v4746_v45 = vpop.f32.mrb[72].mxu1 }
0x2ca8   :  { %v8579_v54 = vadd.f32 %v4838_v33, %v8516_v60  ;;  %v4836_v34 = vsub.f32 1.0, %v4746_v45  ;;  %v6894_v56 = vpop.f32.mrb[73].mxu1  ;;  %v5221_v41 = vsel %vm8833_vm7, %v5218_v31, 0.0 }
0x2caa   :  { %v4839_v43 = vmul.f32 %v4836_v34, %v8266_v23  ;;  %v8584_v35 = vpack.c.bf16 %v8579_v54, %v8575_v62  ;;  %v5219_v11 = vmul.f32 %v8579_v54, %v8579_v54 }
0x2cab   :  { %v8586_v59 = vpop.f32.mrb[74].mxu1 }
0x2cac   :  { %v8589_v48 = vadd.f32 %v4839_v43, %v8518_v37  ;;  %v6910_v29 = vpop.f32.mrb[75].mxu1  ;;  %7214 = vmatpush3.bf16.msra.mxu1 %v8584_v35  ;;  %v5224_v6 = vsel %vm8835_vm9, %v5219_v11, 0.0 }
0x2cad   :  { %6957 = vmatprep.subr.mxu1 %v7442_v2 }
0x2cae   :  { %v5220_v19 = vmul.f32 %v8589_v48, %v8589_v48 }
0x2caf   :  { %v8593_v3 = vpop.f32.mrb[76].mxu1 }
0x2cb0   :  { %v6913_v60 = vpop.f32.mrb[77].mxu1  ;;  %6958 = vmatpush3.msra.mxu1 %v8589_v48 }
0x2cb1   :  { %7218 = vmatprep.subr.bf16.mxu1 %v7445_v13 }
0x2cb3   :  { %v8597_v23 = vpop.f32.mrb[78].mxu1 }
0x2cb4   :  { %v6916_v57 = vpop.f32.mrb[79].mxu1 }
0x2cbb   :  { %v5119_v52 = vpop.f32.mrb[80].mxu1 }
0x2cbc   :  { %5124 = vrot.lane.b32.xlu0 %v5119_v52, %s7444_s30  ;;  %v6932_v37 = vpop.f32.mrb[81].mxu1 }
0x2cc0   :  { %5240 = vrot.lane.b32.xlu0 %v8525_v55, %s7444_s30  ;;  %v5227_v55 = vsel %vm8834_vm15, %v5220_v19, 0.0 }
0x2d2e   :  { %v5125_v0 = vpop.permute.xlu0 %5124 }
0x2d2f   :  { %v5127_v63 = vsel %vm8832_vm8, %v5119_v52, %v5125_v0  ;;  %vm8844_vm8 = vcmask 850944  }
0x2d30   :  { %v5128_v5 = vsel %vm171_vm3, %v5127_v63, -inf }
0x2d31   :  { %5129 = vmax.xlane.f32.xlu1 %v5128_v5 }
0x2d32   :  { %v5241_v10 = vpop.permute.xlu0 %5240 }
0x2d33   :  { %v5243_v9 = vsel %vm171_vm3, %v5241_v10, 0.0 }
0x2d35   :  { %5244 = vadd.xlane.f32.xlu1 %v5243_v9 }
0x2d39   :  { %5222 = vadd.xlane.f32.xlu1 %v5221_v41 }
0x2d3d   :  { %5228 = vadd.xlane.f32.xlu1 %v5227_v55 }
0x2dbe   :  { %v5130_v47 = vpop.xlane.xlu1 %5129 }
0x2dbf   :  { %v5131_v8 = vsub.f32 %v5127_v63, %v5130_v47 }
0x2dc1   :  { %v5132_v26 = vmul.f32 1.442695, %v5131_v8 }
0x2dc2   :  { %v5245_v1 = vpop.xlane.xlu1 %5244 }
0x2dc3   :  { %7395 = vpow2.f32 %v5132_v26  ;;  %v5246_v39 = vmax.f32 %v5245_v1, 1e-16 }
0x2dc5   :  { %7397 = vrsqrt.f32 %v5246_v39 }
0x2dc6   :  { %v5223_v34 = vpop.xlane.xlu1 %5222 }
0x2dc7   :  { %v5230_v43 = vmax.f32 %v5223_v34, 1e-16 }
0x2dca   :  { %v5229_v29 = vpop.xlane.xlu1 %5228 }
0x2dcb   :  { %v5232_v60 = vmax.f32 %v5229_v29, 1e-16 }
0x2dcd   :  { %v7396_v40 = vpop.eup %7395 }
0x2dce   :  { %v5134_v15 = vsel %vm171_vm3, %v7396_v40, 0.0  ;;  %vm8836_vm3 = vmmov %vm8833_vm7 }
0x2dcf   :  { %v7398_v17 = vpop.eup %7397  ;;  %5135 = vadd.xlane.f32.xlu0 %v5134_v15  ;;  %vm8837_vm2 = vmmov %vm8836_vm3 }
0x2dd0   :  { %v5248_v30 = vmul.f32 %v7398_v17, %v8521_v27 }
0x2dd2   :  { %5250 = vrot.lane.b32.xlu1 %v5248_v30, %s7444_s30  ;;  %s5954_s30 = sshll.u32 %s7462_s0, 4  ;;  %s5955_s30 = int_to_ptr.vmem [resolvable:$true] %s5954_s30 }
0x2dd3   :  { %5225 = vadd.xlane.f32.xlu0 %v5224_v6  ;;  %p7423_p1 = scmp.lt.s32.totalorder %s5955_s30, %s5955_s30 }
0x2e44   :  { %v5251_v31 = vpop.permute.xlu1 %5250 }
0x2e5c   :  { %v5136_v36 = vpop.xlane.xlu0 %5135 }
0x2e5d   :  { %7399 = vrcp.f32 %v5136_v36 }
0x2e60   :  { %v5226_v45 = vpop.xlane.xlu0 %5225 }
0x2e61   :  { %v5231_v56 = vmax.f32 %v5226_v45, 1e-16 }
0x2e63   :  { %7401 = vrsqrt.f32 %v5231_v56 }
0x2e64   :  { %7403 = vrsqrt.f32 %v5230_v43 }
0x2e65   :  { %7405 = vrsqrt.f32 %v5232_v60 }
0x2e67   :  { %v7400_v51 = vpop.eup %7399 }
0x2e68   :  { %v5138_v33 = vmul.f32 %v7400_v51, %v7396_v40 }
0x2e6a   :  { %5140 = vrot.lane.b32.xlu0 %v5138_v33, %s7449_s10 }
0x2e6d   :  { %v7402_v27 = vpop.eup %7401 }
0x2e6e   :  { %v7404_v57 = vpop.eup %7403  ;;  %v5237_v52 = vmul.f32 %v7402_v27, %v8579_v54  ;;  %v4926_v54 = vadd.f32 %v8593_v3, %v8274_v12  ;;  %v4927_v12 = vadd.f32 %v8597_v23, %v8279_v46 }
0x2e6f   :  { %v5236_v0 = vmul.f32 %v7404_v57, %v8575_v62  ;;  %v7406_v9 = vpop.eup %7405 }
0x2e70   :  { %v5238_v62 = vmul.f32 %v7406_v9, %v8589_v48 }
0x2e71   :  { %v7209_v10 = vpack.c.bf16 %v5237_v52, %v5236_v0 }
0x2edc   :  { %v5141_v37 = vpop.permute.xlu0 %5140 }
0x2edd   :  { %v5143_v63 = vsel %vm8836_vm3, %v5138_v33, %v5141_v37 }
0x2ede   :  { %v5144_v5 = vmul.f32 %v5143_v63, %v7636_v28  ;;  %v4925_v28 = vadd.f32 %v8586_v59, %v8269_v7 }
0x2ee0   :  { %6942 = vmatmul.mubr.msk.f32.vlgmr.msra.gmra.mrb[78].mxu0 %vm277_vm5, %v5144_v5  ;;  %v7216_v16 = vpack.c.bf16 %v4926_v54, %v4925_v28 }
0x2ee1   :  { %7211 = vmatpush3.bf16.xpose.msk.msra.mxu0 %vm7539_vm4, %v7209_v10  ;;  %6950 = vmatprep.mubr.msk.f32.mxu0 %vm7443_vm1, %v7442_v2  ;;  %vm8838_vm4 = vmmov %vm8837_vm2 }
0x2ee2   :  { %6948 = vmatprep.subr.mxu0 %v7442_v2 }
0x2ee9   :  { %6949 = vmatpush3.xpose.msk.msra.mxu0 %vm8837_vm2, %v5238_v62 }
0x2eea   :  { %7215 = vmatprep.subr.bf16.mxu0 %v7445_v13 }
0x2eec   :  { %6951 = vmatmul.mubr.msk.f32.vlgmr.msra.gmra.mrb[80].mxu0 %vm8838_vm4, %v5251_v31 }
0x2eed   :  { %7217 = vmatpush3.bf16.msra.mxu0 %v7216_v16  ;;  %6968 = vmatprep.mubr.msk.f32.mxu0 %vm7443_vm1, %v7442_v2 }
0x2eee   :  { %6966 = vmatprep.subr.mxu0 %v7442_v2 }
0x2ef1   :  { %6967 = vmatpush3.msra.mxu0 %v4927_v12 }
0x2ef2   :  { %6980 = vmatprep.subr.mxu0 %v7442_v2 }
0x2fb3   :  { %v5214_v7 = vpop.f32.mrb[78].mxu0 }
0x2fb4   :  { %v6943_v59 = vpop.f32.mrb[79].mxu0 }
0x2fbf   :  { %v5329_v3 = vpop.f32.mrb[80].mxu0 }
0x2fc0   :  { %5334 = vrot.lane.b32.xlu1 %v5329_v3, %s7446_s8  ;;  %v6952_v41 = vpop.f32.mrb[81].mxu0  ;;  %s7418_s8 = scalar_lea.vmem %s5955_s30, 128 }
0x2fc1   :  { %p7419_p0 = scmp.ne.s32.totalorder %s5955_s30, %s7418_s8  ;;  %p7424_p2 = scmp.lt.s32.totalorder %s7418_s8, %s7418_s8 }
0x2fc3   :  { %p7425_p3 = por %p7424_p2, %p7423_p1 }
0x2fc5   :  { %p7426_p4 = pnand %p7425_p3, %p7419_p0 }
0x3032   :  { %v5335_v19 = vpop.permute.xlu1 %5334 }
0x3033   :  { %v5337_v55 = vsel %vm8839_vm14, %v5329_v3, %v5335_v19 }
0x3034   :  { %v5338_v47 = vsel %vm8840_vm12, %v5337_v55, -inf }
0x3035   :  { %5339 = vmax.xlane.f32.xlu0 %v5338_v47 }
0x30c2   :  { %v5340_v8 = vpop.xlane.xlu0 %5339 }
0x30c3   :  { %v5341_v26 = vsub.f32 %v5337_v55, %v5340_v8 }
0x30c5   :  { %v5342_v1 = vmul.f32 1.442695, %v5341_v26 }
0x30c7   :  { %7407 = vpow2.f32 %v5342_v1 }
0x30d1   :  { %v7408_v46 = vpop.eup %7407 }
0x30d2   :  { %v5344_v23 = vsel %vm8841_vm13, %v7408_v46, 0.0 }
0x30d3   :  { %5345 = vadd.xlane.f32.xlu1 %v5344_v23 }
0x3160   :  { %v5346_v39 = vpop.xlane.xlu1 %5345 }
0x3161   :  { %7409 = vrcp.f32 %v5346_v39 }
0x316b   :  { %v7410_v40 = vpop.eup %7409 }
0x316c   :  { %v5348_v15 = vmul.f32 %v7410_v40, %v7408_v46 }
0x316e   :  { %5350 = vrot.lane.b32.xlu0 %v5348_v15, %s7447_s9 }
0x31e0   :  { %v5351_v11 = vpop.permute.xlu0 %5350 }
0x31e1   :  { %v5353_v17 = vsel %vm457_vm10, %v5348_v15, %v5351_v11 }
0x31e2   :  { %v5354_v30 = vmul.f32 %v5353_v17, %v7582_v49 }
0x31e4   :  { %6960 = vmatmul.mubr.msk.f32.vlgmr.msra.gmra.mrb[82].mxu1 %vm460_vm11, %v5354_v30  ;;  %6969 = vmatmul.mubr.msk.f32.vlgmr.msra.gmra.mrb[82].mxu0 %vm460_vm11, %v5354_v30 }
0x31e5   :  { %7220 = vmatpush3.bf16.msra.mxu1 %v8584_v35  ;;  %6981 = vmatpush3.xpose.msk.msra.mxu0 %vm457_vm10, %v5348_v15 }
0x31e6   :  { %6975 = vmatprep.subr.mxu1 %v7442_v2  ;;  %6982 = vmatprep.mubr.msk.f32.mxu0 %vm7443_vm1, %v7442_v2 }
0x31e7   :  { %6977 = vmatprep.mubr.msk.f32.mxu1 %vm7443_vm1, %v7442_v2  ;;  %7224 = vmatprep.subr.bf16.mxu0 %v7445_v13 }
0x31e8   :  { %6983 = vmatmul.mubr.msk.f32.vlgmr.msra.gmra.mrb[84].mxu0 %vm457_vm10, %v4925_v28 }
0x31e9   :  { %6976 = vmatpush3.msra.mxu1 %v8589_v48  ;;  %6985 = vmatprep.mubr.msk.f32.mxu0 %vm7443_vm1, %v7442_v2 }
0x31ea   :  { %7221 = vmatprep.subr.bf16.mxu1 %v7445_v13  ;;  %7226 = vmatpush3.bf16.msra.mxu0 %v7672_v42 }
0x31eb   :  { %7227 = vmatprep.subr.bf16.mxu0 %v7445_v13 }
0x31ec   :  { %6986 = vmatmul.mubr.msk.f32.gmra.mrb[86].mxu0 %vm457_vm10, %v4926_v54 }
0x31ed   :  { %6988 = vmatprep.mubr.msk.f32.mxu0 %vm7443_vm1, %v7442_v2 }
0x31ee   :  { %7229 = vmatpush3.bf16.msra.mxu0 %v7678_v44 }
0x31ef   :  { %7230 = vmatprep.subr.bf16.mxu0 %v7445_v13 }
0x31f0   :  { %6989 = vmatmul.mubr.msk.f32.gmra.mrb[88].mxu0 %vm457_vm10, %v4927_v12 }
0x31f1   :  { %7026 = vmatprep.mubr.msk.f32.mxu0 %vm7443_vm1, %v7442_v2 }
0x31f2   :  { %7232 = vmatpush3.bf16.msra.mxu0 %v7689_v50 }
0x31f3   :  { %7233 = vmatprep.subr.bf16.mxu0 %v7445_v13 }
0x31f6   :  { %7235 = vmatpush3.bf16.msra.mxu0 %v7699_v53 }
0x31f7   :  { %7236 = vmatprep.subr.bf16.mxu0 %v7445_v13 }
0x31fa   :  { %7238 = vmatpush3.bf16.msra.mxu0 %v7710_v58 }
0x31fb   :  { %7239 = vmatprep.subr.bf16.mxu0 %v7445_v13 }
0x31fe   :  { %7241 = vmatpush3.bf16.msra.mxu0 %v7720_v61 }
0x31ff   :  { %7024 = vmatprep.subr.mxu0 %v7442_v2 }
0x3202   :  { %7025 = vmatpush3.msra.mxu0 %v8366_v14 }
0x32b7   :  { %v5424_v42 = vpop.f32.mrb[82].mxu1  ;;  %v5494_v44 = vpop.f32.mrb[82].mxu0 }
0x32b8   :  { %5499 = vrot.lane.b32.xlu1 %v5494_v44, %s7447_s9  ;;  %v6961_v50 = vpop.f32.mrb[83].mxu1  ;;  %v6970_v6 = vpop.f32.mrb[83].mxu0 }
0x32bb   :  { %v5654_v36 = vpop.f32.mrb[84].mxu0 }
0x32bc   :  { %v5668_v53 = vmul.f32 %v5654_v36, %v7620_v20  ;;  %5777 = vrot.lane.b32.xlu1 %v5214_v7, %s7451_s17  ;;  %v6984_v58 = vpop.f32.mrb[85].mxu0 }
0x32be   :  { %5671 = vxpose.xlu0.b32.start [1/3] (short) (narrow) %v5668_v53, 8 }
0x32bf   :  { %v5659_v51 = vpop.f32.mrb[86].mxu0 }
0x32c0   :  { %v5669_v61 = vmul.f32 %v5659_v51, %v7624_v22  ;;  %v6987_v33 = vpop.f32.mrb[87].mxu0  ;;  %5781 = vrot.lane.b32.xlu1 %v5424_v42, %s7452_s24 }
0x32c2   :  { %5672 = vxpose.xlu0.b32.cont [2/3] (short) (narrow) %v5669_v61, 8 }
0x32c3   :  { %v5664_v14 = vpop.f32.mrb[88].mxu0 }
0x32c4   :  { %v5670_v45 = vmul.f32 %v5664_v14, %v7628_v24  ;;  %v6990_v34 = vpop.f32.mrb[89].mxu0 }
0x32c6   :  { %5673 = vxpose.xlu0.b32.end [3/3] (short) (narrow) %v5670_v45, 8 }
0x332a   :  { %v5500_v56 = vpop.permute.xlu1 %5499 }
0x332b   :  { %v5502_v43 = vsel %vm457_vm10, %v5494_v44, %v5500_v56  ;;  %vm8843_vm10 = vcmask 588800  }
0x332c   :  { %v5503_v20 = vmul.f32 %v5502_v43, %v7582_v49 }
0x332e   :  { %6978 = vmatmul.mubr.msk.f32.vlgmr.msra.gmra.mrb[84].mxu1 %vm460_vm11, %v5503_v20  ;;  %v5778_v29 = vpop.permute.xlu1 %5777 }
0x332f   :  { %7223 = vmatpush3.bf16.msra.mxu1 %v8584_v35  ;;  %6997 = vmatprep.mubr.msk.f32.mxu1 %vm7443_vm1, %v7442_v2 }
0x3330   :  { %6995 = vmatprep.subr.mxu1 %v7442_v2 }
0x3333   :  { %6996 = vmatpush3.msra.mxu1 %v8589_v48 }
0x3334   :  { %7242 = vmatprep.subr.bf16.mxu1 %v7445_v13 }
0x333e   :  { %v5687_v22 = vpop.trf.xlu0 }
0x333f   :  { %6998 = vmatmul.mubr.msk.f32.vlgmr.msra.gmra.mrb[86].mxu1 %vm460_vm11, %v5687_v22 }
0x3340   :  { %7244 = vmatpush3.bf16.msra.mxu1 %v7751_v18  ;;  %7037 = vmatprep.mubr.msk.f32.mxu1 %vm7443_vm1, %v7442_v2  ;;  %v5782_v18 = vpop.permute.xlu1 %5781  ;;  %v5795_v2 = vsel %vm89_vm0, %v8483_v25, %v5778_v29  ;;  %vm8842_vm1 = vcmask 457728   ;;  %vm8845_vm0 = vcmask 58368  }
0x3341   :  { %7245 = vmatprep.subr.bf16.mxu1 %v7445_v13  ;;  %v5796_v13 = vsel %vm460_vm11, %v5795_v2, %v5782_v18 }
0x3344   :  { %7247 = vmatpush3.bf16.msra.mxu1 %v7757_v21 }
0x3401   :  { %v5573_v49 = vpop.f32.mrb[84].mxu1 }
0x3402   :  { %5785 = vrot.lane.b32.xlu1 %v5573_v49, %s7453_s14  ;;  %v6979_v24 = vpop.f32.mrb[85].mxu1 }
0x3412   :  { %v5772_v35 = vpop.f32.mrb[86].mxu1 }
0x3413   :  { %5789 = vrot.lane.b32.xlu1 %v5772_v35, %s7454_s22  ;;  %v6999_v48 = vpop.f32.mrb[87].mxu1 }
0x3417   :  { %5792 = vrot.lane.b32.xlu1 %v8409_v38, %s7456_s19 }
0x3474   :  { %v5786_v60 = vpop.permute.xlu1 %5785 }
0x3475   :  { %v5797_v21 = vsel %vm894_vm6, %v5796_v13, %v5786_v60 }
0x3485   :  { %v5790_v27 = vpop.permute.xlu1 %5789 }
0x3486   :  { %v5798_v57 = vsel %vm8842_vm1, %v5797_v21, %v5790_v27 }
0x3489   :  { %v5793_v52 = vpop.permute.xlu1 %5792 }
0x348a   :  { %v5799_v37 = vsel %vm8843_vm10, %v5798_v57, %v5793_v52 }
0x348b   :  { %7027 = vmatmul.mubr.msk.f32.vlgmr.msra.gmra.mrb[90].mxu0 %vm8844_vm8, %v5799_v37 }
0x355e   :  { %v5869_v0 = vpop.f32.mrb[90].mxu0 }
0x355f   :  { %v5870_v38 = vadd.f32 %v8406_v4, %v5869_v0  ;;  %v7028_v63 = vpop.f32.mrb[91].mxu0 }
0x3561   :  { %7411 = vtanh.f32 %v5870_v38 }
0x356b   :  { %v7412_v5 = vpop.eup %7411 }
0x356c   :  { %7038 = vmatmul.mubr.msk.f32.vlgmr.msra.gmra.mrb[88].mxu1 %vm277_vm5, %v7412_v5 }
0x363f   :  { %v5943_v25 = vpop.f32.mrb[88].mxu1 }
0x3640   :  { %v5944_v10 = vadd.f32 %v8416_v32, %v5943_v25  ;;  %v7039_v9 = vpop.f32.mrb[89].mxu1 }
0x3642   :  { %5948 = vst.msk [vmem:[#allocation2 + $0x6] sm:$0x3] %vm8845_vm0, %v5944_v10 }
0x3643   :  { %7429 = shalt.err (!%p7426_p4)
}
0x3644   :  { %s7430_s17 = scalar_lea.hbm %s8738_s7, 128 }
0x3645   :  { %p7431_p5 = scmp.ne.s32.totalorder %s8738_s7, %s7430_s17  ;;  %p7434_p6 = scmp.lt.u32.totalorder %s7430_s17, %s8738_s7 }
0x3647   :  { %p7436_p7 = pnand %p7434_p6, %p7431_p5 }
0x3649   :  { %7439 = shalt.err (!%p7436_p7)
}
0x364a   :  { %s7463_s19 = smov 32   ;;  %s7464_s20 = smov 2  }
0x364b   :  { %5960 = dma.vmem_to_hbm [thread:$0]  %s5955_s30, 128, %s8738_s7, [#allocation3], %s7463_s19, %s7463_s19, %s7464_s20  }
0x364c   :  { %7440 = dma.done.wait [#allocation3], 128  }
0x364d   :  { %7441 = vsyncadd [#allocation3], 4294967168 }
0x364e   :  { %5964 = vsyncpa [#allocation3], 1 }

</bundles_post_ra>
